<compile_context>
chip_gen: v6e
topology: v6e:2x2x1
jax: 0.10.0
libtpu: 0.0.40
codegen_flags: <defaults>
</compile_context>

<pallas_src>
import jax
import jax.numpy as jnp
from jax.experimental import pallas as pl
from jax.experimental.pallas import tpu as pltpu

PACK = 8  # original rows packed into the lane axis


def _leaky_relu(x, slope=0.2):
    return jnp.where(x > 0, x, slope * x)


def band_encoder_mlp_kernel(x_ref,
                            w0_ref, b0_ref,
                            w1_ref, b1_ref,
                            w2_ref, b2_ref,
                            w3_ref, b3_ref,
                            w4_ref, b4_ref,
                            o_ref):
    # x_ref: (tile_q, PACK*pfs) bf16 — 8 original rows per packed row.
    # All weights are block-diagonal (bf16); biases are tiled (f32).
    h = jnp.dot(x_ref[...], w0_ref[...], preferred_element_type=jnp.float32)
    h = _leaky_relu(h + b0_ref[...])
    h = jnp.dot(h.astype(jnp.bfloat16), w1_ref[...], preferred_element_type=jnp.float32)
    h = _leaky_relu(h + b1_ref[...])
    h = jnp.dot(h.astype(jnp.bfloat16), w2_ref[...], preferred_element_type=jnp.float32)
    h = _leaky_relu(h + b2_ref[...])
    h = jnp.dot(h.astype(jnp.bfloat16), w3_ref[...], preferred_element_type=jnp.float32)
    h = _leaky_relu(h + b3_ref[...])
    out = jnp.dot(h.astype(jnp.bfloat16), w4_ref[...], preferred_element_type=jnp.float32)
    o_ref[...] = (out + b4_ref[...]).astype(o_ref.dtype)


def prepare_packed_params(params, *, channels, pfs, pchan, pack=PACK):
    """Build block-diagonal (row-packed) weights from base per-layer params.

    Packed lane layouts:
      input  lane = r*pfs + f       (r = sub-row in [0, pack))
      hidden lane = r*channels + c
      output lane = p*pack + r      (channel-major -> cheap NCHW unpack)
    """
    w0, b0, w1, b1, w2, b2, w3, b3, w4, b4 = params
    P = pack
    eye = jnp.eye(P, dtype=jnp.float32)

    blk = lambda w: jnp.kron(eye, w)          # block-diagonal repeat
    tileb = lambda b: jnp.tile(b, (1, P))     # bias per block

    w0b, w1b, w2b, w3b = (blk(w) for w in (w0, w1, w2, w3))
    b0b, b1b, b2b, b3b = (tileb(b) for b in (b0, b1, b2, b3))

    # Output layer: block-diagonal, then regroup columns channel-major:
    # natural col = r*pchan + p  ->  grouped col = p*P + r
    w4bd = jnp.kron(eye, w4)                               # (P*C, P*pchan)
    w4g = w4bd.reshape(P * channels, P, pchan)
    w4g = jnp.transpose(w4g, (0, 2, 1)).reshape(P * channels, pchan * P)
    b4g = jnp.repeat(b4, P, axis=1)                        # (1, pchan*P)

    cast = lambda w: w.astype(jnp.bfloat16)
    return (cast(w0b), b0b, cast(w1b), b1b, cast(w2b), b2b,
            cast(w3b), b3b, cast(w4g), b4g)


def band_encoder_forward(x, packed_params, *, channels, pfs, pchan, block_q=512):
    """x: (B, 64*32*pfs) float32  ->  (B, pchan*64, 32) float32."""
    B = x.shape[0]
    P = PACK
    M = B * 64 * 32
    Mp = M // P

    # Free, contiguous reshape: packed row q holds original rows q*P .. q*P+P-1.
    x_packed = x.reshape(Mp, P * pfs).astype(jnp.bfloat16)

    # Tile size (packed rows): keep it large but ensure >=2 grid steps (v7x 2 TCs).
    bq = min(block_q, Mp)
    while Mp % bq != 0:
        bq //= 2
    if Mp // bq < 2 and bq >= 16:
        bq //= 2
    assert bq % 8 == 0 and Mp % bq == 0, (bq, Mp)

    w0b, b0b, w1b, b1b, w2b, b2b, w3b, b3b, w4g, b4g = packed_params

    full = lambda arr: pl.BlockSpec(arr.shape, lambda i: (0, 0))

    out_packed = pl.pallas_call(
        band_encoder_mlp_kernel,
        out_shape=jax.ShapeDtypeStruct((Mp, pchan * P), jnp.float32),
        grid_spec=pltpu.PrefetchScalarGridSpec(
            num_scalar_prefetch=0,
            grid=(Mp // bq,),
            in_specs=[
                pl.BlockSpec((bq, P * pfs), lambda i: (i, 0)),   # packed x tile
                full(w0b), full(b0b),                             # layer 0
                full(w1b), full(b1b),                             # layer 1
                full(w2b), full(b2b),                             # layer 2
                full(w3b), full(b3b),                             # layer 3
                full(w4g), full(b4g),                             # output layer
            ],
            out_specs=pl.BlockSpec((bq, pchan * P), lambda i: (i, 0)),
        ),
        compiler_params=pltpu.CompilerParams(
            dimension_semantics=("parallel",)),
    )(x_packed, w0b, b0b, w1b, b1b, w2b, b2b, w3b, b3b, w4g, b4g)

    # out_packed[q, p*P + r] = y[q*P + r, p].  Unpack to (B, pchan, 64, 32) with
    # a transpose that moves contiguous P-element chunks (partial permute fusion),
    # then flatten to (B, pchan*64, 32).
    qpb = (64 * 32) // P                                    # packed rows per batch
    out = out_packed.reshape(B, qpb, pchan, P)
    out = jnp.transpose(out, (0, 2, 1, 3))                  # (B, pchan, qpb, P)
    out = out.reshape(B, pchan * 64, 32)
    return out


def init_params(key, *, channels, pfs, pchan):
    """Deterministic synthetic parameters (PyTorch Linear shapes, stored transposed)."""
    ks = jax.random.split(key, 10)

    def lin(kw, kb, fan_in, fan_out):
        scale = 1.0 / jnp.sqrt(jnp.float32(fan_in))
        w = jax.random.uniform(kw, (fan_in, fan_out), jnp.float32, -scale, scale)
        b = jax.random.uniform(kb, (1, fan_out), jnp.float32, -scale, scale)
        return w, b

    w0, b0 = lin(ks[0], ks[1], pfs, channels)
    w1, b1 = lin(ks[2], ks[3], channels, channels)
    w2, b2 = lin(ks[4], ks[5], channels, channels)
    w3, b3 = lin(ks[6], ks[7], channels, channels)
    w4, b4 = lin(ks[8], ks[9], channels, pchan)
    return (w0, b0, w1, b1, w2, b2, w3, b3, w4, b4)


def reference_forward(x, params, *, channels, pfs, pchan):
    """Pure-JAX f32 reference for correctness checking."""
    B = x.shape[0]
    w0, b0, w1, b1, w2, b2, w3, b3, w4, b4 = params
    h = x.reshape(B, 64, 32, pfs)
    h = _leaky_relu(h @ w0 + b0[0])
    h = _leaky_relu(h @ w1 + b1[0])
    h = _leaky_relu(h @ w2 + b2[0])
    h = _leaky_relu(h @ w3 + b3[0])
    h = h @ w4 + b4[0]
    h = jnp.transpose(h, (0, 3, 1, 2))
    return h.reshape(B, pchan * 64, 32)


if __name__ == "__main__":
    # Small, self-consistent shapes.
    batch = 2
    channels = 32                  # hidden width of LinearOutputStack
    periodicity_feature_size = 16  # pfs
    periodicity_channels = 8       # pchan

    key = jax.random.PRNGKey(0)
    k_x, k_p = jax.random.split(key)

    x = jax.random.normal(
        k_x, (batch, 64 * 32 * periodicity_feature_size), dtype=jnp.float32)

    params = init_params(k_p, channels=channels,
                         pfs=periodicity_feature_size,
                         pchan=periodicity_channels)
    packed_params = prepare_packed_params(
        params, channels=channels, pfs=periodicity_feature_size,
        pchan=periodicity_channels)

    out = band_encoder_forward(
        x, packed_params,
        channels=channels, pfs=periodicity_feature_size,
        pchan=periodicity_channels, block_q=512)
    out = jax.block_until_ready(out)

    assert out.shape == (batch, periodicity_channels * 64, 32), out.shape

    ref = reference_forward(
        x, params,
        channels=channels, pfs=periodicity_feature_size,
        pchan=periodicity_channels)
    ref = jax.block_until_ready(ref)

    err = float(jnp.max(jnp.abs(out - ref)))
    # bf16 matmul operands (f32 accumulation) -> relaxed tolerance vs f32 reference.
    assert err < 3e-2, f"max abs err {err}"

    print("KERNEL_OK")
</pallas_src>

<mosaic_0001>
module attributes {stable_mosaic.version = 11 : i64} {
  func.func @band_encoder_mlp_kernel(%arg0: i32, %arg1: memref<256x128xbf16, #tpu.memory_space<vmem>>, %arg2: memref<128x256xbf16, #tpu.memory_space<vmem>>, %arg3: memref<1x256xf32, #tpu.memory_space<vmem>>, %arg4: memref<256x256xbf16, #tpu.memory_space<vmem>>, %arg5: memref<1x256xf32, #tpu.memory_space<vmem>>, %arg6: memref<256x256xbf16, #tpu.memory_space<vmem>>, %arg7: memref<1x256xf32, #tpu.memory_space<vmem>>, %arg8: memref<256x256xbf16, #tpu.memory_space<vmem>>, %arg9: memref<1x256xf32, #tpu.memory_space<vmem>>, %arg10: memref<256x64xbf16, #tpu.memory_space<vmem>>, %arg11: memref<1x64xf32, #tpu.memory_space<vmem>>, %arg12: memref<256x64xf32, #tpu.memory_space<vmem>>) attributes {dimension_semantics = [#tpu.dimension_semantics<parallel>], iteration_bounds = array<i64: 2>, scalar_prefetch = 0 : i64, scratch_operands = 0 : i64, tpu.core_type = #tpu.core_type<tc>, window_params = [{transform_indices = @transform_0, window_bounds = array<i64: 256, 128>}, {pipeline_mode = #tpu.pipeline_mode<synchronous>, transform_indices = @transform_1, window_bounds = array<i64: 128, 256>}, {pipeline_mode = #tpu.pipeline_mode<synchronous>, transform_indices = @transform_2, window_bounds = array<i64: 1, 256>}, {pipeline_mode = #tpu.pipeline_mode<synchronous>, transform_indices = @transform_3, window_bounds = array<i64: 256, 256>}, {pipeline_mode = #tpu.pipeline_mode<synchronous>, transform_indices = @transform_4, window_bounds = array<i64: 1, 256>}, {pipeline_mode = #tpu.pipeline_mode<synchronous>, transform_indices = @transform_5, window_bounds = array<i64: 256, 256>}, {pipeline_mode = #tpu.pipeline_mode<synchronous>, transform_indices = @transform_6, window_bounds = array<i64: 1, 256>}, {pipeline_mode = #tpu.pipeline_mode<synchronous>, transform_indices = @transform_7, window_bounds = array<i64: 256, 256>}, {pipeline_mode = #tpu.pipeline_mode<synchronous>, transform_indices = @transform_8, window_bounds = array<i64: 1, 256>}, {pipeline_mode = #tpu.pipeline_mode<synchronous>, transform_indices = @transform_9, window_bounds = array<i64: 256, 64>}, {pipeline_mode = #tpu.pipeline_mode<synchronous>, transform_indices = @transform_10, window_bounds = array<i64: 1, 64>}, {transform_indices = @transform_11, window_bounds = array<i64: 256, 64>}]} {
    %c0 = arith.constant 0 : index
    %c0_0 = arith.constant 0 : index
    %0 = vector.load %arg1[%c0, %c0_0] : memref<256x128xbf16, #tpu.memory_space<vmem>>, vector<256x128xbf16>
    %c0_1 = arith.constant 0 : index
    %c0_2 = arith.constant 0 : index
    %1 = vector.load %arg2[%c0_1, %c0_2] : memref<128x256xbf16, #tpu.memory_space<vmem>>, vector<128x256xbf16>
    %cst = arith.constant dense<0.000000e+00> : vector<256x256xf32>
    %2 = tpu.matmul %0, %1, %cst {dimension_numbers = #tpu.dot_dimension_numbers<[1], [0], [0], [1], [0, 0, 1, 1], [], []>} : vector<256x128xbf16>, vector<128x256xbf16>, vector<256x256xf32> -> vector<256x256xf32>
    %c0_3 = arith.constant 0 : index
    %c0_4 = arith.constant 0 : index
    %3 = vector.load %arg3[%c0_3, %c0_4] : memref<1x256xf32, #tpu.memory_space<vmem>>, vector<1x256xf32>
    %4 = vector.broadcast %3 : vector<1x256xf32> to vector<256x256xf32>
    %5 = arith.addf %2, %4 : vector<256x256xf32>
    %cst_5 = arith.constant 0.000000e+00 : f32
    %6 = vector.broadcast %cst_5 : f32 to vector<256x256xf32>
    %7 = arith.cmpf ogt, %5, %6 : vector<256x256xf32>
    %cst_6 = arith.constant 2.000000e-01 : f32
    %8 = vector.broadcast %cst_6 : f32 to vector<256x256xf32>
    %9 = arith.mulf %8, %5 : vector<256x256xf32>
    %10 = arith.select %7, %5, %9 : vector<256x256xi1>, vector<256x256xf32>
    %11 = arith.truncf %10 : vector<256x256xf32> to vector<256x256xbf16>
    %c0_7 = arith.constant 0 : index
    %c0_8 = arith.constant 0 : index
    %12 = vector.load %arg4[%c0_7, %c0_8] : memref<256x256xbf16, #tpu.memory_space<vmem>>, vector<256x256xbf16>
    %cst_9 = arith.constant dense<0.000000e+00> : vector<256x256xf32>
    %13 = tpu.matmul %11, %12, %cst_9 {dimension_numbers = #tpu.dot_dimension_numbers<[1], [0], [0], [1], [0, 0, 1, 1], [], []>} : vector<256x256xbf16>, vector<256x256xbf16>, vector<256x256xf32> -> vector<256x256xf32>
    %c0_10 = arith.constant 0 : index
    %c0_11 = arith.constant 0 : index
    %14 = vector.load %arg5[%c0_10, %c0_11] : memref<1x256xf32, #tpu.memory_space<vmem>>, vector<1x256xf32>
    %15 = vector.broadcast %14 : vector<1x256xf32> to vector<256x256xf32>
    %16 = arith.addf %13, %15 : vector<256x256xf32>
    %cst_12 = arith.constant 0.000000e+00 : f32
    %17 = vector.broadcast %cst_12 : f32 to vector<256x256xf32>
    %18 = arith.cmpf ogt, %16, %17 : vector<256x256xf32>
    %cst_13 = arith.constant 2.000000e-01 : f32
    %19 = vector.broadcast %cst_13 : f32 to vector<256x256xf32>
    %20 = arith.mulf %19, %16 : vector<256x256xf32>
    %21 = arith.select %18, %16, %20 : vector<256x256xi1>, vector<256x256xf32>
    %22 = arith.truncf %21 : vector<256x256xf32> to vector<256x256xbf16>
    %c0_14 = arith.constant 0 : index
    %c0_15 = arith.constant 0 : index
    %23 = vector.load %arg6[%c0_14, %c0_15] : memref<256x256xbf16, #tpu.memory_space<vmem>>, vector<256x256xbf16>
    %cst_16 = arith.constant dense<0.000000e+00> : vector<256x256xf32>
    %24 = tpu.matmul %22, %23, %cst_16 {dimension_numbers = #tpu.dot_dimension_numbers<[1], [0], [0], [1], [0, 0, 1, 1], [], []>} : vector<256x256xbf16>, vector<256x256xbf16>, vector<256x256xf32> -> vector<256x256xf32>
    %c0_17 = arith.constant 0 : index
    %c0_18 = arith.constant 0 : index
    %25 = vector.load %arg7[%c0_17, %c0_18] : memref<1x256xf32, #tpu.memory_space<vmem>>, vector<1x256xf32>
    %26 = vector.broadcast %25 : vector<1x256xf32> to vector<256x256xf32>
    %27 = arith.addf %24, %26 : vector<256x256xf32>
    %cst_19 = arith.constant 0.000000e+00 : f32
    %28 = vector.broadcast %cst_19 : f32 to vector<256x256xf32>
    %29 = arith.cmpf ogt, %27, %28 : vector<256x256xf32>
    %cst_20 = arith.constant 2.000000e-01 : f32
    %30 = vector.broadcast %cst_20 : f32 to vector<256x256xf32>
    %31 = arith.mulf %30, %27 : vector<256x256xf32>
    %32 = arith.select %29, %27, %31 : vector<256x256xi1>, vector<256x256xf32>
    %33 = arith.truncf %32 : vector<256x256xf32> to vector<256x256xbf16>
    %c0_21 = arith.constant 0 : index
    %c0_22 = arith.constant 0 : index
    %34 = vector.load %arg8[%c0_21, %c0_22] : memref<256x256xbf16, #tpu.memory_space<vmem>>, vector<256x256xbf16>
    %cst_23 = arith.constant dense<0.000000e+00> : vector<256x256xf32>
    %35 = tpu.matmul %33, %34, %cst_23 {dimension_numbers = #tpu.dot_dimension_numbers<[1], [0], [0], [1], [0, 0, 1, 1], [], []>} : vector<256x256xbf16>, vector<256x256xbf16>, vector<256x256xf32> -> vector<256x256xf32>
    %c0_24 = arith.constant 0 : index
    %c0_25 = arith.constant 0 : index
    %36 = vector.load %arg9[%c0_24, %c0_25] : memref<1x256xf32, #tpu.memory_space<vmem>>, vector<1x256xf32>
    %37 = vector.broadcast %36 : vector<1x256xf32> to vector<256x256xf32>
    %38 = arith.addf %35, %37 : vector<256x256xf32>
    %cst_26 = arith.constant 0.000000e+00 : f32
    %39 = vector.broadcast %cst_26 : f32 to vector<256x256xf32>
    %40 = arith.cmpf ogt, %38, %39 : vector<256x256xf32>
    %cst_27 = arith.constant 2.000000e-01 : f32
    %41 = vector.broadcast %cst_27 : f32 to vector<256x256xf32>
    %42 = arith.mulf %41, %38 : vector<256x256xf32>
    %43 = arith.select %40, %38, %42 : vector<256x256xi1>, vector<256x256xf32>
    %44 = arith.truncf %43 : vector<256x256xf32> to vector<256x256xbf16>
    %c0_28 = arith.constant 0 : index
    %c0_29 = arith.constant 0 : index
    %45 = vector.load %arg10[%c0_28, %c0_29] : memref<256x64xbf16, #tpu.memory_space<vmem>>, vector<256x64xbf16>
    %cst_30 = arith.constant dense<0.000000e+00> : vector<256x64xf32>
    %46 = tpu.matmul %44, %45, %cst_30 {dimension_numbers = #tpu.dot_dimension_numbers<[1], [0], [0], [1], [0, 0, 1, 1], [], []>} : vector<256x256xbf16>, vector<256x64xbf16>, vector<256x64xf32> -> vector<256x64xf32>
    %c0_31 = arith.constant 0 : index
    %c0_32 = arith.constant 0 : index
    %47 = vector.load %arg11[%c0_31, %c0_32] : memref<1x64xf32, #tpu.memory_space<vmem>>, vector<1x64xf32>
    %48 = vector.broadcast %47 : vector<1x64xf32> to vector<256x64xf32>
    %49 = arith.addf %46, %48 : vector<256x64xf32>
    %c0_33 = arith.constant 0 : index
    %c0_34 = arith.constant 0 : index
    %50 = vector.load %arg12[%c0_33, %c0_34] : memref<256x64xf32, #tpu.memory_space<vmem>>, vector<256x64xf32>
    tpu.vector_store %arg12[%c0_33, %c0_34], %49 {strides = array<i32>} : memref<256x64xf32, #tpu.memory_space<vmem>>, vector<256x64xf32>,
    return
  }
  func.func @transform_0(%arg0: i32) -> (i32, i32) {
    %c0_i32 = arith.constant 0 : i32
    %c0_i32_0 = arith.constant 0 : i32
    return %arg0, %c0_i32 : i32, i32
  }
  func.func @transform_1(%arg0: i32) -> (i32, i32) {
    %c0_i32 = arith.constant 0 : i32
    %c0_i32_0 = arith.constant 0 : i32
    %c0_i32_1 = arith.constant 0 : i32
    return %c0_i32, %c0_i32_0 : i32, i32
  }
  func.func @transform_2(%arg0: i32) -> (i32, i32) {
    %c0_i32 = arith.constant 0 : i32
    %c0_i32_0 = arith.constant 0 : i32
    %c0_i32_1 = arith.constant 0 : i32
    return %c0_i32, %c0_i32_0 : i32, i32
  }
  func.func @transform_3(%arg0: i32) -> (i32, i32) {
    %c0_i32 = arith.constant 0 : i32
    %c0_i32_0 = arith.constant 0 : i32
    %c0_i32_1 = arith.constant 0 : i32
    return %c0_i32, %c0_i32_0 : i32, i32
  }
  func.func @transform_4(%arg0: i32) -> (i32, i32) {
    %c0_i32 = arith.constant 0 : i32
    %c0_i32_0 = arith.constant 0 : i32
    %c0_i32_1 = arith.constant 0 : i32
    return %c0_i32, %c0_i32_0 : i32, i32
  }
  func.func @transform_5(%arg0: i32) -> (i32, i32) {
    %c0_i32 = arith.constant 0 : i32
    %c0_i32_0 = arith.constant 0 : i32
    %c0_i32_1 = arith.constant 0 : i32
    return %c0_i32, %c0_i32_0 : i32, i32
  }
  func.func @transform_6(%arg0: i32) -> (i32, i32) {
    %c0_i32 = arith.constant 0 : i32
    %c0_i32_0 = arith.constant 0 : i32
    %c0_i32_1 = arith.constant 0 : i32
    return %c0_i32, %c0_i32_0 : i32, i32
  }
  func.func @transform_7(%arg0: i32) -> (i32, i32) {
    %c0_i32 = arith.constant 0 : i32
    %c0_i32_0 = arith.constant 0 : i32
    %c0_i32_1 = arith.constant 0 : i32
    return %c0_i32, %c0_i32_0 : i32, i32
  }
  func.func @transform_8(%arg0: i32) -> (i32, i32) {
    %c0_i32 = arith.constant 0 : i32
    %c0_i32_0 = arith.constant 0 : i32
    %c0_i32_1 = arith.constant 0 : i32
    return %c0_i32, %c0_i32_0 : i32, i32
  }
  func.func @transform_9(%arg0: i32) -> (i32, i32) {
    %c0_i32 = arith.constant 0 : i32
    %c0_i32_0 = arith.constant 0 : i32
    %c0_i32_1 = arith.constant 0 : i32
    return %c0_i32, %c0_i32_0 : i32, i32
  }
  func.func @transform_10(%arg0: i32) -> (i32, i32) {
    %c0_i32 = arith.constant 0 : i32
    %c0_i32_0 = arith.constant 0 : i32
    %c0_i32_1 = arith.constant 0 : i32
    return %c0_i32, %c0_i32_0 : i32, i32
  }
  func.func @transform_11(%arg0: i32) -> (i32, i32) {
    %c0_i32 = arith.constant 0 : i32
    %c0_i32_0 = arith.constant 0 : i32
    return %arg0, %c0_i32 : i32, i32
  }
}

</mosaic_0001>

<bundles_post_ra>
// kernel: tpu_custom_call.1
= control target key start
LH: loop header
LB: loop body
LE: loop exit
PB: predicated region body
PF: predicated region fallthrough
CT: control target
= control target key end

     0   :  { %s4937_s0 = inlined_call_operand.hbm [shape: bf16[512,128], index: 0, kind: input, shape index: {}]   ;;  %s4938_s1 = inlined_call_operand.vmem [shape: bf16[128,256], index: 1, kind: input, shape index: {}]   ;;  %s4939_s2 = inlined_call_operand.vmem [shape: f32[1,256], index: 2, kind: input, shape index: {}]   ;;  %s4940_s3 = inlined_call_operand.hbm [shape: bf16[256,256], index: 3, kind: input, shape index: {}]   ;;  %s4941_s4 = inlined_call_operand.vmem [shape: f32[1,256], index: 4, kind: input, shape index: {}]   ;;  %s4942_s5 = inlined_call_operand.hbm [shape: bf16[256,256], index: 5, kind: input, shape index: {}]   ;;  %s4943_s6 = inlined_call_operand.vmem [shape: f32[1,256], index: 6, kind: input, shape index: {}]   ;;  %s4944_s7 = inlined_call_operand.hbm [shape: bf16[256,256], index: 7, kind: input, shape index: {}]   ;;  %s4945_s8 = inlined_call_operand.vmem [shape: f32[1,256], index: 8, kind: input, shape index: {}]   ;;  %s4946_s9 = inlined_call_operand.vmem [shape: bf16[256,64], index: 9, kind: input, shape index: {}]   ;;  %s4947_s10 = inlined_call_operand.vmem [shape: f32[1,64], index: 10, kind: input, shape index: {}]   ;;  %s4948_s11 = inlined_call_operand.vmem [shape: f32[512,64], index: 11, kind: output, shape index: {}]  }
   0x1   :  { %4954 = sst [smem:[#allocation12_spill]] %s4940_s3 }
   0x2   :  { %4955 = sst [smem:[#allocation13_spill]] %s4942_s5 }
   0x3   :  { %16 = vsyncpa [#allocation3], 0 }
   0x4   :  { %18 = vsyncpa [#allocation3 + $0x1], 0 }
   0x5   :  { %19 = vsyncpa [#allocation5], 0 }
   0x6   :  { %20 = vsyncpa [#allocation8], 0  ;;  %s4182_s17 = smov 0   ;;  %s4184_s18 = smov 0  }
   0x7   :  { %s4186_s19 = smov 0   ;;  %s4188_s20 = smov 0  }
   0x8 LB: > { %s4952_s21 = sadd.s32 4294967295, %s4111_s20   ;;  %p46_p0 = scmp.ne.s32.totalorder %s4103_s18, %s4099_s17  ;;  %s4111_s20 = sphi %s4188_s20, %s4970_s20   ;;  %s4107_s19 = sphi %s4186_s19, %s4969_s19   ;;  %s4103_s18 = sphi %s4184_s18, %s4968_s18   ;;  %s4099_s17 = sphi %s4182_s17, %s4967_s17  }
   0x9   : > { %p4204_p1 = scmp.eq.s32.totalorder %s4952_s21, 0  ;;  %p3397_p2 = scmp.ge.s32.totalorder %s4111_s20, 1 }
   0xa   : > { %p293_p3 = scmp.lt.s32.totalorder %s4111_s20, 3  ;;  %s4113_s25 = smov [#allocation4]  }
   0xb   : > { %s4956_s22 = scalar_select %p4204_p1, 1, 0 }
   0xc   : > { %p4212_p4 = por %p4204_p1, %p46_p0  ;;  %p4216_p5 = pnand %p3397_p2, %p293_p3 }
   0xd   : > { %s311_s26 = sshll.u32 %s4113_s25, 4  ;;  %s4114_s28 = smov [#allocation6]   ;;  %s312_s26 = int_to_ptr.vmem [resolvable:$true] %s311_s26 }
   0xe   : > { %s4957_s23 = scalar_select %p4212_p4, 1, 0 }
   0xf   : > { %s4958_s24 = scalar_select %p4216_p5, 1, 0 }
  0x10   : > { %p3702_p6 = pneg %p4216_p5  ;;  %s327_s29 = sshll.u32 %s4114_s28, 4  ;;  %s328_s29 = int_to_ptr.vmem [resolvable:$true] %s327_s29 }
  0x11   : > { %s4115_s30 = smov [#allocation7]   ;;  %s3974_s13 = scalar_lea.vmem %s312_s26, 4096 }
  0x12   : > { %p4224_p7 = pnand %p3702_p6, %p4204_p1  ;;  %s343_s12 = sshll.u32 %s4115_s30, 4  ;;  %s344_s12 = int_to_ptr.vmem [resolvable:$true] %s343_s12 }
  0x13   : > { %p3975_p9 = scmp.ne.s32.totalorder %s312_s26, %s3974_s13  ;;  %p3982_p12 = scmp.lt.s32.totalorder %s312_s26, %s312_s26 }
  0x14   : > { %p3965_p8 = pneg %p4224_p7  ;;  %p3983_p13 = scmp.lt.s32.totalorder %s3974_s13, %s3974_s13 }
  0x16   : > { %p3977_p10 = pnand %p3975_p9, %p3965_p8  ;;  %p3984_p0 = por %p3983_p13, %p3982_p12 }
  0x18   : > { %p3978_p11 = pneg %p3977_p10 }
  0x1a   : > { %p3985_p2 = pnand %p3984_p0, %p3978_p11 }
  0x1c   : > { %3988 = shalt.err (!%p3985_p2)
}
  0x1d   : > { %s4116_s14 = smov 128   ;;  %s4117_s15 = smov 8  }
  0x1e   : > { %s4960_s3 = sld [smem:[#allocation12_spill]]  ;;  %s4000_s25 = scalar_lea.vmem %s328_s29, 4096 }
  0x1f   : > { %p4001_p3 = scmp.ne.s32.totalorder %s328_s29, %s4000_s25  ;;  %p4008_p10 = scmp.lt.s32.totalorder %s328_s29, %s328_s29 }
  0x20   : > { %p4009_p1 = scmp.lt.s32.totalorder %s4000_s25, %s4000_s25 }
  0x21   : > { %p4003_p6 = pnand %p4001_p3, %p3965_p8 }
  0x22   : > { %p4010_p12 = por %p4009_p1, %p4008_p10 }
  0x23   : > { %p4004_p9 = pneg %p4003_p6 }
  0x24   : > { %3705 = dma.hbm_to_vmem [thread:$0]  (!%p4224_p7), %s4960_s3, 4096, %s312_s26, [#allocation5], %s4116_s14, %s4116_s14, %s4117_s15  }
  0x25   : > { %p4011_p11 = pnand %p4010_p12, %p4004_p9 }
  0x27   : > { %4014 = shalt.err (!%p4011_p11)
}
  0x28   : > { %s4961_s5 = sld [smem:[#allocation13_spill]]  ;;  %s4026_s26 = scalar_lea.vmem %s344_s12, 4096 }
  0x29   : > { %p4027_p13 = scmp.ne.s32.totalorder %s344_s12, %s4026_s26  ;;  %p4034_p3 = scmp.lt.s32.totalorder %s344_s12, %s344_s12 }
  0x2a   : > { %p4035_p6 = scmp.lt.s32.totalorder %s4026_s26, %s4026_s26 }
  0x2b   : > { %p4029_p0 = pnand %p4027_p13, %p3965_p8 }
  0x2c   : > { %p4036_p4 = por %p4035_p6, %p4034_p3 }
  0x2d   : > { %p4030_p2 = pneg %p4029_p0 }
  0x2e   : > { %3708 = dma.hbm_to_vmem [thread:$0]  (!%p4224_p7), %s4961_s5, 4096, %s328_s29, [#allocation5], %s4116_s14, %s4116_s14, %s4117_s15  }
  0x2f   : > { %p4037_p1 = pnand %p4036_p4, %p4030_p2 }
  0x31   : > { %4040 = shalt.err (!%p4037_p1)
}
  0x32   : > { %3711 = dma.hbm_to_vmem [thread:$0]  (!%p4224_p7), %s4944_s7, 4096, %s344_s12, [#allocation8], %s4116_s14, %s4116_s14, %s4117_s15  }
  0x33   : > { %s4255_s29 = sadd.s32 1, %s4111_s20   ;;  %s33_s25 = sadd.s32 1, %s4107_s19 }
  0x34   : > { %s30_s17 = ssub.s32 %s4111_s20, %s4255_s29  ;;  %p40_p8 = scmp.ne.s32.totalorder %s4107_s19, %s4103_s18 }
  0x35   : > { %p31_p4 = scmp.eq.s32.totalorder %s30_s17, 0  ;;  %p41_p9 = scmp.eq.s32.totalorder %s4111_s20, 0 }
  0x36   : > { %p3719_p10 = scmp.lt.s32.totalorder %s4111_s20, 2  ;;  %s366_s28 = sand.u32 1, %s4107_s19  }
  0x37   : > { %s4265_s27 = scalar_select %p31_p4, %s4107_s19, %s33_s25  }
  0x38   : > { %p42_p12 = por %p41_p9, %p40_p8  ;;  %s3402_s30 = sshll.u32 %s366_s28, 7 }
  0x39   : > { %s3559_s26 = sshll.u32 %s4111_s20, 11  ;;  %s370_s12 = scalar_lea.vmem [#allocation2], %s3402_s30 }
  0x3a   : > { %s4272_s21 = scalar_lea.hbm %s4937_s0, %s3559_s26  ;;  %s377_s14 = sshll.u32 %s370_s12, 4  ;;  %s4274_s14 = int_to_ptr.vmem [resolvable:$true] %s377_s14 }
  0x3b   : > { %p4276_p7 = pnand %p3719_p10, %p42_p12  ;;  %s4280_s17 = scalar_lea.sflag [#allocation3], %s366_s28 }
  0x3c   : > { %s4041_s25 = scalar_lea.hbm %s4272_s21, 2048  ;;  %s4046_s30 = scalar_lea.hbm %s4937_s0, 4096 }
  0x3d   : > { %p4042_p11 = scmp.ne.s32.totalorder %s4272_s21, %s4041_s25  ;;  %p4043_p13 = pneg %p4276_p7 }
  0x3e   : > { %p4047_p3 = scmp.lt.s32.totalorder %s4272_s21, %s4937_s0  ;;  %p4048_p6 = scmp.lt.s32.totalorder %s4046_s30, %s4041_s25 }
  0x3f   : > { %p4044_p0 = pnand %p4043_p13, %p4042_p11 }
  0x40   : > { %p4049_p1 = por %p4048_p6, %p4047_p3 }
  0x41   : > { %p4045_p2 = pneg %p4044_p0 }
  0x43   : > { %p4050_p4 = pnand %p4049_p1, %p4045_p2 }
  0x45   : > { %4053 = shalt.err (!%p4050_p4)
}
  0x46   : > { %s4054_s28 = scalar_lea.vmem %s4274_s14, 2048  ;;  %s4118_s3 = smov [#allocation2]  }
  0x47   : > { %p4055_p8 = scmp.ne.s32.totalorder %s4274_s14, %s4054_s28  ;;  %s4059_s5 = sshll.u32 %s4118_s3, 4  ;;  %s4060_s5 = int_to_ptr.vmem [resolvable:$false] %s4059_s5 }
  0x48   : > { %s4061_s26 = scalar_lea.vmem %s4060_s5, 4096  ;;  %p4062_p12 = scmp.lt.s32.totalorder %s4274_s14, %s4060_s5 }
  0x49   : > { %p4057_p9 = pnand %p4055_p8, %p4043_p13  ;;  %p4063_p11 = scmp.lt.s32.totalorder %s4061_s26, %s4054_s28 }
  0x4b   : > { %p4058_p10 = pneg %p4057_p9  ;;  %p4064_p0 = por %p4063_p11, %p4062_p12 }
  0x4d   : > { %p4065_p5 = pnand %p4064_p0, %p4058_p10 }
  0x4f   : > { %4068 = shalt.err (!%p4065_p5)
}
  0x50   : > { %s4119_s25 = smov 64   ;;  %s4120_s13 = smov 4  }
  0x51   : > { %3715 = dma.hbm_to_vmem [thread:$0]  (!%p4276_p7), %s4272_s21, 2048, %s4274_s14, %s4280_s17, %s4119_s25, %s4119_s25, %s4120_s13  }
  0x52   : > { %p4963_p13 = scmp.ne.s32.totalorder %s4958_s24, 0 }
  0x53   : > { %s391_s3 = sand.u32 (!%p4963_p13), 1, %s4103_s18   ;;  %p4964_p2 = scmp.ne.s32.totalorder (!%p4963_p13), %s4957_s23, 0 }
  0x54   : > { %389 = sbr.rel (%p4963_p13) target bundleno = 1281 (0x501), region = 64  ;;  %s3406_s30 = sshll.u32 (!%p4963_p13), %s391_s3, 7 }
  0x55   : > { %s392_s5 = scalar_lea.sflag (!%p4963_p13), [#allocation3], %s391_s3  ;;  %s4304_s16 = scalar_lea.vmem (!%p4963_p13), [#allocation2], %s3406_s30 }
  0x59   : > { %4086 = dma.done.wait (%p4964_p2), %s392_s5, 2048  }
  0x5a   : > { %4088 = vsyncadd (%p4964_p2), %s392_s5, 4294965248  ;;  %p4965_p5 = scmp.ne.s32.totalorder %s4956_s22, 0 }
  0x5c   : > { %4090 = dma.done.wait (%p4965_p5), [#allocation5], 8192  }
  0x5d   : > { %4092 = vsyncadd (%p4965_p5), [#allocation5], 4294959104 }
  0x5e   : > { %4094 = dma.done.wait (%p4965_p5), [#allocation8], 4096  }
  0x5f   : > { %4096 = vsyncadd (%p4965_p5), [#allocation8], 4294963200  ;;  %v4121_v0 = vmov 0   ;;  %v3763_v1 = vld [vmem:[%s4938_s1 + $0x74] ss:$8 sps:$4 sm:$0xff]   ;;  %v3787_v18 = vld [vmem:[%s4304_s16] sm:$0xff]  }
  0x60   : > { %722 = vmatprep.mubr.bf16.mxu0 %v4121_v0  ;;  %802 = vmatprep.mubr.bf16.mxu1 %v4121_v0  ;;  %v3765_v2 = vld [vmem:[%s4938_s1 + $0x70] ss:$8 sps:$4 sm:$0xff]   ;;  %v3766_v3 = vld [vmem:[%s4938_s1 + $0x64] ss:$8 sps:$4 sm:$0xff]   ;;  %v3768_v4 = vld [vmem:[%s4938_s1 + $0x60] ss:$8 sps:$4 sm:$0xff]  }
  0x61   : > { %690 = vmatprep.subr.bf16.mxu0 %v3763_v1  ;;  %3672 = vmatprep.subr.bf16.mxu1 %v3763_v1  ;;  %v3769_v5 = vld [vmem:[%s4938_s1 + $0x54] ss:$8 sps:$4 sm:$0xff]   ;;  %v3771_v6 = vld [vmem:[%s4938_s1 + $0x50] ss:$8 sps:$4 sm:$0xff]   ;;  %v3772_v7 = vld [vmem:[%s4938_s1 + $0x44] ss:$8 sps:$4 sm:$0xff]  }
  0x62   : > { %691 = vmatpush1.bf16.msra.mxu0 %v3765_v2  ;;  %3680 = vmatpush1.bf16.msra.mxu1 %v3765_v2  ;;  %v3774_v8 = vld [vmem:[%s4938_s1 + $0x40] ss:$8 sps:$4 sm:$0xff]   ;;  %v3775_v9 = vld [vmem:[%s4938_s1 + $0x34] ss:$8 sps:$4 sm:$0xff]   ;;  %v3777_v10 = vld [vmem:[%s4938_s1 + $0x30] ss:$8 sps:$4 sm:$0xff]   ;;  %v504_v2 = vlaneseq }
  0x63   : > { %692 = vmatprep.subr.bf16.mxu0 %v3766_v3  ;;  %3673 = vmatprep.subr.bf16.mxu1 %v3766_v3  ;;  %v3778_v11 = vld [vmem:[%s4938_s1 + $0x24] ss:$8 sps:$4 sm:$0xff]   ;;  %v3780_v12 = vld [vmem:[%s4938_s1 + $0x20] ss:$8 sps:$4 sm:$0xff]   ;;  %v3781_v13 = vld [vmem:[%s4938_s1 + $0x14] ss:$8 sps:$4 sm:$0xff]  }
  0x64   : > { %v3783_v14 = vld [vmem:[%s4938_s1 + $0x10] ss:$8 sps:$4 sm:$0xff]   ;;  %v3784_v15 = vld [vmem:[%s4938_s1 + $0x4] ss:$8 sps:$4 sm:$0xff]   ;;  %v3786_v16 = vld [vmem:[%s4938_s1] ss:$8 sps:$4 sm:$0xff]  }
  0x65   : > { %v3805_v17 = vld [vmem:[#allocation4 + $0x74] ss:$8 sps:$4 sm:$0xff]   ;;  %v3795_v19 = vld [vmem:[%s4304_s16 + $0x40] sm:$0xff]   ;;  %v3803_v20 = vld [vmem:[#allocation4 + $0x70] ss:$8 sps:$4 sm:$0xff]   ;;  %v505_v3 = vshrl.u32 %v504_v2, 7 }
  0x66   : > { %693 = vmatpush1.bf16.msra.mxu0 %v3768_v4  ;;  %3681 = vmatpush1.bf16.msra.mxu1 %v3768_v4  ;;  %v3808_v21 = vld [vmem:[#allocation4 + $0x64] ss:$8 sps:$4 sm:$0xff]   ;;  %v3806_v22 = vld [vmem:[#allocation4 + $0x60] ss:$8 sps:$4 sm:$0xff]   ;;  %v3811_v23 = vld [vmem:[#allocation4 + $0x54] ss:$8 sps:$4 sm:$0xff]  }
  0x67   : > { %694 = vmatprep.subr.bf16.mxu0 %v3769_v5  ;;  %3674 = vmatprep.subr.bf16.mxu1 %v3769_v5  ;;  %v3788_v24 = vld [vmem:[%s4304_s16 + $0x8] sm:$0xff]   ;;  %v3809_v26 = vld [vmem:[#allocation4 + $0x50] ss:$8 sps:$4 sm:$0xff]   ;;  %v3817_v31 = vld [vmem:[#allocation4 + $0x34] ss:$8 sps:$4 sm:$0xff]   ;;  %v4400_v4 = vsub.s32 0, %v505_v3 }
  0x68   : > { %v3796_v25 = vld [vmem:[%s4304_s16 + $0x48] sm:$0xff]   ;;  %v3789_v29 = vld [vmem:[%s4304_s16 + $0x10] sm:$0xff]   ;;  %v3790_v36 = vld [vmem:[%s4304_s16 + $0x18] sm:$0xff]   ;;  %s4966_s26 = sadd.s32 4294967295, %s4111_s20  }
  0x69   : > { %v3814_v27 = vld [vmem:[#allocation4 + $0x44] ss:$8 sps:$4 sm:$0xff]   ;;  %v3812_v28 = vld [vmem:[#allocation4 + $0x40] ss:$8 sps:$4 sm:$0xff]   ;;  %v3797_v30 = vld [vmem:[%s4304_s16 + $0x50] sm:$0xff]   ;;  %s3410_s25 = sshll.u32 %s4966_s26, 5 }
  0x6a   : > { %695 = vmatpush1.bf16.msra.mxu0 %v3771_v6  ;;  %3682 = vmatpush1.bf16.msra.mxu1 %v3771_v6  ;;  %v3815_v32 = vld [vmem:[#allocation4 + $0x30] ss:$8 sps:$4 sm:$0xff]   ;;  %v3820_v33 = vld [vmem:[#allocation4 + $0x24] ss:$8 sps:$4 sm:$0xff]   ;;  %v3818_v34 = vld [vmem:[#allocation4 + $0x20] ss:$8 sps:$4 sm:$0xff]  }
  0x6b   : > { %696 = vmatprep.subr.bf16.mxu0 %v3772_v7  ;;  %3675 = vmatprep.subr.bf16.mxu1 %v3772_v7  ;;  %v3823_v35 = vld [vmem:[#allocation4 + $0x14] ss:$8 sps:$4 sm:$0xff]   ;;  %v3821_v38 = vld [vmem:[#allocation4 + $0x10] ss:$8 sps:$4 sm:$0xff]   ;;  %v3826_v39 = vld [vmem:[#allocation4 + $0x4] ss:$8 sps:$4 sm:$0xff]  }
  0x6c   : > { %v3798_v37 = vld [vmem:[%s4304_s16 + $0x58] sm:$0xff]   ;;  %v3824_v40 = vld [vmem:[#allocation4] ss:$8 sps:$4 sm:$0xff]   ;;  %v3832_v45 = vld [vmem:[#allocation4 + $0xe4] ss:$8 sps:$4 sm:$0xff]   ;;  %p448_p7 = scmp.lt.s32.totalorder %s3410_s25, 63 }
  0x6d   : > { %v3829_v41 = vld [vmem:[#allocation4 + $0xf4] ss:$8 sps:$4 sm:$0xff]   ;;  %v3791_v42 = vld [vmem:[%s4304_s16 + $0x20] sm:$0xff]   ;;  %v3827_v44 = vld [vmem:[#allocation4 + $0xf0] ss:$8 sps:$4 sm:$0xff]  }
  0x6e   : > { %697 = vmatpush1.bf16.msra.mxu0 %v3774_v8  ;;  %3683 = vmatpush1.bf16.msra.mxu1 %v3774_v8  ;;  %v3799_v43 = vld [vmem:[%s4304_s16 + $0x60] sm:$0xff]   ;;  %v3835_v47 = vld [vmem:[#allocation4 + $0xd4] ss:$8 sps:$4 sm:$0xff]   ;;  %v3792_v48 = vld [vmem:[%s4304_s16 + $0x28] sm:$0xff]   ;;  %s4972_s25 = smov (!%p448_p7, %s3410_s25), 63 }
  0x6f   : > { %698 = vmatprep.subr.bf16.mxu0 %v3775_v9  ;;  %3676 = vmatprep.subr.bf16.mxu1 %v3775_v9  ;;  %v3830_v46 = vld [vmem:[#allocation4 + $0xe0] ss:$8 sps:$4 sm:$0xff]   ;;  %v3833_v50 = vld [vmem:[#allocation4 + $0xd0] ss:$8 sps:$4 sm:$0xff]   ;;  %v3838_v51 = vld [vmem:[#allocation4 + $0xc4] ss:$8 sps:$4 sm:$0xff]  }
  0x70   : > { %v3800_v49 = vld [vmem:[%s4304_s16 + $0x68] sm:$0xff]   ;;  %v3841_v53 = vld [vmem:[#allocation4 + $0xb4] ss:$8 sps:$4 sm:$0xff]   ;;  %v3839_v56 = vld [vmem:[#allocation4 + $0xb0] ss:$8 sps:$4 sm:$0xff]   ;;  %s3411_s13 = sshll.u32 %s4972_s25, 3 }
  0x71   : > { %v3836_v52 = vld [vmem:[#allocation4 + $0xc0] ss:$8 sps:$4 sm:$0xff]   ;;  %v3793_v54 = vld [vmem:[%s4304_s16 + $0x30] sm:$0xff]   ;;  %v3794_v57 = vld [vmem:[%s4304_s16 + $0x38] sm:$0xff]   ;;  %s4826_s23 = scalar_lea.vmem %s4948_s11, %s3411_s13 }
  0x72   : > { %699 = vmatpush1.bf16.msra.mxu0 %v3777_v10  ;;  %3684 = vmatpush1.bf16.msra.mxu1 %v3777_v10  ;;  %v3801_v55 = vld [vmem:[%s4304_s16 + $0x70] sm:$0xff]   ;;  %v3802_v58 = vld [vmem:[%s4304_s16 + $0x78] sm:$0xff]   ;;  %v3844_v59 = vld [vmem:[#allocation4 + $0xa4] ss:$8 sps:$4 sm:$0xff]  }
  0x73   : > { %700 = vmatprep.subr.bf16.mxu0 %v3778_v11  ;;  %3677 = vmatprep.subr.bf16.mxu1 %v3778_v11  ;;  %v3842_v60 = vld [vmem:[#allocation4 + $0xa0] ss:$8 sps:$4 sm:$0xff]   ;;  %v3847_v61 = vld [vmem:[#allocation4 + $0x94] ss:$8 sps:$4 sm:$0xff]   ;;  %v3845_v62 = vld [vmem:[#allocation4 + $0x90] ss:$8 sps:$4 sm:$0xff]  }
  0x74   : > { %v3850_v63 = vld [vmem:[#allocation4 + $0x84] ss:$8 sps:$4 sm:$0xff]   ;;  %v3848_v1 = vld [vmem:[#allocation4 + $0x80] ss:$8 sps:$4 sm:$0xff]   ;;  %v3865_v2 = vld [vmem:[#allocation6 + $0x34] ss:$8 sps:$4 sm:$0xff]  }
  0x75   : > { %v502_v5 = vld [vmem:[%s4939_s2] sm:$0x3] }
  0x76   : > { %701 = vmatpush1.bf16.msra.mxu0 %v3780_v12  ;;  %3685 = vmatpush1.bf16.msra.mxu1 %v3780_v12  ;;  %v4409_v7 = vrot.slane %v502_v5, %v4400_v4 }
  0x77   : > { %702 = vmatprep.subr.bf16.mxu0 %v3781_v13  ;;  %3678 = vmatprep.subr.bf16.mxu1 %v3781_v13 }
  0x7a   : > { %703 = vmatpush1.bf16.msra.mxu0 %v3783_v14  ;;  %3686 = vmatpush1.bf16.msra.mxu1 %v3783_v14 }
  0x7b   : > { %704 = vmatprep.subr.bf16.mxu0 %v3784_v15  ;;  %3679 = vmatprep.subr.bf16.mxu1 %v3784_v15 }
  0x7e   : > { %705 = vmatpush1.bf16.msra.mxu0 %v3786_v16  ;;  %3687 = vmatpush1.bf16.msra.mxu1 %v3786_v16 }
  0x7f   : > { %1311 = vmatprep.subr.bf16.mxu1 %v3805_v17 }
  0x81   : > { %723 = vmatmul.mubr.bf16.vlgmr.msra.gmra.mxu0 %v3787_v18  ;;  %803 = vmatmul.mubr.bf16.vlgmr.msra.gmra.mxu1 %v3795_v19 }
  0x82   : > { %732 = vmatprep.mubr.bf16.mxu0 %v4121_v0  ;;  %812 = vmatprep.mubr.bf16.mxu1 %v4121_v0 }
  0x83   : > { %1312 = vmatpush1.bf16.msra.mxu1 %v3803_v20 }
  0x84   : > { %1313 = vmatprep.subr.bf16.mxu1 %v3808_v21 }
  0x87   : > { %1314 = vmatpush1.bf16.msra.mxu1 %v3806_v22  ;;  %v3851_v22 = vld [vmem:[#allocation6 + $0x70] ss:$8 sps:$4 sm:$0xff]  }
  0x88   : > { %1315 = vmatprep.subr.bf16.mxu1 %v3811_v23 }
  0x89   : > { %733 = vmatmul.mubr.bf16.gmra.mxu0 %v3788_v24  ;;  %813 = vmatmul.mubr.bf16.gmra.mxu1 %v3796_v25 }
  0x8a   : > { %742 = vmatprep.mubr.bf16.mxu0 %v4121_v0  ;;  %822 = vmatprep.mubr.bf16.mxu1 %v4121_v0 }
  0x8b   : > { %1316 = vmatpush1.bf16.msra.mxu1 %v3809_v26  ;;  %v3853_v26 = vld [vmem:[#allocation6 + $0x74] ss:$8 sps:$4 sm:$0xff]  }
  0x8c   : > { %1317 = vmatprep.subr.bf16.mxu1 %v3814_v27  ;;  %1932 = vmatprep.subr.bf16.mxu0 %v3853_v26 }
  0x8d   : > { %1933 = vmatpush1.bf16.msra.mxu0 %v3851_v22 }
  0x8f   : > { %1318 = vmatpush1.bf16.msra.mxu1 %v3812_v28 }
  0x90   : > { %1319 = vmatprep.subr.bf16.mxu1 %v3817_v31  ;;  %v3856_v31 = vld [vmem:[#allocation6 + $0x64] ss:$8 sps:$4 sm:$0xff]  }
  0x91   : > { %743 = vmatmul.mubr.bf16.gmra.mxu0 %v3789_v29  ;;  %823 = vmatmul.mubr.bf16.gmra.mxu1 %v3797_v30 }
  0x92   : > { %752 = vmatprep.mubr.bf16.mxu0 %v4121_v0  ;;  %832 = vmatprep.mubr.bf16.mxu1 %v4121_v0 }
  0x93   : > { %1320 = vmatpush1.bf16.msra.mxu1 %v3815_v32  ;;  %1934 = vmatprep.subr.bf16.mxu0 %v3856_v31 }
  0x94   : > { %1321 = vmatprep.subr.bf16.mxu1 %v3820_v33 }
  0x97   : > { %1322 = vmatpush1.bf16.msra.mxu1 %v3818_v34 }
  0x98   : > { %1323 = vmatprep.subr.bf16.mxu1 %v3823_v35  ;;  %v3854_v35 = vld [vmem:[#allocation6 + $0x60] ss:$8 sps:$4 sm:$0xff]  }
  0x99   : > { %753 = vmatmul.mubr.bf16.gmra.mxu0 %v3790_v36  ;;  %833 = vmatmul.mubr.bf16.gmra.mxu1 %v3798_v37 }
  0x9a   : > { %762 = vmatprep.mubr.bf16.mxu0 %v4121_v0  ;;  %842 = vmatprep.mubr.bf16.mxu1 %v4121_v0 }
  0x9b   : > { %1324 = vmatpush1.bf16.msra.mxu1 %v3821_v38  ;;  %1935 = vmatpush1.bf16.msra.mxu0 %v3854_v35  ;;  %v3871_v35 = vld [vmem:[#allocation6 + $0x14] ss:$8 sps:$4 sm:$0xff]  }
  0x9c   : > { %1325 = vmatprep.subr.bf16.mxu1 %v3826_v39 }
  0x9f   : > { %1326 = vmatpush1.bf16.msra.mxu1 %v3824_v40 }
  0xa0   : > { %1327 = vmatprep.subr.bf16.mxu1 %v3829_v41  ;;  %v3859_v41 = vld [vmem:[#allocation6 + $0x54] ss:$8 sps:$4 sm:$0xff]  }
  0xa1   : > { %763 = vmatmul.mubr.bf16.gmra.mxu0 %v3791_v42  ;;  %843 = vmatmul.mubr.bf16.gmra.mxu1 %v3799_v43 }
  0xa2   : > { %772 = vmatprep.mubr.bf16.mxu0 %v4121_v0  ;;  %852 = vmatprep.mubr.bf16.mxu1 %v4121_v0 }
  0xa3   : > { %1328 = vmatpush2.bf16.msra.mxu1 %v3827_v44  ;;  %1936 = vmatprep.subr.bf16.mxu0 %v3859_v41 }
  0xa4   : > { %1329 = vmatprep.subr.bf16.mxu1 %v3832_v45  ;;  %v3857_v45 = vld [vmem:[#allocation6 + $0x50] ss:$8 sps:$4 sm:$0xff]  }
  0xa5   : > { %1937 = vmatpush1.bf16.msra.mxu0 %v3857_v45 }
  0xa7   : > { %1330 = vmatpush2.bf16.msra.mxu1 %v3830_v46 }
  0xa8   : > { %1331 = vmatprep.subr.bf16.mxu1 %v3835_v47 }
  0xa9   : > { %773 = vmatmul.mubr.bf16.gmra.mxu0 %v3792_v48  ;;  %853 = vmatmul.mubr.bf16.gmra.mxu1 %v3800_v49 }
  0xaa   : > { %782 = vmatprep.mubr.bf16.mxu0 %v4121_v0  ;;  %862 = vmatprep.mubr.bf16.mxu1 %v4121_v0 }
  0xab   : > { %1332 = vmatpush2.bf16.msra.mxu1 %v3833_v50 }
  0xac   : > { %1333 = vmatprep.subr.bf16.mxu1 %v3838_v51 }
  0xaf   : > { %1334 = vmatpush2.bf16.msra.mxu1 %v3836_v52  ;;  %v3862_v52 = vld [vmem:[#allocation6 + $0x44] ss:$8 sps:$4 sm:$0xff]  }
  0xb0   : > { %1335 = vmatprep.subr.bf16.mxu1 %v3841_v53  ;;  %1938 = vmatprep.subr.bf16.mxu0 %v3862_v52 }
  0xb1   : > { %783 = vmatmul.mubr.bf16.gmra.mxu0 %v3793_v54  ;;  %863 = vmatmul.mubr.bf16.gmra.mxu1 %v3801_v55 }
  0xb2   : > { %792 = vmatprep.mubr.bf16.mxu0 %v4121_v0  ;;  %872 = vmatprep.mubr.bf16.mxu1 %v4121_v0  ;;  %v4398_v0 = vsub.s32 1, %v505_v3 }
  0xb3   : > { %1336 = vmatpush2.bf16.msra.mxu1 %v3839_v56 }
  0xb4   : > { %1337 = vmatprep.subr.bf16.mxu1 %v3844_v59  ;;  %v4406_v6 = vrot.slane %v502_v5, %v4398_v0  ;;  %v3860_v59 = vld [vmem:[#allocation6 + $0x40] ss:$8 sps:$4 sm:$0xff]  }
  0xb5   : > { %1939 = vmatpush1.bf16.msra.mxu0 %v3860_v59 }
  0xb6   : > { %1940 = vmatprep.subr.bf16.mxu0 %v3865_v2 }
  0xb7   : > { %1338 = vmatpush2.bf16.msra.mxu1 %v3842_v60 }
  0xb8   : > { %1339 = vmatprep.subr.bf16.mxu1 %v3847_v61 }
  0xb9   : > { %793 = vmatmul.mubr.bf16.gmra.mxu0 %v3794_v57  ;;  %873 = vmatmul.mubr.bf16.gmra.mxu1 %v3802_v58 }
  0xbb   : > { %1340 = vmatpush2.bf16.msra.mxu1 %v3845_v62 }
  0xbc   : > { %1341 = vmatprep.subr.bf16.mxu1 %v3850_v63 }
  0xbf   : > { %1342 = vmatpush2.bf16.msra.mxu1 %v3848_v1 }
 0x141   : > { %v724_v8 = vpop.f32.mrf.mxu0  ;;  %v4411_v9 = vpop.f32.mrf.mxu1 }
 0x142   : > { %v725_v13 = vadd.f32 %v724_v8, %v4409_v7 }
 0x143   : > { %v726_v10 = vpop.f32.mrf.mxu0  ;;  %v4413_v11 = vpop.f32.mrf.mxu1 }
 0x144   : > { %v727_v12 = vadd.f32 %v726_v10, %v4406_v6  ;;  %v947_v23 = vmul.f32 0.2, %v725_v13  ;;  %vm883_vm2 = vcmp.gt.f32.partialorder %v725_v13, 0.0  ;;  %v3863_v10 = vld [vmem:[#allocation6 + $0x30] ss:$8 sps:$4 sm:$0xff]  }
 0x145   : > { %v728_v14 = vpop.f32.mrf.mxu0  ;;  %v4417_v15 = vpop.f32.mrf.mxu1  ;;  %1941 = vmatpush1.bf16.msra.mxu0 %v3863_v10 }
 0x146   : > { %v729_v16 = vadd.f32 %v728_v14, %v4409_v7  ;;  %v948_v17 = vmul.f32 0.2, %v727_v12  ;;  %vm884_vm1 = vcmp.gt.f32.partialorder %v727_v12, 0.0  ;;  %v1011_v36 = vsel %vm883_vm2, %v725_v13, %v947_v23 }
 0x147   : > { %v730_v18 = vpop.f32.mrf.mxu0  ;;  %v4420_v19 = vpop.f32.mrf.mxu1 }
 0x148   : > { %vm885_vm0 = vcmp.gt.f32.partialorder %v729_v16, 0.0  ;;  %v949_v20 = vmul.f32 0.2, %v729_v16  ;;  %v731_v21 = vadd.f32 %v730_v18, %v4406_v6  ;;  %v1012_v33 = vsel %vm884_vm1, %v727_v12, %v948_v17 }
 0x149   : > { %v734_v24 = vpop.f32.mrf.mxu0  ;;  %v4423_v25 = vpop.f32.mrf.mxu1 }
 0x14a   : > { %vm886_vm3 = vcmp.gt.f32.partialorder %v731_v21, 0.0  ;;  %v950_v27 = vmul.f32 0.2, %v731_v21  ;;  %v1013_v28 = vsel %vm885_vm0, %v729_v16, %v949_v20  ;;  %v735_v37 = vadd.f32 %v734_v24, %v4409_v7  ;;  %v3868_v20 = vld [vmem:[#allocation6 + $0x24] ss:$8 sps:$4 sm:$0xff]  }
 0x14b   : > { %v736_v29 = vpop.f32.mrf.mxu0  ;;  %v4425_v30 = vpop.f32.mrf.mxu1  ;;  %v1075_v42 = vpack.c.bf16 %v1013_v28, %v1011_v36  ;;  %v3866_v28 = vld [vmem:[#allocation6 + $0x20] ss:$8 sps:$4 sm:$0xff]   ;;  %1942 = vmatprep.subr.bf16.mxu0 %v3868_v20 }
 0x14c   : > { %v737_v32 = vadd.f32 %v736_v29, %v4406_v6  ;;  %v1014_v34 = vsel %vm886_vm3, %v731_v21, %v950_v27  ;;  %v951_v49 = vmul.f32 0.2, %v735_v37  ;;  %vm887_vm6 = vcmp.gt.f32.partialorder %v735_v37, 0.0  ;;  %1943 = vmatpush1.bf16.msra.mxu0 %v3866_v28 }
 0x14d   : > { %v738_v38 = vpop.f32.mrf.mxu0  ;;  %v1076_v39 = vpack.c.bf16 %v1014_v34, %v1012_v33  ;;  %v4429_v40 = vpop.f32.mrf.mxu1  ;;  %1944 = vmatprep.subr.bf16.mxu0 %v3871_v35 }
 0x14e   : > { %v739_v43 = vadd.f32 %v738_v38, %v4409_v7  ;;  %v952_v46 = vmul.f32 0.2, %v737_v32  ;;  %vm888_vm5 = vcmp.gt.f32.partialorder %v737_v32, 0.0  ;;  %v1015_v63 = vsel %vm887_vm6, %v735_v37, %v951_v49 }
 0x14f   : > { %v740_v44 = vpop.f32.mrf.mxu0  ;;  %1343 = vmatprep.mubr.bf16.mxu1 %v1076_v39  ;;  %v4433_v51 = vpop.f32.mrf.mxu1  ;;  %v3869_v39 = vld [vmem:[#allocation6 + $0x10] ss:$8 sps:$4 sm:$0xff]  }
 0x150   : > { %vm889_vm4 = vcmp.gt.f32.partialorder %v739_v43, 0.0  ;;  %v953_v47 = vmul.f32 0.2, %v739_v43  ;;  %v741_v48 = vadd.f32 %v740_v44, %v4406_v6  ;;  %1344 = vmatmul.mubr.bf16.vlgmr.msra.gmra.mxu1 %v1075_v42  ;;  %v1016_v57 = vsel %vm888_vm5, %v737_v32, %v952_v46  ;;  %1945 = vmatpush1.bf16.msra.mxu0 %v3869_v39 }
 0x151   : > { %v744_v50 = vpop.f32.mrf.mxu0  ;;  %v4437_v1 = vpop.f32.mrf.mxu1 }
 0x152   : > { %vm890_vm7 = vcmp.gt.f32.partialorder %v741_v48, 0.0  ;;  %v954_v53 = vmul.f32 0.2, %v741_v48  ;;  %v1017_v55 = vsel %vm889_vm4, %v739_v43, %v953_v47  ;;  %v745_v60 = vadd.f32 %v744_v50, %v4409_v7  ;;  %v3874_v47 = vld [vmem:[#allocation6 + $0x4] ss:$8 sps:$4 sm:$0xff]  }
 0x153   : > { %v746_v54 = vpop.f32.mrf.mxu0  ;;  %v1077_v5 = vpack.c.bf16 %v1017_v55, %v1015_v63  ;;  %v4441_v18 = vpop.f32.mrf.mxu1  ;;  %v3872_v55 = vld [vmem:[#allocation6] ss:$8 sps:$4 sm:$0xff]   ;;  %1946 = vmatprep.subr.bf16.mxu0 %v3874_v47  ;;  %v3886_v47 = vld [vmem:[#allocation6 + $0xc4] ss:$8 sps:$4 sm:$0xff]  }
 0x154   : > { %v747_v56 = vadd.f32 %v746_v54, %v4406_v6  ;;  %v1018_v58 = vsel %vm890_vm7, %v741_v48, %v954_v53  ;;  %v955_v16 = vmul.f32 0.2, %v745_v60  ;;  %vm891_vm10 = vcmp.gt.f32.partialorder %v745_v60, 0.0  ;;  %1947 = vmatpush1.bf16.msra.mxu0 %v3872_v55  ;;  %v3884_v55 = vld [vmem:[#allocation6 + $0xc0] ss:$8 sps:$4 sm:$0xff]  }
 0x155   : > { %v748_v61 = vpop.f32.mrf.mxu0  ;;  %v1078_v62 = vpack.c.bf16 %v1018_v58, %v1016_v57  ;;  %v4445_v34 = vpop.f32.mrf.mxu1 }
 0x156   : > { %v749_v3 = vadd.f32 %v748_v61, %v4409_v7  ;;  %v956_v12 = vmul.f32 0.2, %v747_v56  ;;  %vm892_vm9 = vcmp.gt.f32.partialorder %v747_v56, 0.0  ;;  %v1019_v33 = vsel %vm891_vm10, %v745_v60, %v955_v16  ;;  %v3877_v61 = vld [vmem:[#allocation6 + $0xf4] ss:$8 sps:$4 sm:$0xff]  }
 0x157   : > { %v750_v8 = vpop.f32.mrf.mxu0  ;;  %1353 = vmatprep.mubr.bf16.mxu1 %v1078_v62  ;;  %v4449_v46 = vpop.f32.mrf.mxu1  ;;  %1948 = vmatprep.subr.bf16.mxu0 %v3877_v61  ;;  %v3880_v16 = vld [vmem:[#allocation6 + $0xe4] ss:$8 sps:$4 sm:$0xff]  }
 0x158   : > { %vm893_vm8 = vcmp.gt.f32.partialorder %v749_v3, 0.0  ;;  %v957_v13 = vmul.f32 0.2, %v749_v3  ;;  %v751_v14 = vadd.f32 %v750_v8, %v4406_v6  ;;  %1354 = vmatmul.mubr.bf16.gmra.mxu1 %v1077_v5  ;;  %v1020_v26 = vsel %vm892_vm9, %v747_v56, %v956_v12 }
 0x159   : > { %v754_v17 = vpop.f32.mrf.mxu0  ;;  %v4453_v60 = vpop.f32.mrf.mxu1 }
 0x15a   : > { %vm894_vm11 = vcmp.gt.f32.partialorder %v751_v14, 0.0  ;;  %v958_v21 = vmul.f32 0.2, %v751_v14  ;;  %v1021_v23 = vsel %vm893_vm8, %v749_v3, %v957_v13  ;;  %v755_v29 = vadd.f32 %v754_v17, %v4409_v7  ;;  %v3875_v3 = vld [vmem:[#allocation6 + $0xf0] ss:$8 sps:$4 sm:$0xff]  }
 0x15b   : > { %v756_v22 = vpop.f32.mrf.mxu0  ;;  %v1079_v37 = vpack.c.bf16 %v1021_v23, %v1019_v33  ;;  %1949 = vmatpush2.bf16.msra.mxu0 %v3875_v3  ;;  %v3883_v33 = vld [vmem:[#allocation6 + $0xd4] ss:$8 sps:$4 sm:$0xff]  }
 0x15c   : > { %v757_v24 = vadd.f32 %v756_v22, %v4406_v6  ;;  %v1022_v27 = vsel %vm894_vm11, %v751_v14, %v958_v21  ;;  %v959_v44 = vmul.f32 0.2, %v755_v29  ;;  %vm895_vm14 = vcmp.gt.f32.partialorder %v755_v29, 0.0  ;;  %v4457_v14 = vpop.f32.mrf.mxu1  ;;  %1950 = vmatprep.subr.bf16.mxu0 %v3880_v16 }
 0x15d   : > { %v758_v31 = vpop.f32.mrf.mxu0  ;;  %v1080_v32 = vpack.c.bf16 %v1022_v27, %v1020_v26  ;;  %v3878_v26 = vld [vmem:[#allocation6 + $0xe0] ss:$8 sps:$4 sm:$0xff]  }
 0x15e   : > { %v759_v36 = vadd.f32 %v758_v31, %v4409_v7  ;;  %v960_v41 = vmul.f32 0.2, %v757_v24  ;;  %vm896_vm13 = vcmp.gt.f32.partialorder %v757_v24, 0.0  ;;  %v1023_v59 = vsel %vm895_vm14, %v755_v29, %v959_v44 }
 0x15f   : > { %v760_v38 = vpop.f32.mrf.mxu0  ;;  %1363 = vmatprep.mubr.bf16.mxu1 %v1080_v32  ;;  %v4461_v32 = vpop.f32.mrf.mxu1  ;;  %1951 = vmatpush2.bf16.msra.mxu0 %v3878_v26 }
 0x160   : > { %vm897_vm12 = vcmp.gt.f32.partialorder %v759_v36, 0.0  ;;  %v961_v42 = vmul.f32 0.2, %v759_v36  ;;  %v761_v43 = vadd.f32 %v760_v38, %v4406_v6  ;;  %1364 = vmatmul.mubr.bf16.gmra.mxu1 %v1079_v37  ;;  %v1024_v53 = vsel %vm896_vm13, %v757_v24, %v960_v41  ;;  %v3881_v38 = vld [vmem:[#allocation6 + $0xd0] ss:$8 sps:$4 sm:$0xff]   ;;  %1952 = vmatprep.subr.bf16.mxu0 %v3883_v33 }
 0x161   : > { %v764_v45 = vpop.f32.mrf.mxu0 }
 0x162   : > { %vm898_vm15 = vcmp.gt.f32.partialorder %v761_v43, 0.0  ;;  %v962_v48 = vmul.f32 0.2, %v761_v43  ;;  %v1025_v50 = vsel %vm897_vm12, %v759_v36, %v961_v42  ;;  %v765_v56 = vadd.f32 %v764_v45, %v4409_v7  ;;  %v4465_v45 = vpop.f32.mrf.mxu1 }
 0x163   : > { %v766_v49 = vpop.f32.mrf.mxu0  ;;  %v1081_v63 = vpack.c.bf16 %v1025_v50, %v1023_v59  ;;  %1953 = vmatpush2.bf16.msra.mxu0 %v3881_v38 }
 0x164   : > { %v767_v52 = vadd.f32 %v766_v49, %v4406_v6  ;;  %v1026_v54 = vsel %vm898_vm15, %v761_v43, %v962_v48  ;;  %v963_v12 = vmul.f32 0.2, %v765_v56  ;;  %vm899_vm2 = vcmp.gt.f32.partialorder %v765_v56, 0.0  ;;  %v4469_v61 = vpop.f32.mrf.mxu1  ;;  %1954 = vmatprep.subr.bf16.mxu0 %v3886_v47 }
 0x165   : > { %v768_v57 = vpop.f32.mrf.mxu0  ;;  %v1082_v58 = vpack.c.bf16 %v1026_v54, %v1024_v53 }
 0x166   : > { %v769_v62 = vadd.f32 %v768_v57, %v4409_v7  ;;  %v964_v5 = vmul.f32 0.2, %v767_v52  ;;  %vm900_vm1 = vcmp.gt.f32.partialorder %v767_v52, 0.0  ;;  %v1027_v31 = vsel %vm899_vm2, %v765_v56, %v963_v12 }
 0x167   : > { %v770_v2 = vpop.f32.mrf.mxu0  ;;  %1373 = vmatprep.mubr.bf16.mxu1 %v1082_v58  ;;  %1955 = vmatpush2.bf16.msra.mxu0 %v3884_v55  ;;  %v821_v55 = vadd.f32 %v4433_v51, %v4406_v6 }
 0x168   : > { %vm901_vm0 = vcmp.gt.f32.partialorder %v769_v62, 0.0  ;;  %v965_v8 = vmul.f32 0.2, %v769_v62  ;;  %v771_v10 = vadd.f32 %v770_v2, %v4406_v6  ;;  %1374 = vmatmul.mubr.bf16.gmra.mxu1 %v1081_v63  ;;  %v1028_v23 = vsel %vm900_vm1, %v767_v52, %v964_v5  ;;  %v3887_v5 = vld [vmem:[#allocation6 + $0xb0] ss:$8 sps:$4 sm:$0xff]  }
 0x169   : > { %v774_v13 = vpop.f32.mrf.mxu0 }
 0x16a   : > { %vm902_vm3 = vcmp.gt.f32.partialorder %v771_v10, 0.0  ;;  %v966_v17 = vmul.f32 0.2, %v771_v10  ;;  %v1029_v21 = vsel %vm901_vm0, %v769_v62, %v965_v8  ;;  %v775_v27 = vadd.f32 %v774_v13, %v4409_v7  ;;  %v3889_v62 = vld [vmem:[#allocation6 + $0xb4] ss:$8 sps:$4 sm:$0xff]  }
 0x16b   : > { %v776_v20 = vpop.f32.mrf.mxu0  ;;  %v1083_v36 = vpack.c.bf16 %v1029_v21, %v1027_v31  ;;  %1956 = vmatprep.subr.bf16.mxu0 %v3889_v62 }
 0x16c   : > { %v777_v22 = vadd.f32 %v776_v20, %v4406_v6  ;;  %v1030_v24 = vsel %vm902_vm3, %v771_v10, %v966_v17  ;;  %v967_v43 = vmul.f32 0.2, %v775_v27  ;;  %vm903_vm6 = vcmp.gt.f32.partialorder %v775_v27, 0.0  ;;  %v4473_v17 = vpop.f32.mrf.mxu1  ;;  %1957 = vmatpush2.bf16.msra.mxu0 %v3887_v5 }
 0x16d   : > { %v778_v28 = vpop.f32.mrf.mxu0  ;;  %v1084_v29 = vpack.c.bf16 %v1030_v24, %v1028_v23  ;;  %v811_v23 = vadd.f32 %v4420_v19, %v4406_v6  ;;  %v986_v5 = vmul.f32 0.2, %v821_v55 }
 0x16e   : > { %v779_v35 = vadd.f32 %v778_v28, %v4409_v7  ;;  %v968_v39 = vmul.f32 0.2, %v777_v22  ;;  %vm904_vm5 = vcmp.gt.f32.partialorder %v777_v22, 0.0  ;;  %v1031_v59 = vsel %vm903_vm6, %v775_v27, %v967_v43 }
 0x16f   : > { %v780_v37 = vpop.f32.mrf.mxu0  ;;  %1383 = vmatprep.mubr.bf16.mxu1 %v1084_v29  ;;  %vm918_vm15 = vcmp.gt.f32.partialorder %v811_v23, 0.0 }
 0x170   : > { %vm905_vm4 = vcmp.gt.f32.partialorder %v779_v35, 0.0  ;;  %v969_v41 = vmul.f32 0.2, %v779_v35  ;;  %v781_v42 = vadd.f32 %v780_v37, %v4406_v6  ;;  %1384 = vmatmul.mubr.bf16.gmra.mxu1 %v1083_v36  ;;  %v1032_v53 = vsel %vm904_vm5, %v777_v22, %v968_v39  ;;  %v4482_v36 = vpop.f32.mrf.mxu1 }
 0x171   : > { %v784_v44 = vpop.f32.mrf.mxu0  ;;  %v807_v22 = vadd.f32 %v4413_v11, %v4406_v6  ;;  %v982_v39 = vmul.f32 0.2, %v811_v23  ;;  %vm922_vm5 = vcmp.gt.f32.partialorder %v821_v55, 0.0 }
 0x172   : > { %vm906_vm7 = vcmp.gt.f32.partialorder %v781_v42, 0.0  ;;  %v970_v48 = vmul.f32 0.2, %v781_v42  ;;  %v1033_v50 = vsel %vm905_vm4, %v779_v35, %v969_v41  ;;  %v785_v56 = vadd.f32 %v784_v44, %v4409_v7  ;;  %v4486_v47 = vpop.f32.mrf.mxu1 }
 0x173   : > { %v786_v49 = vpop.f32.mrf.mxu0  ;;  %v1085_v2 = vpack.c.bf16 %v1033_v50, %v1031_v59  ;;  %vm916_vm12 = vcmp.gt.f32.partialorder %v807_v22, 0.0  ;;  %v980_v38 = vmul.f32 0.2, %v807_v22  ;;  %v809_v50 = vadd.f32 %v4417_v15, %v4409_v7 }
 0x174   : > { %v787_v52 = vadd.f32 %v786_v49, %v4406_v6  ;;  %v1034_v54 = vsel %vm906_vm7, %v781_v42, %v970_v48  ;;  %v971_v13 = vmul.f32 0.2, %v785_v56  ;;  %vm907_vm10 = vcmp.gt.f32.partialorder %v785_v56, 0.0 }
 0x175   : > { %v788_v57 = vpop.f32.mrf.mxu0  ;;  %v1086_v58 = vpack.c.bf16 %v1034_v54, %v1032_v53  ;;  %v805_v48 = vadd.f32 %v4411_v9, %v4409_v7  ;;  %v1044_v54 = vsel %vm916_vm12, %v807_v22, %v980_v38  ;;  %v4497_v9 = vpop.f32.mrf.mxu1  ;;  %vm917_vm3 = vcmp.gt.f32.partialorder %v809_v50, 0.0 }
 0x176   : > { %v789_v63 = vadd.f32 %v788_v57, %v4409_v7  ;;  %v972_v8 = vmul.f32 0.2, %v787_v52  ;;  %vm908_vm9 = vcmp.gt.f32.partialorder %v787_v52, 0.0  ;;  %v1035_v35 = vsel %vm907_vm10, %v785_v56, %v971_v13 }
 0x177   : > { %v790_v3 = vpop.f32.mrf.mxu0  ;;  %1393 = vmatprep.mubr.bf16.mxu1 %v1086_v58  ;;  %v1046_v58 = vsel %vm918_vm15, %v811_v23, %v982_v39  ;;  %vm915_vm2 = vcmp.gt.f32.partialorder %v805_v48, 0.0  ;;  %v4499_v51 = vpop.f32.mrf.mxu1  ;;  %v1050_v22 = vsel %vm922_vm5, %v821_v55, %v986_v5  ;;  %v841_v38 = vadd.f32 %v4465_v45, %v4406_v6  ;;  %v3898_v45 = vld [vmem:[#allocation6 + $0x84] ss:$8 sps:$4 sm:$0xff]  }
 0x178   : > { %vm909_vm8 = vcmp.gt.f32.partialorder %v789_v63, 0.0  ;;  %v973_v10 = vmul.f32 0.2, %v789_v63  ;;  %v791_v12 = vadd.f32 %v790_v3, %v4406_v6  ;;  %1394 = vmatmul.mubr.bf16.gmra.mxu1 %v1085_v2  ;;  %v1036_v27 = vsel %vm908_vm9, %v787_v52, %v972_v8 }
 0x179   : > { %v794_v16 = vpop.f32.mrf.mxu0  ;;  %v817_v52 = vadd.f32 %v4425_v30, %v4406_v6  ;;  %v979_v2 = vmul.f32 0.2, %v805_v48  ;;  %v981_v3 = vmul.f32 0.2, %v809_v50  ;;  %v1092_v15 = vpack.c.bf16 %v1046_v58, %v1044_v54  ;;  %v4509_v23 = vpop.f32.mrf.mxu1 }
 0x17a   : > { %vm910_vm11 = vcmp.gt.f32.partialorder %v791_v12, 0.0  ;;  %v974_v20 = vmul.f32 0.2, %v791_v12  ;;  %v1037_v24 = vsel %vm909_vm8, %v789_v63, %v973_v10  ;;  %v795_v29 = vadd.f32 %v794_v16, %v4409_v7 }
 0x17b   : > { %v796_v21 = vpop.f32.mrf.mxu0  ;;  %v1087_v11 = vpack.c.bf16 %v1037_v24, %v1035_v35  ;;  %v984_v30 = vmul.f32 0.2, %v817_v52  ;;  %vm920_vm4 = vcmp.gt.f32.partialorder %v817_v52, 0.0  ;;  %v815_v8 = vadd.f32 %v4423_v25, %v4409_v7 }
 0x17c   : > { %v797_v26 = vadd.f32 %v796_v21, %v4406_v6  ;;  %v1038_v28 = vsel %vm910_vm11, %v791_v12, %v974_v20  ;;  %v975_v44 = vmul.f32 0.2, %v795_v29  ;;  %vm911_vm0 = vcmp.gt.f32.partialorder %v795_v29, 0.0 }
 0x17d   : > { %v798_v31 = vpop.f32.mrf.mxu0  ;;  %v1088_v33 = vpack.c.bf16 %v1038_v28, %v1036_v27  ;;  %v819_v10 = vadd.f32 %v4429_v40, %v4409_v7  ;;  %v1043_v12 = vsel %vm915_vm2, %v805_v48, %v979_v2  ;;  %v1045_v13 = vsel %vm917_vm3, %v809_v50, %v981_v3 }
 0x17e   : > { %v799_v37 = vadd.f32 %v798_v31, %v4409_v7  ;;  %v976_v41 = vmul.f32 0.2, %v797_v26  ;;  %vm912_vm14 = vcmp.gt.f32.partialorder %v797_v26, 0.0  ;;  %v1039_v62 = vsel %vm911_vm0, %v795_v29, %v975_v44  ;;  %v3892_v29 = vld [vmem:[#allocation6 + $0xa4] ss:$8 sps:$4 sm:$0xff]  }
 0x17f   : > { %v800_v19 = vpop.f32.mrf.mxu0  ;;  %1403 = vmatprep.mubr.bf16.mxu1 %v1088_v33  ;;  %v827_v16 = vadd.f32 %v4441_v18, %v4406_v6  ;;  %v831_v20 = vadd.f32 %v4449_v46, %v4406_v6  ;;  %v1048_v21 = vsel %vm920_vm4, %v817_v52, %v984_v30  ;;  %v1091_v24 = vpack.c.bf16 %v1045_v13, %v1043_v12  ;;  %v860_v18 = vpop.f32.mrf.mxu1  ;;  %v3890_v31 = vld [vmem:[#allocation6 + $0xa0] ss:$8 sps:$4 sm:$0xff]  }
 0x180   : > { %vm913_vm13 = vcmp.gt.f32.partialorder %v799_v37, 0.0  ;;  %v977_v42 = vmul.f32 0.2, %v799_v37  ;;  %v801_v43 = vadd.f32 %v800_v19, %v4406_v6  ;;  %1404 = vmatmul.mubr.bf16.gmra.mxu1 %v1087_v11  ;;  %v1040_v56 = vsel %vm912_vm14, %v797_v26, %v976_v41  ;;  %1958 = vmatprep.subr.bf16.mxu0 %v3892_v29  ;;  %v3896_v52 = vld [vmem:[#allocation6 + $0x80] ss:$8 sps:$4 sm:$0xff]  }
 0x181   : > { %v983_v26 = vmul.f32 0.2, %v815_v8  ;;  %v985_v27 = vmul.f32 0.2, %v819_v10  ;;  %v1094_v28 = vpack.c.bf16 %v1050_v22, %v1048_v21  ;;  %vm919_vm6 = vcmp.gt.f32.partialorder %v815_v8, 0.0  ;;  %1959 = vmatpush2.bf16.msra.mxu0 %v3890_v31  ;;  %v4519_v41 = vpop.f32.mrf.mxu1 }
 0x182   : > { %vm914_vm1 = vcmp.gt.f32.partialorder %v801_v43, 0.0  ;;  %v978_v49 = vmul.f32 0.2, %v801_v43  ;;  %v1041_v53 = vsel %vm913_vm13, %v799_v37, %v977_v42  ;;  %vm921_vm7 = vcmp.gt.f32.partialorder %v819_v10, 0.0  ;;  %v3895_v42 = vld [vmem:[#allocation6 + $0x94] ss:$8 sps:$4 sm:$0xff]  }
 0x183   : > { %v1089_v63 = vpack.c.bf16 %v1041_v53, %v1039_v62  ;;  %v988_v25 = vmul.f32 0.2, %v827_v16  ;;  %v990_v40 = vmul.f32 0.2, %v831_v20  ;;  %vm924_vm8 = vcmp.gt.f32.partialorder %v827_v16, 0.0  ;;  %1960 = vmatprep.subr.bf16.mxu0 %v3895_v42 }
 0x184   : > { %v1042_v57 = vsel %vm914_vm1, %v801_v43, %v978_v49  ;;  %vm926_vm9 = vcmp.gt.f32.partialorder %v831_v20, 0.0  ;;  %v825_v46 = vadd.f32 %v4437_v1, %v4409_v7  ;;  %v829_v33 = vadd.f32 %v4445_v34, %v4409_v7  ;;  %v3893_v1 = vld [vmem:[#allocation6 + $0x90] ss:$8 sps:$4 sm:$0xff]  }
 0x185   : > { %v1090_v59 = vpack.c.bf16 %v1042_v57, %v1040_v56  ;;  %v1047_v35 = vsel %vm919_vm6, %v815_v8, %v983_v26  ;;  %v1049_v37 = vsel %vm921_vm7, %v819_v10, %v985_v27  ;;  %v837_v11 = vadd.f32 %v4457_v14, %v4406_v6  ;;  %1961 = vmatpush2.bf16.msra.mxu0 %v3893_v1  ;;  %v866_v14 = vpop.f32.mrf.mxu1 }
 0x186   : > { %v1052_v19 = vsel %vm924_vm8, %v827_v16, %v988_v25  ;;  %v1054_v39 = vsel %vm926_vm9, %v831_v20, %v990_v40  ;;  %v1093_v43 = vpack.c.bf16 %v1049_v37, %v1047_v35  ;;  %v987_v44 = vmul.f32 0.2, %v825_v46  ;;  %1962 = vmatprep.subr.bf16.mxu0 %v3898_v45 }
 0x187   : > { %1413 = vmatprep.mubr.bf16.mxu1 %v1090_v59  ;;  %v989_v48 = vmul.f32 0.2, %v829_v33  ;;  %v1096_v34 = vpack.c.bf16 %v1054_v39, %v1052_v19  ;;  %vm923_vm10 = vcmp.gt.f32.partialorder %v825_v46, 0.0  ;;  %vm925_vm11 = vcmp.gt.f32.partialorder %v829_v33, 0.0 }
 0x188   : > { %1414 = vmatmul.mubr.bf16.gmra.mxu1 %v1089_v63  ;;  %v992_v49 = vmul.f32 0.2, %v837_v11  ;;  %v994_v50 = vmul.f32 0.2, %v841_v38  ;;  %vm928_vm12 = vcmp.gt.f32.partialorder %v837_v11, 0.0  ;;  %vm930_vm13 = vcmp.gt.f32.partialorder %v841_v38, 0.0  ;;  %v868_v63 = vpop.f32.mrf.mxu1 }
 0x189   : > { %1423 = vmatprep.mubr.bf16.mxu1 %v1092_v15  ;;  %v835_v53 = vadd.f32 %v4453_v60, %v4409_v7  ;;  %v839_v54 = vadd.f32 %v4461_v32, %v4409_v7  ;;  %v1051_v55 = vsel %vm923_vm10, %v825_v46, %v987_v44  ;;  %v1053_v56 = vsel %vm925_vm11, %v829_v33, %v989_v48 }
 0x18a   : > { %v847_v57 = vadd.f32 %v4473_v17, %v4406_v6  ;;  %v851_v58 = vadd.f32 %v4486_v47, %v4406_v6  ;;  %v1056_v59 = vsel %vm928_vm12, %v837_v11, %v992_v49  ;;  %v1058_v62 = vsel %vm930_vm13, %v841_v38, %v994_v50  ;;  %1963 = vmatpush2.bf16.msra.mxu0 %v3896_v52  ;;  %v870_v17 = vpop.f32.mrf.mxu1 }
 0x18b   : > { %v1095_v2 = vpack.c.bf16 %v1053_v56, %v1051_v55  ;;  %v991_v3 = vmul.f32 0.2, %v835_v53  ;;  %v993_v15 = vmul.f32 0.2, %v839_v54  ;;  %v1098_v60 = vpack.c.bf16 %v1058_v62, %v1056_v59 }
 0x18c   : > { %vm927_vm14 = vcmp.gt.f32.partialorder %v835_v53, 0.0  ;;  %vm929_vm15 = vcmp.gt.f32.partialorder %v839_v54, 0.0  ;;  %v996_v32 = vmul.f32 0.2, %v847_v57  ;;  %v998_v30 = vmul.f32 0.2, %v851_v58  ;;  %v874_v21 = vpop.f32.mrf.mxu1 }
 0x18d   : > { %vm932_vm0 = vcmp.gt.f32.partialorder %v847_v57, 0.0  ;;  %vm934_vm1 = vcmp.gt.f32.partialorder %v851_v58, 0.0  ;;  %v845_v47 = vadd.f32 %v4469_v61, %v4409_v7  ;;  %v849_v5 = vadd.f32 %v4482_v36, %v4409_v7 }
 0x18e   : > { %v1055_v8 = vsel %vm927_vm14, %v835_v53, %v991_v3  ;;  %v1057_v10 = vsel %vm929_vm15, %v839_v54, %v993_v15  ;;  %v857_v12 = vadd.f32 %v4499_v51, %v4406_v6  ;;  %v861_v13 = vadd.f32 %v860_v18, %v4406_v6  ;;  %v876_v36 = vpop.f32.mrf.mxu1 }
 0x18f   : > { %v1060_v16 = vsel %vm932_vm0, %v847_v57, %v996_v32  ;;  %v1062_v20 = vsel %vm934_vm1, %v851_v58, %v998_v30  ;;  %v1097_v22 = vpack.c.bf16 %v1057_v10, %v1055_v8  ;;  %v997_v26 = vmul.f32 0.2, %v849_v5  ;;  %v3899_v30 = vld [vmem:[#allocation7 + $0x70] ss:$8 sps:$4 sm:$0xff]   ;;  %v3907_v8 = vld [vmem:[#allocation7 + $0x54] ss:$8 sps:$4 sm:$0xff]  }
 0x190   : > { %1424 = vmatmul.mubr.bf16.gmra.mxu1 %v1091_v24  ;;  %v995_v24 = vmul.f32 0.2, %v845_v47  ;;  %v1100_v27 = vpack.c.bf16 %v1062_v20, %v1060_v16  ;;  %vm931_vm2 = vcmp.gt.f32.partialorder %v845_v47, 0.0  ;;  %vm933_vm3 = vcmp.gt.f32.partialorder %v849_v5, 0.0  ;;  %v878_v35 = vpop.f32.mrf.mxu1  ;;  %v3908_v10 = vld [vmem:[#allocation7 + $0x40] ss:$8 sps:$4 sm:$0xff]  }
 0x191   : > { %1433 = vmatprep.mubr.bf16.mxu1 %v1094_v28  ;;  %v1000_v61 = vmul.f32 0.2, %v857_v12  ;;  %v1002_v28 = vmul.f32 0.2, %v861_v13  ;;  %vm936_vm4 = vcmp.gt.f32.partialorder %v857_v12, 0.0  ;;  %vm938_vm5 = vcmp.gt.f32.partialorder %v861_v13, 0.0 }
 0x192   : > { %v855_v51 = vadd.f32 %v4497_v9, %v4409_v7  ;;  %v859_v25 = vadd.f32 %v4509_v23, %v4409_v7  ;;  %v1059_v40 = vsel %vm931_vm2, %v845_v47, %v995_v24  ;;  %v1061_v18 = vsel %vm933_vm3, %v849_v5, %v997_v26  ;;  %v880_v23 = vpop.f32.mrf.mxu1  ;;  %v3904_v47 = vld [vmem:[#allocation7 + $0x64] ss:$8 sps:$4 sm:$0xff]   ;;  %v3905_v5 = vld [vmem:[#allocation7 + $0x50] ss:$8 sps:$4 sm:$0xff]  }
 0x193   : > { %v867_v29 = vadd.f32 %v866_v14, %v4406_v6  ;;  %v871_v31 = vadd.f32 %v870_v17, %v4406_v6  ;;  %v1064_v46 = vsel %vm936_vm4, %v857_v12, %v1000_v61  ;;  %v1066_v33 = vsel %vm938_vm5, %v861_v13, %v1002_v28  ;;  %v3901_v17 = vld [vmem:[#allocation7 + $0x74] ss:$8 sps:$4 sm:$0xff]   ;;  %v3910_v12 = vld [vmem:[#allocation7 + $0x44] ss:$8 sps:$4 sm:$0xff]   ;;  %v1139_v13 = vld [vmem:[%s4941_s4] sm:$0x3] }
 0x194   : > { %v1099_v37 = vpack.c.bf16 %v1061_v18, %v1059_v40  ;;  %v999_v11 = vmul.f32 0.2, %v855_v51  ;;  %v1001_v38 = vmul.f32 0.2, %v859_v25  ;;  %v1102_v19 = vpack.c.bf16 %v1066_v33, %v1064_v46  ;;  %2553 = vmatprep.subr.bf16.mxu1 %v3901_v17  ;;  %v3916_v26 = vld [vmem:[#allocation7 + $0x24] ss:$8 sps:$4 sm:$0xff]  }
 0x195   : > { %vm935_vm6 = vcmp.gt.f32.partialorder %v855_v51, 0.0  ;;  %vm937_vm7 = vcmp.gt.f32.partialorder %v859_v25, 0.0  ;;  %v1004_v39 = vmul.f32 0.2, %v867_v29  ;;  %v1006_v9 = vmul.f32 0.2, %v871_v31  ;;  %2554 = vmatpush1.bf16.msra.mxu1 %v3899_v30 }
 0x196   : > { %vm940_vm8 = vcmp.gt.f32.partialorder %v867_v29, 0.0  ;;  %vm942_vm9 = vcmp.gt.f32.partialorder %v871_v31, 0.0  ;;  %v865_v42 = vadd.f32 %v4519_v41, %v4409_v7  ;;  %v1063_v1 = vsel %vm935_vm6, %v855_v51, %v999_v11  ;;  %2555 = vmatprep.subr.bf16.mxu1 %v3904_v47  ;;  %v3914_v28 = vld [vmem:[#allocation7 + $0x20] ss:$8 sps:$4 sm:$0xff]   ;;  %v3917_v33 = vld [vmem:[#allocation7 + $0x10] ss:$8 sps:$4 sm:$0xff]  }
 0x197   : > { %v1065_v44 = vsel %vm937_vm7, %v859_v25, %v1001_v38  ;;  %v877_v48 = vadd.f32 %v876_v36, %v4406_v6  ;;  %v1068_v49 = vsel %vm940_vm8, %v867_v29, %v1004_v39  ;;  %v1070_v50 = vsel %vm942_vm9, %v871_v31, %v1006_v9  ;;  %v3922_v11 = vld [vmem:[#allocation7 + $0x4] ss:$8 sps:$4 sm:$0xff]   ;;  %v3931_v17 = vld [vmem:[#allocation7 + $0xd4] ss:$8 sps:$4 sm:$0xff]  }
 0x198   : > { %1434 = vmatmul.mubr.bf16.gmra.mxu1 %v1093_v43  ;;  %v869_v43 = vadd.f32 %v868_v63, %v4409_v7  ;;  %v1101_v14 = vpack.c.bf16 %v1065_v44, %v1063_v1  ;;  %v1003_v45 = vmul.f32 0.2, %v865_v42  ;;  %v1104_v53 = vpack.c.bf16 %v1070_v50, %v1068_v49  ;;  %v3925_v49 = vld [vmem:[#allocation7 + $0xf4] ss:$8 sps:$4 sm:$0xff]  }
 0x199   : > { %1443 = vmatprep.mubr.bf16.mxu1 %v1096_v34  ;;  %v881_v34 = vadd.f32 %v880_v23, %v4406_v6  ;;  %vm939_vm10 = vcmp.gt.f32.partialorder %v865_v42, 0.0  ;;  %v1008_v54 = vmul.f32 0.2, %v877_v48  ;;  %vm944_vm12 = vcmp.gt.f32.partialorder %v877_v48, 0.0 }
 0x19a   : > { %v1005_v52 = vmul.f32 0.2, %v869_v43  ;;  %vm941_vm11 = vcmp.gt.f32.partialorder %v869_v43, 0.0  ;;  %v875_v41 = vadd.f32 %v874_v21, %v4409_v7  ;;  %v879_v56 = vadd.f32 %v878_v35, %v4409_v7  ;;  %v3902_v7 = vld [vmem:[#allocation7 + $0x60] ss:$8 sps:$4 sm:$0xff]  }
 0x19b   : > { %v1010_v55 = vmul.f32 0.2, %v881_v34  ;;  %vm946_vm13 = vcmp.gt.f32.partialorder %v881_v34, 0.0  ;;  %v1067_v57 = vsel %vm939_vm10, %v865_v42, %v1003_v45  ;;  %v1072_v58 = vsel %vm944_vm12, %v877_v48, %v1008_v54  ;;  %2556 = vmatpush1.bf16.msra.mxu1 %v3902_v7  ;;  %v3911_v21 = vld [vmem:[#allocation7 + $0x30] ss:$8 sps:$4 sm:$0xff]  }
 0x19c   : > { %v1069_v6 = vsel %vm941_vm11, %v869_v43, %v1005_v52  ;;  %v1007_v63 = vmul.f32 0.2, %v875_v41  ;;  %vm943_vm14 = vcmp.gt.f32.partialorder %v875_v41, 0.0  ;;  %vm945_vm15 = vcmp.gt.f32.partialorder %v879_v56, 0.0  ;;  %2557 = vmatprep.subr.bf16.mxu1 %v3907_v8  ;;  %v3920_v43 = vld [vmem:[#allocation7] ss:$8 sps:$4 sm:$0xff]  }
 0x19d   : > { %v1074_v59 = vsel %vm946_vm13, %v881_v34, %v1010_v55  ;;  %v1103_v62 = vpack.c.bf16 %v1069_v6, %v1067_v57  ;;  %v4553_v16 = vrot.slane %v1139_v13, %v4400_v4  ;;  %v4556_v20 = vrot.slane %v1139_v13, %v4398_v0  ;;  %v3923_v52 = vld [vmem:[#allocation7 + $0xf0] ss:$8 sps:$4 sm:$0xff]   ;;  %v3928_v57 = vld [vmem:[#allocation7 + $0xe4] ss:$8 sps:$4 sm:$0xff]  }
 0x19e   : > { %v1106_v3 = vpack.c.bf16 %v1074_v59, %v1072_v58  ;;  %v1071_v15 = vsel %vm943_vm14, %v875_v41, %v1007_v63  ;;  %v3929_v8 = vld [vmem:[#allocation7 + $0xd0] ss:$8 sps:$4 sm:$0xff]  }
 0x19f   : > { %2558 = vmatpush1.bf16.msra.mxu1 %v3905_v5 }
 0x1a0   : > { %1444 = vmatmul.mubr.bf16.gmra.mxu1 %v1095_v2  ;;  %v1009_v2 = vmul.f32 0.2, %v879_v56  ;;  %2559 = vmatprep.subr.bf16.mxu1 %v3910_v12 }
 0x1a1   : > { %1453 = vmatprep.mubr.bf16.mxu1 %v1098_v60 }
 0x1a2   : > { %v1073_v60 = vsel %vm945_vm15, %v879_v56, %v1009_v2 }
 0x1a3   : > { %v1105_v32 = vpack.c.bf16 %v1073_v60, %v1071_v15  ;;  %2560 = vmatpush1.bf16.msra.mxu1 %v3908_v10 }
 0x1a8   : > { %1454 = vmatmul.mubr.bf16.gmra.mxu1 %v1097_v22  ;;  %v3913_v22 = vld [vmem:[#allocation7 + $0x34] ss:$8 sps:$4 sm:$0xff]  }
 0x1a9   : > { %1463 = vmatprep.mubr.bf16.mxu1 %v1100_v27  ;;  %2561 = vmatprep.subr.bf16.mxu1 %v3913_v22 }
 0x1aa   : > { %2562 = vmatpush1.bf16.msra.mxu1 %v3911_v21 }
 0x1ab   : > { %2563 = vmatprep.subr.bf16.mxu1 %v3916_v26 }
 0x1ae   : > { %2564 = vmatpush1.bf16.msra.mxu1 %v3914_v28 }
 0x1b0   : > { %1464 = vmatmul.mubr.bf16.gmra.mxu1 %v1099_v37  ;;  %v3919_v37 = vld [vmem:[#allocation7 + $0x14] ss:$8 sps:$4 sm:$0xff]  }
 0x1b1   : > { %1473 = vmatprep.mubr.bf16.mxu1 %v1102_v19  ;;  %2565 = vmatprep.subr.bf16.mxu1 %v3919_v37 }
 0x1b2   : > { %2566 = vmatpush1.bf16.msra.mxu1 %v3917_v33 }
 0x1b3   : > { %2567 = vmatprep.subr.bf16.mxu1 %v3922_v11  ;;  %v3935_v11 = vld [vmem:[#allocation7 + $0xb0] ss:$8 sps:$4 sm:$0xff]  }
 0x1b6   : > { %2568 = vmatpush1.bf16.msra.mxu1 %v3920_v43 }
 0x1b7   : > { %2569 = vmatprep.subr.bf16.mxu1 %v3925_v49 }
 0x1b8   : > { %1474 = vmatmul.mubr.bf16.gmra.mxu1 %v1101_v14 }
 0x1b9   : > { %1483 = vmatprep.mubr.bf16.mxu1 %v1104_v53 }
 0x1ba   : > { %2570 = vmatpush2.bf16.msra.mxu1 %v3923_v52 }
 0x1bb   : > { %2571 = vmatprep.subr.bf16.mxu1 %v3928_v57  ;;  %v3941_v57 = vld [vmem:[#allocation7 + $0x90] ss:$8 sps:$4 sm:$0xff]  }
 0x1c0   : > { %1484 = vmatmul.mubr.bf16.gmra.mxu1 %v1103_v62 }
 0x1c1   : > { %1493 = vmatprep.mubr.bf16.mxu1 %v1106_v3  ;;  %v3926_v3 = vld [vmem:[#allocation7 + $0xe0] ss:$8 sps:$4 sm:$0xff]  }
 0x1c2   : > { %2572 = vmatpush2.bf16.msra.mxu1 %v3926_v3 }
 0x1c3   : > { %2573 = vmatprep.subr.bf16.mxu1 %v3931_v17 }
 0x1c6   : > { %2574 = vmatpush2.bf16.msra.mxu1 %v3929_v8 }
 0x1c8   : > { %1494 = vmatmul.mubr.bf16.gmra.mxu1 %v1105_v32 }
 0x210   : > { %v1345_v24 = vpop.f32.mrf.mxu1 }
 0x211   : > { %v1346_v27 = vadd.f32 %v1345_v24, %v4553_v16  ;;  %v3934_v24 = vld [vmem:[#allocation7 + $0xc4] ss:$8 sps:$4 sm:$0xff]  }
 0x212   : > { %v1347_v61 = vpop.f32.mrf.mxu1  ;;  %2575 = vmatprep.subr.bf16.mxu1 %v3934_v24 }
 0x213   : > { %v1348_v36 = vadd.f32 %v1347_v61, %v4556_v20  ;;  %v1568_v40 = vmul.f32 0.2, %v1346_v27  ;;  %vm1504_vm2 = vcmp.gt.f32.partialorder %v1346_v27, 0.0 }
 0x214   : > { %v1349_v51 = vpop.f32.mrf.mxu1 }
 0x215   : > { %v1350_v25 = vadd.f32 %v1349_v51, %v4553_v16  ;;  %v1569_v18 = vmul.f32 0.2, %v1348_v36  ;;  %vm1505_vm1 = vcmp.gt.f32.partialorder %v1348_v36, 0.0  ;;  %v1632_v1 = vsel %vm1504_vm2, %v1346_v27, %v1568_v40 }
 0x216   : > { %v1351_v29 = vpop.f32.mrf.mxu1 }
 0x217   : > { %vm1506_vm0 = vcmp.gt.f32.partialorder %v1350_v25, 0.0  ;;  %v1570_v31 = vmul.f32 0.2, %v1350_v25  ;;  %v1352_v46 = vadd.f32 %v1351_v29, %v4556_v20  ;;  %v1633_v23 = vsel %vm1505_vm1, %v1348_v36, %v1569_v18 }
 0x218   : > { %v1355_v35 = vpop.f32.mrf.mxu1 }
 0x219   : > { %vm1507_vm3 = vcmp.gt.f32.partialorder %v1352_v46, 0.0  ;;  %v1571_v38 = vmul.f32 0.2, %v1352_v46  ;;  %v1634_v19 = vsel %vm1506_vm0, %v1350_v25, %v1570_v31  ;;  %v1356_v44 = vadd.f32 %v1355_v35, %v4553_v16  ;;  %v3932_v25 = vld [vmem:[#allocation7 + $0xc0] ss:$8 sps:$4 sm:$0xff]  }
 0x21a   : > { %v1357_v39 = vpop.f32.mrf.mxu1  ;;  %v1696_v50 = vpack.c.bf16 %v1634_v19, %v1632_v1  ;;  %2576 = vmatpush2.bf16.msra.mxu1 %v3932_v25 }
 0x21b   : > { %v1358_v9 = vadd.f32 %v1357_v39, %v4556_v20  ;;  %v1635_v42 = vsel %vm1507_vm3, %v1352_v46, %v1571_v38  ;;  %v1572_v41 = vmul.f32 0.2, %v1356_v44  ;;  %vm1508_vm6 = vcmp.gt.f32.partialorder %v1356_v44, 0.0  ;;  %v3937_v46 = vld [vmem:[#allocation7 + $0xb4] ss:$8 sps:$4 sm:$0xff]  }
 0x21c   : > { %v1359_v48 = vpop.f32.mrf.mxu1  ;;  %v1697_v34 = vpack.c.bf16 %v1635_v42, %v1633_v23  ;;  %2577 = vmatprep.subr.bf16.mxu1 %v3937_v46  ;;  %v3940_v42 = vld [vmem:[#allocation7 + $0xa4] ss:$8 sps:$4 sm:$0xff]  }
 0x21d   : > { %v1360_v14 = vadd.f32 %v1359_v48, %v4553_v16  ;;  %v1573_v53 = vmul.f32 0.2, %v1358_v9  ;;  %vm1509_vm5 = vcmp.gt.f32.partialorder %v1358_v9, 0.0  ;;  %v1636_v30 = vsel %vm1508_vm6, %v1356_v44, %v1572_v41 }
 0x21e   : > { %v1361_v45 = vpop.f32.mrf.mxu1  ;;  %1964 = vmatprep.mubr.bf16.mxu0 %v1697_v34  ;;  %2578 = vmatpush2.bf16.msra.mxu1 %v3935_v11 }
 0x21f   : > { %vm1510_vm4 = vcmp.gt.f32.partialorder %v1360_v14, 0.0  ;;  %v1574_v54 = vmul.f32 0.2, %v1360_v14  ;;  %v1362_v55 = vadd.f32 %v1361_v45, %v4556_v20  ;;  %1965 = vmatmul.mubr.bf16.vlgmr.msra.gmra.mxu0 %v1696_v50  ;;  %v1637_v63 = vsel %vm1509_vm5, %v1358_v9, %v1573_v53  ;;  %v3938_v50 = vld [vmem:[#allocation7 + $0xa0] ss:$8 sps:$4 sm:$0xff]   ;;  %2579 = vmatprep.subr.bf16.mxu1 %v3940_v42 }
 0x220   : > { %v1365_v56 = vpop.f32.mrf.mxu1 }
 0x221   : > { %vm1511_vm7 = vcmp.gt.f32.partialorder %v1362_v55, 0.0  ;;  %v1575_v6 = vmul.f32 0.2, %v1362_v55  ;;  %v1638_v59 = vsel %vm1510_vm4, %v1360_v14, %v1574_v54  ;;  %v1366_v15 = vadd.f32 %v1365_v56, %v4553_v16  ;;  %v3943_v54 = vld [vmem:[#allocation7 + $0x94] ss:$8 sps:$4 sm:$0xff]  }
 0x222   : > { %v1367_v58 = vpop.f32.mrf.mxu1  ;;  %v1698_v47 = vpack.c.bf16 %v1638_v59, %v1636_v30  ;;  %2580 = vmatpush2.bf16.msra.mxu1 %v3938_v50 }
 0x223   : > { %v1368_v62 = vadd.f32 %v1367_v58, %v4556_v20  ;;  %v1639_v2 = vsel %vm1511_vm7, %v1362_v55, %v1575_v6  ;;  %v1576_v21 = vmul.f32 0.2, %v1366_v15  ;;  %vm1512_vm10 = vcmp.gt.f32.partialorder %v1366_v15, 0.0  ;;  %2581 = vmatprep.subr.bf16.mxu1 %v3943_v54 }
 0x224   : > { %v1369_v60 = vpop.f32.mrf.mxu1  ;;  %v1699_v32 = vpack.c.bf16 %v1639_v2, %v1637_v63 }
 0x225   : > { %v1370_v7 = vadd.f32 %v1369_v60, %v4553_v16  ;;  %v1577_v10 = vmul.f32 0.2, %v1368_v62  ;;  %vm1513_vm9 = vcmp.gt.f32.partialorder %v1368_v62, 0.0  ;;  %v1640_v31 = vsel %vm1512_vm10, %v1366_v15, %v1576_v21 }
 0x226   : > { %v1371_v5 = vpop.f32.mrf.mxu1  ;;  %1974 = vmatprep.mubr.bf16.mxu0 %v1699_v32  ;;  %2582 = vmatpush2.bf16.msra.mxu1 %v3941_v57 }
 0x227   : > { %vm1514_vm8 = vcmp.gt.f32.partialorder %v1370_v7, 0.0  ;;  %v1578_v12 = vmul.f32 0.2, %v1370_v7  ;;  %v1372_v13 = vadd.f32 %v1371_v5, %v4556_v20  ;;  %1975 = vmatmul.mubr.bf16.gmra.mxu0 %v1698_v47  ;;  %v1641_v36 = vsel %vm1513_vm9, %v1368_v62, %v1577_v10 }
 0x228   : > { %v1375_v22 = vpop.f32.mrf.mxu1 }
 0x229   : > { %vm1515_vm11 = vcmp.gt.f32.partialorder %v1372_v13, 0.0  ;;  %v1579_v26 = vmul.f32 0.2, %v1372_v13  ;;  %v1642_v61 = vsel %vm1514_vm8, %v1370_v7, %v1578_v12  ;;  %v1376_v40 = vadd.f32 %v1375_v22, %v4553_v16 }
 0x22a   : > { %v1377_v27 = vpop.f32.mrf.mxu1  ;;  %v1700_v35 = vpack.c.bf16 %v1642_v61, %v1640_v31 }
 0x22b   : > { %v1378_v28 = vadd.f32 %v1377_v27, %v4556_v20  ;;  %v1643_v51 = vsel %vm1515_vm11, %v1372_v13, %v1579_v26  ;;  %v1580_v9 = vmul.f32 0.2, %v1376_v40  ;;  %vm1516_vm14 = vcmp.gt.f32.partialorder %v1376_v40, 0.0 }
 0x22c   : > { %v1379_v18 = vpop.f32.mrf.mxu1  ;;  %v1701_v29 = vpack.c.bf16 %v1643_v51, %v1641_v36 }
 0x22d   : > { %v1380_v33 = vadd.f32 %v1379_v18, %v4553_v16  ;;  %v1581_v38 = vmul.f32 0.2, %v1378_v28  ;;  %vm1517_vm13 = vcmp.gt.f32.partialorder %v1378_v28, 0.0  ;;  %v1644_v53 = vsel %vm1516_vm14, %v1376_v40, %v1580_v9 }
 0x22e   : > { %v1381_v37 = vpop.f32.mrf.mxu1  ;;  %1984 = vmatprep.mubr.bf16.mxu0 %v1701_v29 }
 0x22f   : > { %vm1518_vm12 = vcmp.gt.f32.partialorder %v1380_v33, 0.0  ;;  %v1582_v19 = vmul.f32 0.2, %v1380_v33  ;;  %v1382_v39 = vadd.f32 %v1381_v37, %v4556_v20  ;;  %1985 = vmatmul.mubr.bf16.gmra.mxu0 %v1700_v35  ;;  %v1645_v34 = vsel %vm1517_vm13, %v1378_v28, %v1581_v38 }
 0x230   : > { %v1385_v23 = vpop.f32.mrf.mxu1 }
 0x231   : > { %vm1519_vm15 = vcmp.gt.f32.partialorder %v1382_v39, 0.0  ;;  %v1583_v43 = vmul.f32 0.2, %v1382_v39  ;;  %v1646_v44 = vsel %vm1518_vm12, %v1380_v33, %v1582_v19  ;;  %v1386_v14 = vadd.f32 %v1385_v23, %v4553_v16 }
 0x232   : > { %v1387_v1 = vpop.f32.mrf.mxu1  ;;  %v1702_v41 = vpack.c.bf16 %v1646_v44, %v1644_v53 }
 0x233   : > { %v1388_v48 = vadd.f32 %v1387_v1, %v4556_v20  ;;  %v1647_v49 = vsel %vm1519_vm15, %v1382_v39, %v1583_v43  ;;  %v1584_v62 = vmul.f32 0.2, %v1386_v14  ;;  %vm1520_vm2 = vcmp.gt.f32.partialorder %v1386_v14, 0.0 }
 0x234   : > { %v1389_v45 = vpop.f32.mrf.mxu1  ;;  %v1703_v52 = vpack.c.bf16 %v1647_v49, %v1645_v34 }
 0x235   : > { %v1390_v55 = vadd.f32 %v1389_v45, %v4553_v16  ;;  %v1585_v6 = vmul.f32 0.2, %v1388_v48  ;;  %vm1521_vm1 = vcmp.gt.f32.partialorder %v1388_v48, 0.0  ;;  %v1648_v5 = vsel %vm1520_vm2, %v1386_v14, %v1584_v62 }
 0x236   : > { %v1391_v56 = vpop.f32.mrf.mxu1  ;;  %1994 = vmatprep.mubr.bf16.mxu0 %v1703_v52 }
 0x237   : > { %vm1522_vm0 = vcmp.gt.f32.partialorder %v1390_v55, 0.0  ;;  %v1586_v58 = vmul.f32 0.2, %v1390_v55  ;;  %v1392_v59 = vadd.f32 %v1391_v56, %v4556_v20  ;;  %1995 = vmatmul.mubr.bf16.gmra.mxu0 %v1702_v41  ;;  %v1649_v32 = vsel %vm1521_vm1, %v1388_v48, %v1585_v6 }
 0x238   : > { %v1395_v63 = vpop.f32.mrf.mxu1 }
 0x239   : > { %vm1523_vm3 = vcmp.gt.f32.partialorder %v1392_v59, 0.0  ;;  %v1587_v2 = vmul.f32 0.2, %v1392_v59  ;;  %v1650_v15 = vsel %vm1522_vm0, %v1390_v55, %v1586_v58  ;;  %v1396_v17 = vadd.f32 %v1395_v63, %v4553_v16 }
 0x23a   : > { %v1397_v3 = vpop.f32.mrf.mxu1  ;;  %v1704_v10 = vpack.c.bf16 %v1650_v15, %v1648_v5 }
 0x23b   : > { %v1398_v60 = vadd.f32 %v1397_v3, %v4556_v20  ;;  %v1651_v30 = vsel %vm1523_vm3, %v1392_v59, %v1587_v2  ;;  %v1588_v24 = vmul.f32 0.2, %v1396_v17  ;;  %vm1524_vm6 = vcmp.gt.f32.partialorder %v1396_v17, 0.0 }
 0x23c   : > { %v1399_v7 = vpop.f32.mrf.mxu1  ;;  %v1705_v47 = vpack.c.bf16 %v1651_v30, %v1649_v32 }
 0x23d   : > { %v1400_v8 = vadd.f32 %v1399_v7, %v4553_v16  ;;  %v1589_v13 = vmul.f32 0.2, %v1398_v60  ;;  %vm1525_vm5 = vcmp.gt.f32.partialorder %v1398_v60, 0.0  ;;  %v1652_v31 = vsel %vm1524_vm6, %v1396_v17, %v1588_v24 }
 0x23e   : > { %v1401_v12 = vpop.f32.mrf.mxu1  ;;  %2004 = vmatprep.mubr.bf16.mxu0 %v1705_v47 }
 0x23f   : > { %vm1526_vm4 = vcmp.gt.f32.partialorder %v1400_v8, 0.0  ;;  %v1590_v21 = vmul.f32 0.2, %v1400_v8  ;;  %v1402_v22 = vadd.f32 %v1401_v12, %v4556_v20  ;;  %2005 = vmatmul.mubr.bf16.gmra.mxu0 %v1704_v10  ;;  %v1653_v51 = vsel %vm1525_vm5, %v1398_v60, %v1589_v13 }
 0x240   : > { %v1405_v26 = vpop.f32.mrf.mxu1 }
 0x241   : > { %vm1527_vm7 = vcmp.gt.f32.partialorder %v1402_v22, 0.0  ;;  %v1591_v27 = vmul.f32 0.2, %v1402_v22  ;;  %v1654_v28 = vsel %vm1526_vm4, %v1400_v8, %v1590_v21  ;;  %v1406_v40 = vadd.f32 %v1405_v26, %v4553_v16 }
 0x242   : > { %v1407_v61 = vpop.f32.mrf.mxu1  ;;  %v1706_v33 = vpack.c.bf16 %v1654_v28, %v1652_v31 }
 0x243   : > { %v1408_v36 = vadd.f32 %v1407_v61, %v4556_v20  ;;  %v1655_v25 = vsel %vm1527_vm7, %v1402_v22, %v1591_v27  ;;  %v1592_v19 = vmul.f32 0.2, %v1406_v40  ;;  %vm1528_vm10 = vcmp.gt.f32.partialorder %v1406_v40, 0.0 }
 0x244   : > { %v1409_v18 = vpop.f32.mrf.mxu1  ;;  %v1707_v29 = vpack.c.bf16 %v1655_v25, %v1653_v51 }
 0x245   : > { %v1410_v46 = vadd.f32 %v1409_v18, %v4553_v16  ;;  %v1593_v37 = vmul.f32 0.2, %v1408_v36  ;;  %vm1529_vm9 = vcmp.gt.f32.partialorder %v1408_v36, 0.0  ;;  %v1656_v50 = vsel %vm1528_vm10, %v1406_v40, %v1592_v19 }
 0x246   : > { %v1411_v35 = vpop.f32.mrf.mxu1  ;;  %2014 = vmatprep.mubr.bf16.mxu0 %v1707_v29 }
 0x247   : > { %vm1530_vm8 = vcmp.gt.f32.partialorder %v1410_v46, 0.0  ;;  %v1594_v11 = vmul.f32 0.2, %v1410_v46  ;;  %v1412_v38 = vadd.f32 %v1411_v35, %v4556_v20  ;;  %2015 = vmatmul.mubr.bf16.gmra.mxu0 %v1706_v33  ;;  %v1657_v1 = vsel %vm1529_vm9, %v1408_v36, %v1593_v37 }
 0x248   : > { %v1415_v39 = vpop.f32.mrf.mxu1 }
 0x249   : > { %vm1531_vm11 = vcmp.gt.f32.partialorder %v1412_v38, 0.0  ;;  %v1595_v9 = vmul.f32 0.2, %v1412_v38  ;;  %v1658_v42 = vsel %vm1530_vm8, %v1410_v46, %v1594_v11  ;;  %v1416_v48 = vadd.f32 %v1415_v39, %v4553_v16 }
 0x24a   : > { %v1417_v23 = vpop.f32.mrf.mxu1  ;;  %v1708_v45 = vpack.c.bf16 %v1658_v42, %v1656_v50 }
 0x24b   : > { %v1418_v43 = vadd.f32 %v1417_v23, %v4556_v20  ;;  %v1659_v44 = vsel %vm1531_vm11, %v1412_v38, %v1595_v9  ;;  %v1596_v41 = vmul.f32 0.2, %v1416_v48  ;;  %vm1532_vm14 = vcmp.gt.f32.partialorder %v1416_v48, 0.0 }
 0x24c   : > { %v1419_v34 = vpop.f32.mrf.mxu1  ;;  %v1709_v49 = vpack.c.bf16 %v1659_v44, %v1657_v1 }
 0x24d   : > { %v1420_v14 = vadd.f32 %v1419_v34, %v4553_v16  ;;  %v1597_v53 = vmul.f32 0.2, %v1418_v43  ;;  %vm1533_vm13 = vcmp.gt.f32.partialorder %v1418_v43, 0.0  ;;  %v1660_v60 = vsel %vm1532_vm14, %v1416_v48, %v1596_v41 }
 0x24e   : > { %v1421_v52 = vpop.f32.mrf.mxu1  ;;  %2024 = vmatprep.mubr.bf16.mxu0 %v1709_v49 }
 0x24f   : > { %vm1534_vm12 = vcmp.gt.f32.partialorder %v1420_v14, 0.0  ;;  %v1598_v54 = vmul.f32 0.2, %v1420_v14  ;;  %v1422_v55 = vadd.f32 %v1421_v52, %v4556_v20  ;;  %2025 = vmatmul.mubr.bf16.gmra.mxu0 %v1708_v45  ;;  %v1661_v62 = vsel %vm1533_vm13, %v1418_v43, %v1597_v53  ;;  %v3946_v52 = vld [vmem:[#allocation7 + $0x84] ss:$8 sps:$4 sm:$0xff]  }
 0x250   : > { %v1425_v56 = vpop.f32.mrf.mxu1  ;;  %2583 = vmatprep.subr.bf16.mxu1 %v3946_v52 }
 0x251   : > { %vm1535_vm15 = vcmp.gt.f32.partialorder %v1422_v55, 0.0  ;;  %v1599_v57 = vmul.f32 0.2, %v1422_v55  ;;  %v1662_v58 = vsel %vm1534_vm12, %v1420_v14, %v1598_v54  ;;  %v1426_v2 = vadd.f32 %v1425_v56, %v4553_v16  ;;  %v3944_v54 = vld [vmem:[#allocation7 + $0x80] ss:$8 sps:$4 sm:$0xff]  }
 0x252   : > { %v1427_v6 = vpop.f32.mrf.mxu1  ;;  %v1710_v30 = vpack.c.bf16 %v1662_v58, %v1660_v60  ;;  %2584 = vmatpush2.bf16.msra.mxu1 %v3944_v54 }
 0x253   : > { %v1428_v59 = vadd.f32 %v1427_v6, %v4556_v20  ;;  %v1663_v63 = vsel %vm1535_vm15, %v1422_v55, %v1599_v57  ;;  %v1600_v8 = vmul.f32 0.2, %v1426_v2  ;;  %vm1536_vm2 = vcmp.gt.f32.partialorder %v1426_v2, 0.0 }
 0x254   : > { %v1429_v3 = vpop.f32.mrf.mxu1  ;;  %v1711_v15 = vpack.c.bf16 %v1663_v63, %v1661_v62 }
 0x255   : > { %v1430_v32 = vadd.f32 %v1429_v3, %v4553_v16  ;;  %v1601_v7 = vmul.f32 0.2, %v1428_v59  ;;  %vm1537_vm1 = vcmp.gt.f32.partialorder %v1428_v59, 0.0  ;;  %v1664_v36 = vsel %vm1536_vm2, %v1426_v2, %v1600_v8 }
 0x256   : > { %v1431_v17 = vpop.f32.mrf.mxu1  ;;  %2034 = vmatprep.mubr.bf16.mxu0 %v1711_v15 }
 0x257   : > { %vm1538_vm0 = vcmp.gt.f32.partialorder %v1430_v32, 0.0  ;;  %v1602_v47 = vmul.f32 0.2, %v1430_v32  ;;  %v1432_v5 = vadd.f32 %v1431_v17, %v4556_v20  ;;  %2035 = vmatmul.mubr.bf16.gmra.mxu0 %v1710_v30  ;;  %v1665_v24 = vsel %vm1537_vm1, %v1428_v59, %v1601_v7 }
 0x258   : > { %v1435_v10 = vpop.f32.mrf.mxu1 }
 0x259   : > { %vm1539_vm3 = vcmp.gt.f32.partialorder %v1432_v5, 0.0  ;;  %v1603_v12 = vmul.f32 0.2, %v1432_v5  ;;  %v1666_v21 = vsel %vm1538_vm0, %v1430_v32, %v1602_v47  ;;  %v1436_v27 = vadd.f32 %v1435_v10, %v4553_v16 }
 0x25a   : > { %v1437_v13 = vpop.f32.mrf.mxu1  ;;  %v1712_v25 = vpack.c.bf16 %v1666_v21, %v1664_v36 }
 0x25b   : > { %v1438_v22 = vadd.f32 %v1437_v13, %v4556_v20  ;;  %v1667_v26 = vsel %vm1539_vm3, %v1432_v5, %v1603_v12  ;;  %v1604_v46 = vmul.f32 0.2, %v1436_v27  ;;  %vm1540_vm6 = vcmp.gt.f32.partialorder %v1436_v27, 0.0 }
 0x25c   : > { %v1439_v61 = vpop.f32.mrf.mxu1  ;;  %v1713_v28 = vpack.c.bf16 %v1667_v26, %v1665_v24 }
 0x25d   : > { %v1440_v51 = vadd.f32 %v1439_v61, %v4553_v16  ;;  %v1605_v18 = vmul.f32 0.2, %v1438_v22  ;;  %vm1541_vm5 = vcmp.gt.f32.partialorder %v1438_v22, 0.0  ;;  %v1668_v43 = vsel %vm1540_vm6, %v1436_v27, %v1604_v46 }
 0x25e   : > { %v1441_v40 = vpop.f32.mrf.mxu1  ;;  %2044 = vmatprep.mubr.bf16.mxu0 %v1713_v28 }
 0x25f   : > { %vm1542_vm4 = vcmp.gt.f32.partialorder %v1440_v51, 0.0  ;;  %v1606_v29 = vmul.f32 0.2, %v1440_v51  ;;  %v1442_v31 = vadd.f32 %v1441_v40, %v4556_v20  ;;  %2045 = vmatmul.mubr.bf16.gmra.mxu0 %v1712_v25  ;;  %v1669_v19 = vsel %vm1541_vm5, %v1438_v22, %v1605_v18 }
 0x260   : > { %v1445_v33 = vpop.f32.mrf.mxu1 }
 0x261   : > { %vm1543_vm7 = vcmp.gt.f32.partialorder %v1442_v31, 0.0  ;;  %v1607_v35 = vmul.f32 0.2, %v1442_v31  ;;  %v1670_v11 = vsel %vm1542_vm4, %v1440_v51, %v1606_v29  ;;  %v1446_v9 = vadd.f32 %v1445_v33, %v4553_v16 }
 0x262   : > { %v1447_v37 = vpop.f32.mrf.mxu1  ;;  %v1714_v44 = vpack.c.bf16 %v1670_v11, %v1668_v43 }
 0x263   : > { %v1448_v38 = vadd.f32 %v1447_v37, %v4556_v20  ;;  %v1671_v39 = vsel %vm1543_vm7, %v1442_v31, %v1607_v35  ;;  %v1608_v14 = vmul.f32 0.2, %v1446_v9  ;;  %vm1544_vm10 = vcmp.gt.f32.partialorder %v1446_v9, 0.0 }
 0x264   : > { %v1449_v23 = vpop.f32.mrf.mxu1  ;;  %v1715_v42 = vpack.c.bf16 %v1671_v39, %v1669_v19 }
 0x265   : > { %v1450_v1 = vadd.f32 %v1449_v23, %v4553_v16  ;;  %v1609_v34 = vmul.f32 0.2, %v1448_v38  ;;  %vm1545_vm9 = vcmp.gt.f32.partialorder %v1448_v38, 0.0  ;;  %v1672_v63 = vsel %vm1544_vm10, %v1446_v9, %v1608_v14 }
 0x266   : > { %v1451_v48 = vpop.f32.mrf.mxu1  ;;  %2054 = vmatprep.mubr.bf16.mxu0 %v1715_v42 }
 0x267   : > { %vm1546_vm8 = vcmp.gt.f32.partialorder %v1450_v1, 0.0  ;;  %v1610_v49 = vmul.f32 0.2, %v1450_v1  ;;  %v1452_v50 = vadd.f32 %v1451_v48, %v4556_v20  ;;  %2055 = vmatmul.mubr.bf16.gmra.mxu0 %v1714_v44  ;;  %v1673_v57 = vsel %vm1545_vm9, %v1448_v38, %v1609_v34 }
 0x268   : > { %v1455_v45 = vpop.f32.mrf.mxu1 }
 0x269   : > { %vm1547_vm11 = vcmp.gt.f32.partialorder %v1452_v50, 0.0  ;;  %v1611_v53 = vmul.f32 0.2, %v1452_v50  ;;  %v1674_v41 = vsel %vm1546_vm8, %v1450_v1, %v1610_v49  ;;  %v1456_v58 = vadd.f32 %v1455_v45, %v4553_v16 }
 0x26a   : > { %v1457_v55 = vpop.f32.mrf.mxu1  ;;  %v1716_v3 = vpack.c.bf16 %v1674_v41, %v1672_v63 }
 0x26b   : > { %v1458_v56 = vadd.f32 %v1457_v55, %v4556_v20  ;;  %v1675_v6 = vsel %vm1547_vm11, %v1452_v50, %v1611_v53  ;;  %v1612_v17 = vmul.f32 0.2, %v1456_v58  ;;  %vm1548_vm14 = vcmp.gt.f32.partialorder %v1456_v58, 0.0 }
 0x26c   : > { %v1459_v59 = vpop.f32.mrf.mxu1  ;;  %v1717_v62 = vpack.c.bf16 %v1675_v6, %v1673_v57 }
 0x26d   : > { %v1460_v2 = vadd.f32 %v1459_v59, %v4553_v16  ;;  %v1613_v60 = vmul.f32 0.2, %v1458_v56  ;;  %vm1549_vm13 = vcmp.gt.f32.partialorder %v1458_v56, 0.0  ;;  %v1676_v26 = vsel %vm1548_vm14, %v1456_v58, %v1612_v17 }
 0x26e   : > { %v1461_v15 = vpop.f32.mrf.mxu1  ;;  %2064 = vmatprep.mubr.bf16.mxu0 %v1717_v62 }
 0x26f   : > { %vm1550_vm12 = vcmp.gt.f32.partialorder %v1460_v2, 0.0  ;;  %v1614_v32 = vmul.f32 0.2, %v1460_v2  ;;  %v1462_v30 = vadd.f32 %v1461_v15, %v4556_v20  ;;  %2065 = vmatmul.mubr.bf16.gmra.mxu0 %v1716_v3  ;;  %v1677_v12 = vsel %vm1549_vm13, %v1458_v56, %v1613_v60 }
 0x270   : > { %v1465_v7 = vpop.f32.mrf.mxu1 }
 0x271   : > { %vm1551_vm15 = vcmp.gt.f32.partialorder %v1462_v30, 0.0  ;;  %v1615_v47 = vmul.f32 0.2, %v1462_v30  ;;  %v1678_v8 = vsel %vm1550_vm12, %v1460_v2, %v1614_v32  ;;  %v1466_v21 = vadd.f32 %v1465_v7, %v4553_v16 }
 0x272   : > { %v1467_v5 = vpop.f32.mrf.mxu1  ;;  %v1718_v61 = vpack.c.bf16 %v1678_v8, %v1676_v26 }
 0x273   : > { %v1468_v10 = vadd.f32 %v1467_v5, %v4556_v20  ;;  %v1679_v13 = vsel %vm1551_vm15, %v1462_v30, %v1615_v47  ;;  %v1616_v40 = vmul.f32 0.2, %v1466_v21  ;;  %vm1552_vm2 = vcmp.gt.f32.partialorder %v1466_v21, 0.0 }
 0x274   : > { %v1469_v22 = vpop.f32.mrf.mxu1  ;;  %v1719_v24 = vpack.c.bf16 %v1679_v13, %v1677_v12 }
 0x275   : > { %v1470_v27 = vadd.f32 %v1469_v22, %v4553_v16  ;;  %v1617_v36 = vmul.f32 0.2, %v1468_v10  ;;  %vm1553_vm1 = vcmp.gt.f32.partialorder %v1468_v10, 0.0  ;;  %v1680_v39 = vsel %vm1552_vm2, %v1466_v21, %v1616_v40 }
 0x276   : > { %v1471_v28 = vpop.f32.mrf.mxu1  ;;  %2074 = vmatprep.mubr.bf16.mxu0 %v1719_v24 }
 0x277   : > { %vm1554_vm0 = vcmp.gt.f32.partialorder %v1470_v27, 0.0  ;;  %v1618_v51 = vmul.f32 0.2, %v1470_v27  ;;  %v1472_v25 = vadd.f32 %v1471_v28, %v4556_v20  ;;  %2075 = vmatmul.mubr.bf16.gmra.mxu0 %v1718_v61  ;;  %v1681_v35 = vsel %vm1553_vm1, %v1468_v10, %v1617_v36 }
 0x278   : > { %v1475_v18 = vpop.f32.mrf.mxu1 }
 0x279   : > { %vm1555_vm3 = vcmp.gt.f32.partialorder %v1472_v25, 0.0  ;;  %v1619_v29 = vmul.f32 0.2, %v1472_v25  ;;  %v1682_v46 = vsel %vm1554_vm0, %v1470_v27, %v1618_v51  ;;  %v1476_v11 = vadd.f32 %v1475_v18, %v4553_v16  ;;  %v3947_v18 = vld [vmem:[%s4946_s9 + $0x78] sm:$0xff]  }
 0x27a   : > { %v1477_v31 = vpop.f32.mrf.mxu1  ;;  %v1720_v23 = vpack.c.bf16 %v1682_v46, %v1680_v39  ;;  %3560 = vmatprep.subr.bf16.mxu0 %v3947_v18  ;;  %v1760_v46 = vld [vmem:[%s4943_s6] sm:$0x3] }
 0x27b   : > { %v1478_v33 = vadd.f32 %v1477_v31, %v4556_v20  ;;  %v1683_v37 = vsel %vm1555_vm3, %v1472_v25, %v1619_v29  ;;  %v1620_v48 = vmul.f32 0.2, %v1476_v11  ;;  %vm1556_vm6 = vcmp.gt.f32.partialorder %v1476_v11, 0.0  ;;  %v3949_v29 = vld [vmem:[%s4946_s9 + $0x70] sm:$0xff]  }
 0x27c   : > { %v1479_v38 = vpop.f32.mrf.mxu1  ;;  %v1721_v19 = vpack.c.bf16 %v1683_v37, %v1681_v35  ;;  %v3950_v31 = vld [vmem:[%s4946_s9 + $0x30] sm:$0xff]   ;;  %v4641_v35 = vrot.slane %v1760_v46, %v4400_v4 }
 0x27d   : > { %v1480_v9 = vadd.f32 %v1479_v38, %v4553_v16  ;;  %v1621_v43 = vmul.f32 0.2, %v1478_v33  ;;  %vm1557_vm5 = vcmp.gt.f32.partialorder %v1478_v33, 0.0  ;;  %v1684_v56 = vsel %vm1556_vm6, %v1476_v11, %v1620_v48  ;;  %v3951_v38 = vld [vmem:[%s4946_s9 + $0x68] sm:$0xff]  }
 0x27e   : > { %v1481_v42 = vpop.f32.mrf.mxu1  ;;  %2084 = vmatprep.mubr.bf16.mxu0 %v1721_v19  ;;  %v3952_v19 = vld [vmem:[%s4946_s9 + $0x28] sm:$0xff]  }
 0x27f   : > { %vm1558_vm4 = vcmp.gt.f32.partialorder %v1480_v9, 0.0  ;;  %v1622_v1 = vmul.f32 0.2, %v1480_v9  ;;  %v1482_v44 = vadd.f32 %v1481_v42, %v4556_v20  ;;  %2085 = vmatmul.mubr.bf16.gmra.mxu0 %v1720_v23  ;;  %v1685_v52 = vsel %vm1557_vm5, %v1478_v33, %v1621_v43 }
 0x280   : > { %v1485_v34 = vpop.f32.mrf.mxu1  ;;  %v4638_v33 = vrot.slane %v1760_v46, %v4398_v0 }
 0x281   : > { %vm1559_vm7 = vcmp.gt.f32.partialorder %v1482_v44, 0.0  ;;  %v1623_v49 = vmul.f32 0.2, %v1482_v44  ;;  %v1686_v14 = vsel %vm1558_vm4, %v1480_v9, %v1622_v1  ;;  %v1486_v54 = vadd.f32 %v1485_v34, %v4553_v16  ;;  %v3953_v34 = vld [vmem:[%s4946_s9 + $0x60] sm:$0xff]  }
 0x282   : > { %v1487_v50 = vpop.f32.mrf.mxu1  ;;  %v1722_v6 = vpack.c.bf16 %v1686_v14, %v1684_v56 }
 0x283   : > { %v1488_v45 = vadd.f32 %v1487_v50, %v4556_v20  ;;  %v1687_v53 = vsel %vm1559_vm7, %v1482_v44, %v1623_v49  ;;  %v1624_v2 = vmul.f32 0.2, %v1486_v54  ;;  %vm1560_vm10 = vcmp.gt.f32.partialorder %v1486_v54, 0.0  ;;  %v3954_v49 = vld [vmem:[%s4946_s9 + $0x20] sm:$0xff]   ;;  %v3955_v50 = vld [vmem:[%s4946_s9 + $0x58] sm:$0xff]  }
 0x284   : > { %v1489_v55 = vpop.f32.mrf.mxu1  ;;  %v1723_v41 = vpack.c.bf16 %v1687_v53, %v1685_v52 }
 0x285   : > { %v1490_v57 = vadd.f32 %v1489_v55, %v4553_v16  ;;  %v1625_v59 = vmul.f32 0.2, %v1488_v45  ;;  %vm1561_vm9 = vcmp.gt.f32.partialorder %v1488_v45, 0.0  ;;  %v1688_v10 = vsel %vm1560_vm10, %v1486_v54, %v1624_v2  ;;  %v3956_v55 = vld [vmem:[%s4946_s9 + $0x18] sm:$0xff]  }
 0x286   : > { %v1491_v58 = vpop.f32.mrf.mxu1  ;;  %2094 = vmatprep.mubr.bf16.mxu0 %v1723_v41 }
 0x287   : > { %vm1562_vm8 = vcmp.gt.f32.partialorder %v1490_v57, 0.0  ;;  %v1626_v62 = vmul.f32 0.2, %v1490_v57  ;;  %v1492_v63 = vadd.f32 %v1491_v58, %v4556_v20  ;;  %2095 = vmatmul.mubr.bf16.gmra.mxu0 %v1722_v6  ;;  %v1689_v17 = vsel %vm1561_vm9, %v1488_v45, %v1625_v59  ;;  %v3957_v6 = vld [vmem:[%s4946_s9 + $0x50] sm:$0xff]  }
 0x288   : > { %v1495_v3 = vpop.f32.mrf.mxu1 }
 0x289   : > { %vm1563_vm11 = vcmp.gt.f32.partialorder %v1492_v63, 0.0  ;;  %v1627_v15 = vmul.f32 0.2, %v1492_v63  ;;  %v1690_v32 = vsel %vm1562_vm8, %v1490_v57, %v1626_v62  ;;  %v1496_v47 = vadd.f32 %v1495_v3, %v4553_v16 }
 0x28a   : > { %v1497_v60 = vpop.f32.mrf.mxu1  ;;  %v1724_v13 = vpack.c.bf16 %v1690_v32, %v1688_v10 }
 0x28b   : > { %v1498_v30 = vadd.f32 %v1497_v60, %v4556_v20  ;;  %v1691_v7 = vsel %vm1563_vm11, %v1492_v63, %v1627_v15  ;;  %v1628_v27 = vmul.f32 0.2, %v1496_v47  ;;  %vm1564_vm14 = vcmp.gt.f32.partialorder %v1496_v47, 0.0  ;;  %v3958_v60 = vld [vmem:[%s4946_s9 + $0x10] sm:$0xff]  }
 0x28c   : > { %v1499_v5 = vpop.f32.mrf.mxu1  ;;  %v1725_v8 = vpack.c.bf16 %v1691_v7, %v1689_v17  ;;  %v3959_v7 = vld [vmem:[%s4946_s9 + $0x48] sm:$0xff]  }
 0x28d   : > { %v1500_v12 = vadd.f32 %v1499_v5, %v4553_v16  ;;  %v1629_v22 = vmul.f32 0.2, %v1498_v30  ;;  %vm1565_vm13 = vcmp.gt.f32.partialorder %v1498_v30, 0.0  ;;  %v1692_v40 = vsel %vm1564_vm14, %v1496_v47, %v1628_v27 }
 0x28e   : > { %v1501_v21 = vpop.f32.mrf.mxu1  ;;  %2104 = vmatprep.mubr.bf16.mxu0 %v1725_v8 }
 0x28f   : > { %vm1566_vm12 = vcmp.gt.f32.partialorder %v1500_v12, 0.0  ;;  %v1630_v24 = vmul.f32 0.2, %v1500_v12  ;;  %v1502_v26 = vadd.f32 %v1501_v21, %v4556_v20  ;;  %2105 = vmatmul.mubr.bf16.gmra.mxu0 %v1724_v13  ;;  %v1693_v36 = vsel %vm1565_vm13, %v1498_v30, %v1629_v22  ;;  %v3948_v20 = vld [vmem:[%s4946_s9 + $0x38] sm:$0xff]   ;;  %v3960_v13 = vld [vmem:[%s4946_s9 + $0x8] sm:$0xff]  }
 0x290   : > { %3561 = vmatpush3.bf16.msra.mxu0 %v3948_v20 }
 0x291   : > { %vm1567_vm15 = vcmp.gt.f32.partialorder %v1502_v26, 0.0  ;;  %v1631_v61 = vmul.f32 0.2, %v1502_v26  ;;  %v1694_v28 = vsel %vm1566_vm12, %v1500_v12, %v1630_v24  ;;  %3562 = vmatprep.subr.bf16.mxu0 %v3949_v29 }
 0x292   : > { %v1726_v16 = vpack.c.bf16 %v1694_v28, %v1692_v40 }
 0x293   : > { %v1695_v51 = vsel %vm1567_vm15, %v1502_v26, %v1631_v61  ;;  %v3961_v26 = vld [vmem:[%s4946_s9 + $0x40] sm:$0xff]  }
 0x294   : > { %v1727_v25 = vpack.c.bf16 %v1695_v51, %v1693_v36  ;;  %3563 = vmatpush3.bf16.msra.mxu0 %v3950_v31 }
 0x295   : > { %3564 = vmatprep.subr.bf16.mxu0 %v3951_v38 }
 0x296   : > { %2114 = vmatprep.mubr.bf16.mxu0 %v1727_v25 }
 0x297   : > { %2115 = vmatmul.mubr.bf16.gmra.mxu0 %v1726_v16  ;;  %v3962_v16 = vld [vmem:[%s4946_s9] sm:$0xff]  }
 0x298   : > { %3565 = vmatpush3.bf16.msra.mxu0 %v3952_v19 }
 0x299   : > { %3566 = vmatprep.subr.bf16.mxu0 %v3953_v34 }
 0x29c   : > { %3567 = vmatpush3.bf16.msra.mxu0 %v3954_v49 }
 0x29d   : > { %3568 = vmatprep.subr.bf16.mxu0 %v3955_v50 }
 0x2a0   : > { %3569 = vmatpush3.bf16.msra.mxu0 %v3956_v55 }
 0x2a1   : > { %3570 = vmatprep.subr.bf16.mxu0 %v3957_v6 }
 0x2a4   : > { %3571 = vmatpush3.bf16.msra.mxu0 %v3958_v60 }
 0x2a5   : > { %3572 = vmatprep.subr.bf16.mxu0 %v3959_v7 }
 0x2a8   : > { %3573 = vmatpush3.bf16.msra.mxu0 %v3960_v13 }
 0x2a9   : > { %3574 = vmatprep.subr.bf16.mxu0 %v3961_v26 }
 0x2ac   : > { %3575 = vmatpush3.bf16.msra.mxu0 %v3962_v16 }
 0x2df   : > { %v1966_v37 = vpop.f32.mrf.mxu0 }
 0x2e0   : > { %v1967_v9 = vadd.f32 %v1966_v37, %v4641_v35 }
 0x2e1   : > { %v1968_v11 = vpop.f32.mrf.mxu0 }
 0x2e2   : > { %v1969_v39 = vadd.f32 %v1968_v11, %v4638_v33  ;;  %v2189_v14 = vmul.f32 0.2, %v1967_v9  ;;  %vm2125_vm2 = vcmp.gt.f32.partialorder %v1967_v9, 0.0 }
 0x2e3   : > { %v1970_v23 = vpop.f32.mrf.mxu0 }
 0x2e4   : > { %v1971_v42 = vadd.f32 %v1970_v23, %v4641_v35  ;;  %v2190_v43 = vmul.f32 0.2, %v1969_v39  ;;  %vm2126_vm1 = vcmp.gt.f32.partialorder %v1969_v39, 0.0  ;;  %v2253_v58 = vsel %vm2125_vm2, %v1967_v9, %v2189_v14 }
 0x2e5   : > { %v1972_v1 = vpop.f32.mrf.mxu0 }
 0x2e6   : > { %vm2127_vm0 = vcmp.gt.f32.partialorder %v1971_v42, 0.0  ;;  %v2191_v44 = vmul.f32 0.2, %v1971_v42  ;;  %v1973_v48 = vadd.f32 %v1972_v1, %v4638_v33  ;;  %v2254_v56 = vsel %vm2126_vm1, %v1969_v39, %v2190_v43 }
 0x2e7   : > { %v1976_v45 = vpop.f32.mrf.mxu0 }
 0x2e8   : > { %vm2128_vm3 = vcmp.gt.f32.partialorder %v1973_v48, 0.0  ;;  %v2192_v52 = vmul.f32 0.2, %v1973_v48  ;;  %v2255_v53 = vsel %vm2127_vm0, %v1971_v42, %v2191_v44  ;;  %v1977_v59 = vadd.f32 %v1976_v45, %v4641_v35 }
 0x2e9   : > { %v1978_v54 = vpop.f32.mrf.mxu0  ;;  %v2317_v2 = vpack.c.bf16 %v2255_v53, %v2253_v58 }
 0x2ea   : > { %v1979_v41 = vadd.f32 %v1978_v54, %v4638_v33  ;;  %v2256_v57 = vsel %vm2128_vm3, %v1973_v48, %v2192_v52  ;;  %v2193_v47 = vmul.f32 0.2, %v1977_v59  ;;  %vm2129_vm6 = vcmp.gt.f32.partialorder %v1977_v59, 0.0 }
 0x2eb   : > { %v1980_v62 = vpop.f32.mrf.mxu0  ;;  %v2318_v63 = vpack.c.bf16 %v2256_v57, %v2254_v56 }
 0x2ec   : > { %v1981_v3 = vadd.f32 %v1980_v62, %v4641_v35  ;;  %v2194_v32 = vmul.f32 0.2, %v1979_v41  ;;  %vm2130_vm5 = vcmp.gt.f32.partialorder %v1979_v41, 0.0  ;;  %v2257_v36 = vsel %vm2129_vm6, %v1977_v59, %v2193_v47 }
 0x2ed   : > { %v1982_v15 = vpop.f32.mrf.mxu0  ;;  %2585 = vmatprep.mubr.bf16.mxu1 %v2318_v63 }
 0x2ee   : > { %vm2131_vm4 = vcmp.gt.f32.partialorder %v1981_v3, 0.0  ;;  %v2195_v30 = vmul.f32 0.2, %v1981_v3  ;;  %v1983_v17 = vadd.f32 %v1982_v15, %v4638_v33  ;;  %2586 = vmatmul.mubr.bf16.vlgmr.msra.gmra.mxu1 %v2317_v2  ;;  %v2258_v22 = vsel %vm2130_vm5, %v1979_v41, %v2194_v32 }
 0x2ef   : > { %v1986_v5 = vpop.f32.mrf.mxu0 }
 0x2f0   : > { %vm2132_vm7 = vcmp.gt.f32.partialorder %v1983_v17, 0.0  ;;  %v2196_v8 = vmul.f32 0.2, %v1983_v17  ;;  %v2259_v12 = vsel %vm2131_vm4, %v1981_v3, %v2195_v30  ;;  %v1987_v27 = vadd.f32 %v1986_v5, %v4641_v35 }
 0x2f1   : > { %v1988_v10 = vpop.f32.mrf.mxu0  ;;  %v2319_v25 = vpack.c.bf16 %v2259_v12, %v2257_v36 }
 0x2f2   : > { %v1989_v21 = vadd.f32 %v1988_v10, %v4638_v33  ;;  %v2260_v24 = vsel %vm2132_vm7, %v1983_v17, %v2196_v8  ;;  %v2197_v31 = vmul.f32 0.2, %v1987_v27  ;;  %vm2133_vm10 = vcmp.gt.f32.partialorder %v1987_v27, 0.0 }
 0x2f3   : > { %v1990_v61 = vpop.f32.mrf.mxu0  ;;  %v2320_v28 = vpack.c.bf16 %v2260_v24, %v2258_v22 }
 0x2f4   : > { %v1991_v51 = vadd.f32 %v1990_v61, %v4641_v35  ;;  %v2198_v18 = vmul.f32 0.2, %v1989_v21  ;;  %vm2134_vm9 = vcmp.gt.f32.partialorder %v1989_v21, 0.0  ;;  %v2261_v1 = vsel %vm2133_vm10, %v1987_v27, %v2197_v31 }
 0x2f5   : > { %v1992_v40 = vpop.f32.mrf.mxu0  ;;  %2595 = vmatprep.mubr.bf16.mxu1 %v2320_v28 }
 0x2f6   : > { %vm2135_vm8 = vcmp.gt.f32.partialorder %v1991_v51, 0.0  ;;  %v2199_v20 = vmul.f32 0.2, %v1991_v51  ;;  %v1993_v29 = vadd.f32 %v1992_v40, %v4638_v33  ;;  %2596 = vmatmul.mubr.bf16.gmra.mxu1 %v2319_v25  ;;  %v2262_v39 = vsel %vm2134_vm9, %v1989_v21, %v2198_v18 }
 0x2f7   : > { %v1996_v46 = vpop.f32.mrf.mxu0 }
 0x2f8   : > { %vm2136_vm11 = vcmp.gt.f32.partialorder %v1993_v29, 0.0  ;;  %v2200_v37 = vmul.f32 0.2, %v1993_v29  ;;  %v2263_v38 = vsel %vm2135_vm8, %v1991_v51, %v2199_v20  ;;  %v1997_v23 = vadd.f32 %v1996_v46, %v4641_v35 }
 0x2f9   : > { %v1998_v11 = vpop.f32.mrf.mxu0  ;;  %v2321_v48 = vpack.c.bf16 %v2263_v38, %v2261_v1 }
 0x2fa   : > { %v1999_v19 = vadd.f32 %v1998_v11, %v4638_v33  ;;  %v2264_v9 = vsel %vm2136_vm11, %v1993_v29, %v2200_v37  ;;  %v2201_v45 = vmul.f32 0.2, %v1997_v23  ;;  %vm2137_vm14 = vcmp.gt.f32.partialorder %v1997_v23, 0.0 }
 0x2fb   : > { %v2000_v42 = vpop.f32.mrf.mxu0  ;;  %v2322_v43 = vpack.c.bf16 %v2264_v9, %v2262_v39 }
 0x2fc   : > { %v2001_v44 = vadd.f32 %v2000_v42, %v4641_v35  ;;  %v2202_v49 = vmul.f32 0.2, %v1999_v19  ;;  %vm2138_vm13 = vcmp.gt.f32.partialorder %v1999_v19, 0.0  ;;  %v2265_v62 = vsel %vm2137_vm14, %v1997_v23, %v2201_v45 }
 0x2fd   : > { %v2002_v34 = vpop.f32.mrf.mxu0  ;;  %2605 = vmatprep.mubr.bf16.mxu1 %v2322_v43 }
 0x2fe   : > { %vm2139_vm12 = vcmp.gt.f32.partialorder %v2001_v44, 0.0  ;;  %v2203_v50 = vmul.f32 0.2, %v2001_v44  ;;  %v2003_v14 = vadd.f32 %v2002_v34, %v4638_v33  ;;  %2606 = vmatmul.mubr.bf16.gmra.mxu1 %v2321_v48  ;;  %v2266_v56 = vsel %vm2138_vm13, %v1999_v19, %v2202_v49 }
 0x2ff   : > { %v2006_v52 = vpop.f32.mrf.mxu0 }
 0x300   : > { %vm2140_vm15 = vcmp.gt.f32.partialorder %v2003_v14, 0.0  ;;  %v2204_v53 = vmul.f32 0.2, %v2003_v14  ;;  %v2267_v55 = vsel %vm2139_vm12, %v2001_v44, %v2203_v50  ;;  %v2007_v6 = vadd.f32 %v2006_v52, %v4641_v35 }
 0x301   : > { %v2008_v54 = vpop.f32.mrf.mxu0  ;;  %v2323_v2 = vpack.c.bf16 %v2267_v55, %v2265_v62 }
 0x302   : > { %v2009_v41 = vadd.f32 %v2008_v54, %v4638_v33  ;;  %v2268_v57 = vsel %vm2140_vm15, %v2003_v14, %v2204_v53  ;;  %v2205_v30 = vmul.f32 0.2, %v2007_v6  ;;  %vm2141_vm2 = vcmp.gt.f32.partialorder %v2007_v6, 0.0 }
 0x303   : > { %v2010_v58 = vpop.f32.mrf.mxu0  ;;  %v2324_v59 = vpack.c.bf16 %v2268_v57, %v2266_v56 }
 0x304   : > { %v2011_v63 = vadd.f32 %v2010_v58, %v4641_v35  ;;  %v2206_v15 = vmul.f32 0.2, %v2009_v41  ;;  %vm2142_vm1 = vcmp.gt.f32.partialorder %v2009_v41, 0.0  ;;  %v2269_v13 = vsel %vm2141_vm2, %v2007_v6, %v2205_v30 }
 0x305   : > { %v2012_v3 = vpop.f32.mrf.mxu0  ;;  %2615 = vmatprep.mubr.bf16.mxu1 %v2324_v59 }
 0x306   : > { %vm2143_vm0 = vcmp.gt.f32.partialorder %v2011_v63, 0.0  ;;  %v2207_v60 = vmul.f32 0.2, %v2011_v63  ;;  %v2013_v32 = vadd.f32 %v2012_v3, %v4638_v33  ;;  %2616 = vmatmul.mubr.bf16.gmra.mxu1 %v2323_v2  ;;  %v2270_v10 = vsel %vm2142_vm1, %v2009_v41, %v2206_v15 }
 0x307   : > { %v2016_v17 = vpop.f32.mrf.mxu0 }
 0x308   : > { %vm2144_vm3 = vcmp.gt.f32.partialorder %v2013_v32, 0.0  ;;  %v2208_v7 = vmul.f32 0.2, %v2013_v32  ;;  %v2271_v47 = vsel %vm2143_vm0, %v2011_v63, %v2207_v60  ;;  %v2017_v21 = vadd.f32 %v2016_v17, %v4641_v35 }
 0x309   : > { %v2018_v5 = vpop.f32.mrf.mxu0  ;;  %v2325_v26 = vpack.c.bf16 %v2271_v47, %v2269_v13 }
 0x30a   : > { %v2019_v8 = vadd.f32 %v2018_v5, %v4638_v33  ;;  %v2272_v12 = vsel %vm2144_vm3, %v2013_v32, %v2208_v7  ;;  %v2209_v25 = vmul.f32 0.2, %v2017_v21  ;;  %vm2145_vm6 = vcmp.gt.f32.partialorder %v2017_v21, 0.0 }
 0x30b   : > { %v2020_v22 = vpop.f32.mrf.mxu0  ;;  %v2326_v24 = vpack.c.bf16 %v2272_v12, %v2270_v10 }
 0x30c   : > { %v2021_v27 = vadd.f32 %v2020_v22, %v4641_v35  ;;  %v2210_v28 = vmul.f32 0.2, %v2019_v8  ;;  %vm2146_vm5 = vcmp.gt.f32.partialorder %v2019_v8, 0.0  ;;  %v2273_v37 = vsel %vm2145_vm6, %v2017_v21, %v2209_v25 }
 0x30d   : > { %v2022_v61 = vpop.f32.mrf.mxu0  ;;  %2625 = vmatprep.mubr.bf16.mxu1 %v2326_v24 }
 0x30e   : > { %vm2147_vm4 = vcmp.gt.f32.partialorder %v2021_v27, 0.0  ;;  %v2211_v36 = vmul.f32 0.2, %v2021_v27  ;;  %v2023_v51 = vadd.f32 %v2022_v61, %v4638_v33  ;;  %2626 = vmatmul.mubr.bf16.gmra.mxu1 %v2325_v26  ;;  %v2274_v31 = vsel %vm2146_vm5, %v2019_v8, %v2210_v28 }
 0x30f   : > { %v2026_v40 = vpop.f32.mrf.mxu0 }
 0x310   : > { %vm2148_vm7 = vcmp.gt.f32.partialorder %v2023_v51, 0.0  ;;  %v2212_v16 = vmul.f32 0.2, %v2023_v51  ;;  %v2275_v18 = vsel %vm2147_vm4, %v2021_v27, %v2211_v36  ;;  %v2027_v11 = vadd.f32 %v2026_v40, %v4641_v35 }
 0x311   : > { %v2028_v20 = vpop.f32.mrf.mxu0  ;;  %v2327_v39 = vpack.c.bf16 %v2275_v18, %v2273_v37 }
 0x312   : > { %v2029_v29 = vadd.f32 %v2028_v20, %v4638_v33  ;;  %v2276_v46 = vsel %vm2148_vm7, %v2023_v51, %v2212_v16  ;;  %v2213_v44 = vmul.f32 0.2, %v2027_v11  ;;  %vm2149_vm10 = vcmp.gt.f32.partialorder %v2027_v11, 0.0 }
 0x313   : > { %v2030_v38 = vpop.f32.mrf.mxu0  ;;  %v2328_v19 = vpack.c.bf16 %v2276_v46, %v2274_v31 }
 0x314   : > { %v2031_v9 = vadd.f32 %v2030_v38, %v4641_v35  ;;  %v2214_v42 = vmul.f32 0.2, %v2029_v29  ;;  %vm2150_vm9 = vcmp.gt.f32.partialorder %v2029_v29, 0.0  ;;  %v2277_v53 = vsel %vm2149_vm10, %v2027_v11, %v2213_v44 }
 0x315   : > { %v2032_v23 = vpop.f32.mrf.mxu0  ;;  %2635 = vmatprep.mubr.bf16.mxu1 %v2328_v19 }
 0x316   : > { %vm2151_vm8 = vcmp.gt.f32.partialorder %v2031_v9, 0.0  ;;  %v2215_v43 = vmul.f32 0.2, %v2031_v9  ;;  %v2033_v1 = vadd.f32 %v2032_v23, %v4638_v33  ;;  %2636 = vmatmul.mubr.bf16.gmra.mxu1 %v2327_v39  ;;  %v2278_v45 = vsel %vm2150_vm9, %v2029_v29, %v2214_v42 }
 0x317   : > { %v2036_v48 = vpop.f32.mrf.mxu0 }
 0x318   : > { %vm2152_vm11 = vcmp.gt.f32.partialorder %v2033_v1, 0.0  ;;  %v2216_v34 = vmul.f32 0.2, %v2033_v1  ;;  %v2279_v49 = vsel %vm2151_vm8, %v2031_v9, %v2215_v43  ;;  %v2037_v54 = vadd.f32 %v2036_v48, %v4641_v35 }
 0x319   : > { %v2038_v50 = vpop.f32.mrf.mxu0  ;;  %v2329_v56 = vpack.c.bf16 %v2279_v49, %v2277_v53 }
 0x31a   : > { %v2039_v14 = vadd.f32 %v2038_v50, %v4638_v33  ;;  %v2280_v52 = vsel %vm2152_vm11, %v2033_v1, %v2216_v34  ;;  %v2217_v63 = vmul.f32 0.2, %v2037_v54  ;;  %vm2153_vm14 = vcmp.gt.f32.partialorder %v2037_v54, 0.0 }
 0x31b   : > { %v2040_v55 = vpop.f32.mrf.mxu0  ;;  %v2330_v41 = vpack.c.bf16 %v2280_v52, %v2278_v45 }
 0x31c   : > { %v2041_v57 = vadd.f32 %v2040_v55, %v4641_v35  ;;  %v2218_v58 = vmul.f32 0.2, %v2039_v14  ;;  %vm2154_vm13 = vcmp.gt.f32.partialorder %v2039_v14, 0.0  ;;  %v2281_v7 = vsel %vm2153_vm14, %v2037_v54, %v2217_v63 }
 0x31d   : > { %v2042_v6 = vpop.f32.mrf.mxu0  ;;  %2645 = vmatprep.mubr.bf16.mxu1 %v2330_v41 }
 0x31e   : > { %vm2155_vm12 = vcmp.gt.f32.partialorder %v2041_v57, 0.0  ;;  %v2219_v59 = vmul.f32 0.2, %v2041_v57  ;;  %v2043_v62 = vadd.f32 %v2042_v6, %v4638_v33  ;;  %2646 = vmatmul.mubr.bf16.gmra.mxu1 %v2329_v56  ;;  %v2282_v30 = vsel %vm2154_vm13, %v2039_v14, %v2218_v58 }
 0x31f   : > { %v2046_v2 = vpop.f32.mrf.mxu0 }
 0x320   : > { %vm2156_vm15 = vcmp.gt.f32.partialorder %v2043_v62, 0.0  ;;  %v2220_v3 = vmul.f32 0.2, %v2043_v62  ;;  %v2283_v15 = vsel %vm2155_vm12, %v2041_v57, %v2219_v59  ;;  %v2047_v47 = vadd.f32 %v2046_v2, %v4641_v35 }
 0x321   : > { %v2048_v60 = vpop.f32.mrf.mxu0  ;;  %v2331_v10 = vpack.c.bf16 %v2283_v15, %v2281_v7 }
 0x322   : > { %v2049_v32 = vadd.f32 %v2048_v60, %v4638_v33  ;;  %v2284_v17 = vsel %vm2156_vm15, %v2043_v62, %v2220_v3  ;;  %v2221_v26 = vmul.f32 0.2, %v2047_v47  ;;  %vm2157_vm2 = vcmp.gt.f32.partialorder %v2047_v47, 0.0 }
 0x323   : > { %v2050_v5 = vpop.f32.mrf.mxu0  ;;  %v2332_v8 = vpack.c.bf16 %v2284_v17, %v2282_v30 }
 0x324   : > { %v2051_v12 = vadd.f32 %v2050_v5, %v4641_v35  ;;  %v2222_v21 = vmul.f32 0.2, %v2049_v32  ;;  %vm2158_vm1 = vcmp.gt.f32.partialorder %v2049_v32, 0.0  ;;  %v2285_v16 = vsel %vm2157_vm2, %v2047_v47, %v2221_v26 }
 0x325   : > { %v2052_v13 = vpop.f32.mrf.mxu0  ;;  %2655 = vmatprep.mubr.bf16.mxu1 %v2332_v8 }
 0x326   : > { %vm2159_vm0 = vcmp.gt.f32.partialorder %v2051_v12, 0.0  ;;  %v2223_v22 = vmul.f32 0.2, %v2051_v12  ;;  %v2053_v24 = vadd.f32 %v2052_v13, %v4638_v33  ;;  %2656 = vmatmul.mubr.bf16.gmra.mxu1 %v2331_v10  ;;  %v2286_v25 = vsel %vm2158_vm1, %v2049_v32, %v2222_v21 }
 0x327   : > { %v2056_v27 = vpop.f32.mrf.mxu0 }
 0x328   : > { %vm2160_vm3 = vcmp.gt.f32.partialorder %v2053_v24, 0.0  ;;  %v2224_v61 = vmul.f32 0.2, %v2053_v24  ;;  %v2287_v28 = vsel %vm2159_vm0, %v2051_v12, %v2223_v22  ;;  %v2057_v18 = vadd.f32 %v2056_v27, %v4641_v35 }
 0x329   : > { %v2058_v36 = vpop.f32.mrf.mxu0  ;;  %v2333_v31 = vpack.c.bf16 %v2287_v28, %v2285_v16 }
 0x32a   : > { %v2059_v51 = vadd.f32 %v2058_v36, %v4638_v33  ;;  %v2288_v40 = vsel %vm2160_vm3, %v2053_v24, %v2224_v61  ;;  %v2225_v39 = vmul.f32 0.2, %v2057_v18  ;;  %vm2161_vm6 = vcmp.gt.f32.partialorder %v2057_v18, 0.0 }
 0x32b   : > { %v2060_v20 = vpop.f32.mrf.mxu0  ;;  %v2334_v29 = vpack.c.bf16 %v2288_v40, %v2286_v25 }
 0x32c   : > { %v2061_v46 = vadd.f32 %v2060_v20, %v4641_v35  ;;  %v2226_v11 = vmul.f32 0.2, %v2059_v51  ;;  %vm2162_vm5 = vcmp.gt.f32.partialorder %v2059_v51, 0.0  ;;  %v2289_v34 = vsel %vm2161_vm6, %v2057_v18, %v2225_v39 }
 0x32d   : > { %v2062_v37 = vpop.f32.mrf.mxu0  ;;  %2665 = vmatprep.mubr.bf16.mxu1 %v2334_v29 }
 0x32e   : > { %vm2163_vm4 = vcmp.gt.f32.partialorder %v2061_v46, 0.0  ;;  %v2227_v38 = vmul.f32 0.2, %v2061_v46  ;;  %v2063_v19 = vadd.f32 %v2062_v37, %v4638_v33  ;;  %2666 = vmatmul.mubr.bf16.gmra.mxu1 %v2333_v31  ;;  %v2290_v44 = vsel %vm2162_vm5, %v2059_v51, %v2226_v11 }
 0x32f   : > { %v2066_v9 = vpop.f32.mrf.mxu0 }
 0x330   : > { %vm2164_vm7 = vcmp.gt.f32.partialorder %v2063_v19, 0.0  ;;  %v2228_v23 = vmul.f32 0.2, %v2063_v19  ;;  %v2291_v42 = vsel %vm2163_vm4, %v2061_v46, %v2227_v38  ;;  %v2067_v49 = vadd.f32 %v2066_v9, %v4641_v35 }
 0x331   : > { %v2068_v43 = vpop.f32.mrf.mxu0  ;;  %v2335_v45 = vpack.c.bf16 %v2291_v42, %v2289_v34 }
 0x332   : > { %v2069_v1 = vadd.f32 %v2068_v43, %v4638_v33  ;;  %v2292_v48 = vsel %vm2164_vm7, %v2063_v19, %v2228_v23  ;;  %v2229_v56 = vmul.f32 0.2, %v2067_v49  ;;  %vm2165_vm10 = vcmp.gt.f32.partialorder %v2067_v49, 0.0 }
 0x333   : > { %v2070_v50 = vpop.f32.mrf.mxu0  ;;  %v2336_v14 = vpack.c.bf16 %v2292_v48, %v2290_v44 }
 0x334   : > { %v2071_v52 = vadd.f32 %v2070_v50, %v4641_v35  ;;  %v2230_v54 = vmul.f32 0.2, %v2069_v1  ;;  %vm2166_vm9 = vcmp.gt.f32.partialorder %v2069_v1, 0.0  ;;  %v2293_v3 = vsel %vm2165_vm10, %v2067_v49, %v2229_v56 }
 0x335   : > { %v2072_v53 = vpop.f32.mrf.mxu0  ;;  %2675 = vmatprep.mubr.bf16.mxu1 %v2336_v14 }
 0x336   : > { %vm2167_vm8 = vcmp.gt.f32.partialorder %v2071_v52, 0.0  ;;  %v2231_v55 = vmul.f32 0.2, %v2071_v52  ;;  %v2073_v41 = vadd.f32 %v2072_v53, %v4638_v33  ;;  %2676 = vmatmul.mubr.bf16.gmra.mxu1 %v2335_v45  ;;  %v2294_v63 = vsel %vm2166_vm9, %v2069_v1, %v2230_v54 }
 0x337   : > { %v2076_v57 = vpop.f32.mrf.mxu0 }
 0x338   : > { %vm2168_vm11 = vcmp.gt.f32.partialorder %v2073_v41, 0.0  ;;  %v2232_v6 = vmul.f32 0.2, %v2073_v41  ;;  %v2295_v58 = vsel %vm2167_vm8, %v2071_v52, %v2231_v55  ;;  %v2077_v15 = vadd.f32 %v2076_v57, %v4641_v35 }
 0x339   : > { %v2078_v59 = vpop.f32.mrf.mxu0  ;;  %v2337_v30 = vpack.c.bf16 %v2295_v58, %v2293_v3 }
 0x33a   : > { %v2079_v62 = vadd.f32 %v2078_v59, %v4638_v33  ;;  %v2296_v2 = vsel %vm2168_vm11, %v2073_v41, %v2232_v6  ;;  %v2233_v10 = vmul.f32 0.2, %v2077_v15  ;;  %vm2169_vm14 = vcmp.gt.f32.partialorder %v2077_v15, 0.0 }
 0x33b   : > { %v2080_v60 = vpop.f32.mrf.mxu0  ;;  %v2338_v32 = vpack.c.bf16 %v2296_v2, %v2294_v63 }
 0x33c   : > { %v2081_v17 = vadd.f32 %v2080_v60, %v4641_v35  ;;  %v2234_v47 = vmul.f32 0.2, %v2079_v62  ;;  %vm2170_vm13 = vcmp.gt.f32.partialorder %v2079_v62, 0.0  ;;  %v2297_v61 = vsel %vm2169_vm14, %v2077_v15, %v2233_v10 }
 0x33d   : > { %v2082_v7 = vpop.f32.mrf.mxu0  ;;  %2685 = vmatprep.mubr.bf16.mxu1 %v2338_v32 }
 0x33e   : > { %vm2171_vm12 = vcmp.gt.f32.partialorder %v2081_v17, 0.0  ;;  %v2235_v5 = vmul.f32 0.2, %v2081_v17  ;;  %v2083_v8 = vadd.f32 %v2082_v7, %v4638_v33  ;;  %2686 = vmatmul.mubr.bf16.gmra.mxu1 %v2337_v30  ;;  %v2298_v26 = vsel %vm2170_vm13, %v2079_v62, %v2234_v47 }
 0x33f   : > { %v2086_v12 = vpop.f32.mrf.mxu0 }
 0x340   : > { %vm2172_vm15 = vcmp.gt.f32.partialorder %v2083_v8, 0.0  ;;  %v2236_v13 = vmul.f32 0.2, %v2083_v8  ;;  %v2299_v21 = vsel %vm2171_vm12, %v2081_v17, %v2235_v5  ;;  %v2087_v28 = vadd.f32 %v2086_v12, %v4641_v35 }
 0x341   : > { %v2088_v22 = vpop.f32.mrf.mxu0  ;;  %v2339_v25 = vpack.c.bf16 %v2299_v21, %v2297_v61 }
 0x342   : > { %v2089_v24 = vadd.f32 %v2088_v22, %v4638_v33  ;;  %v2300_v27 = vsel %vm2172_vm15, %v2083_v8, %v2236_v13  ;;  %v2237_v31 = vmul.f32 0.2, %v2087_v28  ;;  %vm2173_vm2 = vcmp.gt.f32.partialorder %v2087_v28, 0.0 }
 0x343   : > { %v2090_v36 = vpop.f32.mrf.mxu0  ;;  %v2340_v51 = vpack.c.bf16 %v2300_v27, %v2298_v26 }
 0x344   : > { %v2091_v40 = vadd.f32 %v2090_v36, %v4641_v35  ;;  %v2238_v18 = vmul.f32 0.2, %v2089_v24  ;;  %vm2174_vm1 = vcmp.gt.f32.partialorder %v2089_v24, 0.0  ;;  %v2301_v23 = vsel %vm2173_vm2, %v2087_v28, %v2237_v31 }
 0x345   : > { %v2092_v16 = vpop.f32.mrf.mxu0  ;;  %2695 = vmatprep.mubr.bf16.mxu1 %v2340_v51 }
 0x346   : > { %vm2175_vm0 = vcmp.gt.f32.partialorder %v2091_v40, 0.0  ;;  %v2239_v20 = vmul.f32 0.2, %v2091_v40  ;;  %v2093_v29 = vadd.f32 %v2092_v16, %v4638_v33  ;;  %2696 = vmatmul.mubr.bf16.gmra.mxu1 %v2339_v25  ;;  %v2302_v39 = vsel %vm2174_vm1, %v2089_v24, %v2238_v18 }
 0x347   : > { %v2096_v46 = vpop.f32.mrf.mxu0 }
 0x348   : > { %vm2176_vm3 = vcmp.gt.f32.partialorder %v2093_v29, 0.0  ;;  %v2240_v37 = vmul.f32 0.2, %v2093_v29  ;;  %v2303_v11 = vsel %vm2175_vm0, %v2091_v40, %v2239_v20  ;;  %v2097_v42 = vadd.f32 %v2096_v46, %v4641_v35 }
 0x349   : > { %v2098_v38 = vpop.f32.mrf.mxu0  ;;  %v2341_v44 = vpack.c.bf16 %v2303_v11, %v2301_v23 }
 0x34a   : > { %v2099_v19 = vadd.f32 %v2098_v38, %v4638_v33  ;;  %v2304_v9 = vsel %vm2176_vm3, %v2093_v29, %v2240_v37  ;;  %v2241_v45 = vmul.f32 0.2, %v2097_v42  ;;  %vm2177_vm6 = vcmp.gt.f32.partialorder %v2097_v42, 0.0 }
 0x34b   : > { %v2100_v43 = vpop.f32.mrf.mxu0  ;;  %v2342_v1 = vpack.c.bf16 %v2304_v9, %v2302_v39 }
 0x34c   : > { %v2101_v48 = vadd.f32 %v2100_v43, %v4641_v35  ;;  %v2242_v49 = vmul.f32 0.2, %v2099_v19  ;;  %vm2178_vm5 = vcmp.gt.f32.partialorder %v2099_v19, 0.0  ;;  %v2305_v6 = vsel %vm2177_vm6, %v2097_v42, %v2241_v45 }
 0x34d   : > { %v2102_v34 = vpop.f32.mrf.mxu0  ;;  %2705 = vmatprep.mubr.bf16.mxu1 %v2342_v1 }
 0x34e   : > { %vm2179_vm4 = vcmp.gt.f32.partialorder %v2101_v48, 0.0  ;;  %v2243_v50 = vmul.f32 0.2, %v2101_v48  ;;  %v2103_v14 = vadd.f32 %v2102_v34, %v4638_v33  ;;  %2706 = vmatmul.mubr.bf16.gmra.mxu1 %v2341_v44  ;;  %v2306_v56 = vsel %vm2178_vm5, %v2099_v19, %v2242_v49 }
 0x34f   : > { %v2106_v52 = vpop.f32.mrf.mxu0 }
 0x350   : > { %vm2180_vm7 = vcmp.gt.f32.partialorder %v2103_v14, 0.0  ;;  %v2244_v53 = vmul.f32 0.2, %v2103_v14  ;;  %v2307_v54 = vsel %vm2179_vm4, %v2101_v48, %v2243_v50  ;;  %v2107_v58 = vadd.f32 %v2106_v52, %v4641_v35 }
 0x351   : > { %v2108_v55 = vpop.f32.mrf.mxu0  ;;  %v2343_v63 = vpack.c.bf16 %v2307_v54, %v2305_v6 }
 0x352   : > { %v2109_v41 = vadd.f32 %v2108_v55, %v4638_v33  ;;  %v2308_v57 = vsel %vm2180_vm7, %v2103_v14, %v2244_v53  ;;  %v2245_v30 = vmul.f32 0.2, %v2107_v58  ;;  %vm2181_vm10 = vcmp.gt.f32.partialorder %v2107_v58, 0.0 }
 0x353   : > { %v2110_v59 = vpop.f32.mrf.mxu0  ;;  %v2344_v62 = vpack.c.bf16 %v2308_v57, %v2306_v56 }
 0x354   : > { %v2111_v2 = vadd.f32 %v2110_v59, %v4641_v35  ;;  %v2246_v15 = vmul.f32 0.2, %v2109_v41  ;;  %vm2182_vm9 = vcmp.gt.f32.partialorder %v2109_v41, 0.0  ;;  %v2309_v13 = vsel %vm2181_vm10, %v2107_v58, %v2245_v30 }
 0x355   : > { %v2112_v3 = vpop.f32.mrf.mxu0  ;;  %2715 = vmatprep.mubr.bf16.mxu1 %v2344_v62 }
 0x356   : > { %vm2183_vm8 = vcmp.gt.f32.partialorder %v2111_v2, 0.0  ;;  %v2247_v60 = vmul.f32 0.2, %v2111_v2  ;;  %v2113_v32 = vadd.f32 %v2112_v3, %v4638_v33  ;;  %2716 = vmatmul.mubr.bf16.gmra.mxu1 %v2343_v63  ;;  %v2310_v10 = vsel %vm2182_vm9, %v2109_v41, %v2246_v15 }
 0x357   : > { %v2116_v17 = vpop.f32.mrf.mxu0 }
 0x358   : > { %vm2184_vm11 = vcmp.gt.f32.partialorder %v2113_v32, 0.0  ;;  %v2248_v7 = vmul.f32 0.2, %v2113_v32  ;;  %v2311_v47 = vsel %vm2183_vm8, %v2111_v2, %v2247_v60  ;;  %v2117_v21 = vadd.f32 %v2116_v17, %v4641_v35 }
 0x359   : > { %v2118_v5 = vpop.f32.mrf.mxu0  ;;  %v2345_v26 = vpack.c.bf16 %v2311_v47, %v2309_v13 }
 0x35a   : > { %v2119_v8 = vadd.f32 %v2118_v5, %v4638_v33  ;;  %v2312_v12 = vsel %vm2184_vm11, %v2113_v32, %v2248_v7  ;;  %v2249_v25 = vmul.f32 0.2, %v2117_v21  ;;  %vm2185_vm14 = vcmp.gt.f32.partialorder %v2117_v21, 0.0 }
 0x35b   : > { %v2120_v22 = vpop.f32.mrf.mxu0  ;;  %v2346_v24 = vpack.c.bf16 %v2312_v12, %v2310_v10 }
 0x35c   : > { %v2121_v27 = vadd.f32 %v2120_v22, %v4641_v35  ;;  %v2250_v28 = vmul.f32 0.2, %v2119_v8  ;;  %vm2186_vm13 = vcmp.gt.f32.partialorder %v2119_v8, 0.0  ;;  %v2313_v29 = vsel %vm2185_vm14, %v2117_v21, %v2249_v25  ;;  %v2381_v35 = vld [vmem:[%s4945_s8] sm:$0x3] }
 0x35d   : > { %v2122_v61 = vpop.f32.mrf.mxu0  ;;  %2725 = vmatprep.mubr.bf16.mxu1 %v2346_v24  ;;  %v4750_v37 = vrot.slane %v2381_v35, %v4400_v4 }
 0x35e   : > { %vm2187_vm12 = vcmp.gt.f32.partialorder %v2121_v27, 0.0  ;;  %v2251_v36 = vmul.f32 0.2, %v2121_v27  ;;  %v2123_v51 = vadd.f32 %v2122_v61, %v4638_v33  ;;  %2726 = vmatmul.mubr.bf16.gmra.mxu1 %v2345_v26  ;;  %v2314_v18 = vsel %vm2186_vm13, %v2119_v8, %v2250_v28 }
 0x35f   : > { %v4747_v33 = vrot.slane %v2381_v35, %v4398_v0 }
 0x360   : > { %vm2188_vm15 = vcmp.gt.f32.partialorder %v2123_v51, 0.0  ;;  %v2252_v40 = vmul.f32 0.2, %v2123_v51  ;;  %v2315_v16 = vsel %vm2187_vm12, %v2121_v27, %v2251_v36 }
 0x361   : > { %v2347_v46 = vpack.c.bf16 %v2315_v16, %v2313_v29 }
 0x362   : > { %v2316_v20 = vsel %vm2188_vm15, %v2123_v51, %v2252_v40 }
 0x363   : > { %v2348_v31 = vpack.c.bf16 %v2316_v20, %v2314_v18 }
 0x365   : > { %2735 = vmatprep.mubr.bf16.mxu1 %v2348_v31 }
 0x366   : > { %2736 = vmatmul.mubr.bf16.gmra.mxu1 %v2347_v46 }
 0x3ae   : > { %v2587_v11 = vpop.f32.mrf.mxu1 }
 0x3af   : > { %v2588_v39 = vadd.f32 %v2587_v11, %v4750_v37 }
 0x3b0   : > { %v2589_v38 = vpop.f32.mrf.mxu1 }
 0x3b1   : > { %v2590_v19 = vadd.f32 %v2589_v38, %v4747_v33  ;;  %v2810_v0 = vmul.f32 0.2, %v2588_v39  ;;  %vm2746_vm2 = vcmp.gt.f32.partialorder %v2588_v39, 0.0 }
 0x3b2   : > { %v2591_v9 = vpop.f32.mrf.mxu1 }
 0x3b3   : > { %v2592_v23 = vadd.f32 %v2591_v9, %v4750_v37  ;;  %v2811_v43 = vmul.f32 0.2, %v2590_v19  ;;  %vm2747_vm1 = vcmp.gt.f32.partialorder %v2590_v19, 0.0  ;;  %v2874_v52 = vsel %vm2746_vm2, %v2588_v39, %v2810_v0 }
 0x3b4   : > { %v2593_v42 = vpop.f32.mrf.mxu1 }
 0x3b5   : > { %vm2748_vm0 = vcmp.gt.f32.partialorder %v2592_v23, 0.0  ;;  %v2812_v1 = vmul.f32 0.2, %v2592_v23  ;;  %v2594_v44 = vadd.f32 %v2593_v42, %v4747_v33  ;;  %v2875_v14 = vsel %vm2747_vm1, %v2590_v19, %v2811_v43 }
 0x3b6   : > { %v2597_v48 = vpop.f32.mrf.mxu1 }
 0x3b7   : > { %vm2749_vm3 = vcmp.gt.f32.partialorder %v2594_v44, 0.0  ;;  %v2813_v4 = vmul.f32 0.2, %v2594_v44  ;;  %v2876_v34 = vsel %vm2748_vm0, %v2592_v23, %v2812_v1  ;;  %v2598_v53 = vadd.f32 %v2597_v48, %v4750_v37 }
 0x3b8   : > { %v2599_v49 = vpop.f32.mrf.mxu1  ;;  %v2938_v41 = vpack.c.bf16 %v2876_v34, %v2874_v52 }
 0x3b9   : > { %v2600_v50 = vadd.f32 %v2599_v49, %v4747_v33  ;;  %v2877_v45 = vsel %vm2749_vm3, %v2594_v44, %v2813_v4  ;;  %v2814_v62 = vmul.f32 0.2, %v2598_v53  ;;  %vm2750_vm6 = vcmp.gt.f32.partialorder %v2598_v53, 0.0 }
 0x3ba   : > { %v2601_v54 = vpop.f32.mrf.mxu1  ;;  %v2939_v55 = vpack.c.bf16 %v2877_v45, %v2875_v14 }
 0x3bb   : > { %v2602_v56 = vadd.f32 %v2601_v54, %v4750_v37  ;;  %v2815_v6 = vmul.f32 0.2, %v2600_v50  ;;  %vm2751_vm5 = vcmp.gt.f32.partialorder %v2600_v50, 0.0  ;;  %v2878_v5 = vsel %vm2750_vm6, %v2598_v53, %v2814_v62 }
 0x3bc   : > { %v2603_v57 = vpop.f32.mrf.mxu1  ;;  %3137 = vmatprep.mubr.bf16.mxu0 %v2939_v55 }
 0x3bd   : > { %vm2752_vm4 = vcmp.gt.f32.partialorder %v2602_v56, 0.0  ;;  %v2816_v58 = vmul.f32 0.2, %v2602_v56  ;;  %v2604_v59 = vadd.f32 %v2603_v57, %v4747_v33  ;;  %3138 = vmatmul.mubr.bf16.vlgmr.msra.gmra.mxu0 %v2938_v41  ;;  %v2879_v32 = vsel %vm2751_vm5, %v2600_v50, %v2815_v6 }
 0x3be   : > { %v2607_v63 = vpop.f32.mrf.mxu1 }
 0x3bf   : > { %vm2753_vm7 = vcmp.gt.f32.partialorder %v2604_v59, 0.0  ;;  %v2817_v2 = vmul.f32 0.2, %v2604_v59  ;;  %v2880_v15 = vsel %vm2752_vm4, %v2602_v56, %v2816_v58  ;;  %v2608_v17 = vadd.f32 %v2607_v63, %v4750_v37 }
 0x3c0   : > { %v2609_v3 = vpop.f32.mrf.mxu1  ;;  %v2940_v10 = vpack.c.bf16 %v2880_v15, %v2878_v5 }
 0x3c1   : > { %v2610_v60 = vadd.f32 %v2609_v3, %v4747_v33  ;;  %v2881_v30 = vsel %vm2753_vm7, %v2604_v59, %v2817_v2  ;;  %v2818_v24 = vmul.f32 0.2, %v2608_v17  ;;  %vm2754_vm10 = vcmp.gt.f32.partialorder %v2608_v17, 0.0 }
 0x3c2   : > { %v2611_v7 = vpop.f32.mrf.mxu1  ;;  %v2941_v47 = vpack.c.bf16 %v2881_v30, %v2879_v32 }
 0x3c3   : > { %v2612_v8 = vadd.f32 %v2611_v7, %v4750_v37  ;;  %v2819_v13 = vmul.f32 0.2, %v2610_v60  ;;  %vm2755_vm9 = vcmp.gt.f32.partialorder %v2610_v60, 0.0  ;;  %v2882_v20 = vsel %vm2754_vm10, %v2608_v17, %v2818_v24 }
 0x3c4   : > { %v2613_v12 = vpop.f32.mrf.mxu1  ;;  %3145 = vmatprep.mubr.bf16.mxu0 %v2941_v47 }
 0x3c5   : > { %vm2756_vm8 = vcmp.gt.f32.partialorder %v2612_v8, 0.0  ;;  %v2820_v21 = vmul.f32 0.2, %v2612_v8  ;;  %v2614_v22 = vadd.f32 %v2613_v12, %v4747_v33  ;;  %3146 = vmatmul.mubr.bf16.gmra.mxu0 %v2940_v10  ;;  %v2883_v51 = vsel %vm2755_vm9, %v2610_v60, %v2819_v13 }
 0x3c6   : > { %v2617_v26 = vpop.f32.mrf.mxu1 }
 0x3c7   : > { %vm2757_vm11 = vcmp.gt.f32.partialorder %v2614_v22, 0.0  ;;  %v2821_v27 = vmul.f32 0.2, %v2614_v22  ;;  %v2884_v28 = vsel %vm2756_vm8, %v2612_v8, %v2820_v21  ;;  %v2618_v40 = vadd.f32 %v2617_v26, %v4750_v37 }
 0x3c8   : > { %v2619_v61 = vpop.f32.mrf.mxu1  ;;  %v2942_v31 = vpack.c.bf16 %v2884_v28, %v2882_v20 }
 0x3c9   : > { %v2620_v36 = vadd.f32 %v2619_v61, %v4747_v33  ;;  %v2885_v25 = vsel %vm2757_vm11, %v2614_v22, %v2821_v27  ;;  %v2822_v19 = vmul.f32 0.2, %v2618_v40  ;;  %vm2758_vm14 = vcmp.gt.f32.partialorder %v2618_v40, 0.0 }
 0x3ca   : > { %v2621_v16 = vpop.f32.mrf.mxu1  ;;  %v2943_v18 = vpack.c.bf16 %v2885_v25, %v2883_v51 }
 0x3cb   : > { %v2622_v29 = vadd.f32 %v2621_v16, %v4750_v37  ;;  %v2823_v35 = vmul.f32 0.2, %v2620_v36  ;;  %vm2759_vm13 = vcmp.gt.f32.partialorder %v2620_v36, 0.0  ;;  %v2886_v34 = vsel %vm2758_vm14, %v2618_v40, %v2822_v19 }
 0x3cc   : > { %v2623_v46 = vpop.f32.mrf.mxu1  ;;  %3153 = vmatprep.mubr.bf16.mxu0 %v2943_v18 }
 0x3cd   : > { %vm2760_vm12 = vcmp.gt.f32.partialorder %v2622_v29, 0.0  ;;  %v2824_v11 = vmul.f32 0.2, %v2622_v29  ;;  %v2624_v38 = vadd.f32 %v2623_v46, %v4747_v33  ;;  %3154 = vmatmul.mubr.bf16.gmra.mxu0 %v2942_v31  ;;  %v2887_v1 = vsel %vm2759_vm13, %v2620_v36, %v2823_v35 }
 0x3ce   : > { %v2627_v39 = vpop.f32.mrf.mxu1 }
 0x3cf   : > { %vm2761_vm15 = vcmp.gt.f32.partialorder %v2624_v38, 0.0  ;;  %v2825_v9 = vmul.f32 0.2, %v2624_v38  ;;  %v2888_v42 = vsel %vm2760_vm12, %v2622_v29, %v2824_v11  ;;  %v2628_v0 = vadd.f32 %v2627_v39, %v4750_v37 }
 0x3d0   : > { %v2629_v23 = vpop.f32.mrf.mxu1  ;;  %v2944_v50 = vpack.c.bf16 %v2888_v42, %v2886_v34 }
 0x3d1   : > { %v2630_v43 = vadd.f32 %v2629_v23, %v4747_v33  ;;  %v2889_v44 = vsel %vm2761_vm15, %v2624_v38, %v2825_v9  ;;  %v2826_v54 = vmul.f32 0.2, %v2628_v0  ;;  %vm2762_vm2 = vcmp.gt.f32.partialorder %v2628_v0, 0.0 }
 0x3d2   : > { %v2631_v48 = vpop.f32.mrf.mxu1  ;;  %v2945_v4 = vpack.c.bf16 %v2889_v44, %v2887_v1 }
 0x3d3   : > { %v2632_v49 = vadd.f32 %v2631_v48, %v4750_v37  ;;  %v2827_v45 = vmul.f32 0.2, %v2630_v43  ;;  %vm2763_vm1 = vcmp.gt.f32.partialorder %v2630_v43, 0.0  ;;  %v2890_v62 = vsel %vm2762_vm2, %v2628_v0, %v2826_v54 }
 0x3d4   : > { %v2633_v14 = vpop.f32.mrf.mxu1  ;;  %3161 = vmatprep.mubr.bf16.mxu0 %v2945_v4 }
 0x3d5   : > { %vm2764_vm0 = vcmp.gt.f32.partialorder %v2632_v49, 0.0  ;;  %v2828_v52 = vmul.f32 0.2, %v2632_v49  ;;  %v2634_v53 = vadd.f32 %v2633_v14, %v4747_v33  ;;  %3162 = vmatmul.mubr.bf16.gmra.mxu0 %v2944_v50  ;;  %v2891_v58 = vsel %vm2763_vm1, %v2630_v43, %v2827_v45 }
 0x3d6   : > { %v2637_v55 = vpop.f32.mrf.mxu1 }
 0x3d7   : > { %vm2765_vm3 = vcmp.gt.f32.partialorder %v2634_v53, 0.0  ;;  %v2829_v41 = vmul.f32 0.2, %v2634_v53  ;;  %v2892_v56 = vsel %vm2764_vm0, %v2632_v49, %v2828_v52  ;;  %v2638_v63 = vadd.f32 %v2637_v55, %v4750_v37 }
 0x3d8   : > { %v2639_v57 = vpop.f32.mrf.mxu1  ;;  %v2946_v15 = vpack.c.bf16 %v2892_v56, %v2890_v62 }
 0x3d9   : > { %v2640_v6 = vadd.f32 %v2639_v57, %v4747_v33  ;;  %v2893_v59 = vsel %vm2765_vm3, %v2634_v53, %v2829_v41  ;;  %v2830_v47 = vmul.f32 0.2, %v2638_v63  ;;  %vm2766_vm6 = vcmp.gt.f32.partialorder %v2638_v63, 0.0 }
 0x3da   : > { %v2641_v2 = vpop.f32.mrf.mxu1  ;;  %v2947_v3 = vpack.c.bf16 %v2893_v59, %v2891_v58 }
 0x3db   : > { %v2642_v60 = vadd.f32 %v2641_v2, %v4750_v37  ;;  %v2831_v30 = vmul.f32 0.2, %v2640_v6  ;;  %vm2767_vm5 = vcmp.gt.f32.partialorder %v2640_v6, 0.0  ;;  %v2894_v24 = vsel %vm2766_vm6, %v2638_v63, %v2830_v47 }
 0x3dc   : > { %v2643_v32 = vpop.f32.mrf.mxu1  ;;  %3169 = vmatprep.mubr.bf16.mxu0 %v2947_v3 }
 0x3dd   : > { %vm2768_vm4 = vcmp.gt.f32.partialorder %v2642_v60, 0.0  ;;  %v2832_v17 = vmul.f32 0.2, %v2642_v60  ;;  %v2644_v7 = vadd.f32 %v2643_v32, %v4747_v33  ;;  %3170 = vmatmul.mubr.bf16.gmra.mxu0 %v2946_v15  ;;  %v2895_v21 = vsel %vm2767_vm5, %v2640_v6, %v2831_v30 }
 0x3de   : > { %v2647_v5 = vpop.f32.mrf.mxu1 }
 0x3df   : > { %vm2769_vm7 = vcmp.gt.f32.partialorder %v2644_v7, 0.0  ;;  %v2833_v8 = vmul.f32 0.2, %v2644_v7  ;;  %v2896_v10 = vsel %vm2768_vm4, %v2642_v60, %v2832_v17  ;;  %v2648_v26 = vadd.f32 %v2647_v5, %v4750_v37 }
 0x3e0   : > { %v2649_v12 = vpop.f32.mrf.mxu1  ;;  %v2948_v28 = vpack.c.bf16 %v2896_v10, %v2894_v24 }
 0x3e1   : > { %v2650_v13 = vadd.f32 %v2649_v12, %v4747_v33  ;;  %v2897_v22 = vsel %vm2769_vm7, %v2644_v7, %v2833_v8  ;;  %v2834_v18 = vmul.f32 0.2, %v2648_v26  ;;  %vm2770_vm10 = vcmp.gt.f32.partialorder %v2648_v26, 0.0 }
 0x3e2   : > { %v2651_v27 = vpop.f32.mrf.mxu1  ;;  %v2949_v61 = vpack.c.bf16 %v2897_v22, %v2895_v21 }
 0x3e3   : > { %v2652_v36 = vadd.f32 %v2651_v27, %v4750_v37  ;;  %v2835_v25 = vmul.f32 0.2, %v2650_v13  ;;  %vm2771_vm9 = vcmp.gt.f32.partialorder %v2650_v13, 0.0  ;;  %v2898_v19 = vsel %vm2770_vm10, %v2648_v26, %v2834_v18 }
 0x3e4   : > { %v2653_v51 = vpop.f32.mrf.mxu1  ;;  %3177 = vmatprep.mubr.bf16.mxu0 %v2949_v61 }
 0x3e5   : > { %vm2772_vm8 = vcmp.gt.f32.partialorder %v2652_v36, 0.0  ;;  %v2836_v40 = vmul.f32 0.2, %v2652_v36  ;;  %v2654_v16 = vadd.f32 %v2653_v51, %v4747_v33  ;;  %3178 = vmatmul.mubr.bf16.gmra.mxu0 %v2948_v28  ;;  %v2899_v11 = vsel %vm2771_vm9, %v2650_v13, %v2835_v25 }
 0x3e6   : > { %v2657_v20 = vpop.f32.mrf.mxu1 }
 0x3e7   : > { %vm2773_vm11 = vcmp.gt.f32.partialorder %v2654_v16, 0.0  ;;  %v2837_v29 = vmul.f32 0.2, %v2654_v16  ;;  %v2900_v31 = vsel %vm2772_vm8, %v2652_v36, %v2836_v40  ;;  %v2658_v39 = vadd.f32 %v2657_v20, %v4750_v37 }
 0x3e8   : > { %v2659_v46 = vpop.f32.mrf.mxu1  ;;  %v2950_v42 = vpack.c.bf16 %v2900_v31, %v2898_v19 }
 0x3e9   : > { %v2660_v35 = vadd.f32 %v2659_v46, %v4747_v33  ;;  %v2901_v38 = vsel %vm2773_vm11, %v2654_v16, %v2837_v29  ;;  %v2838_v4 = vmul.f32 0.2, %v2658_v39  ;;  %vm2774_vm14 = vcmp.gt.f32.partialorder %v2658_v39, 0.0 }
 0x3ea   : > { %v2661_v9 = vpop.f32.mrf.mxu1  ;;  %v2951_v23 = vpack.c.bf16 %v2901_v38, %v2899_v11 }
 0x3eb   : > { %v2662_v43 = vadd.f32 %v2661_v9, %v4750_v37  ;;  %v2839_v44 = vmul.f32 0.2, %v2660_v35  ;;  %vm2775_vm13 = vcmp.gt.f32.partialorder %v2660_v35, 0.0  ;;  %v2902_v54 = vsel %vm2774_vm14, %v2658_v39, %v2838_v4 }
 0x3ec   : > { %v2663_v1 = vpop.f32.mrf.mxu1  ;;  %3185 = vmatprep.mubr.bf16.mxu0 %v2951_v23 }
 0x3ed   : > { %vm2776_vm12 = vcmp.gt.f32.partialorder %v2662_v43, 0.0  ;;  %v2840_v0 = vmul.f32 0.2, %v2662_v43  ;;  %v2664_v48 = vadd.f32 %v2663_v1, %v4747_v33  ;;  %3186 = vmatmul.mubr.bf16.gmra.mxu0 %v2950_v42  ;;  %v2903_v52 = vsel %vm2775_vm13, %v2660_v35, %v2839_v44 }
 0x3ee   : > { %v2667_v34 = vpop.f32.mrf.mxu1 }
 0x3ef   : > { %vm2777_vm15 = vcmp.gt.f32.partialorder %v2664_v48, 0.0  ;;  %v2841_v49 = vmul.f32 0.2, %v2664_v48  ;;  %v2904_v50 = vsel %vm2776_vm12, %v2662_v43, %v2840_v0  ;;  %v2668_v55 = vadd.f32 %v2667_v34, %v4750_v37 }
 0x3f0   : > { %v2669_v14 = vpop.f32.mrf.mxu1  ;;  %v2952_v57 = vpack.c.bf16 %v2904_v50, %v2902_v54 }
 0x3f1   : > { %v2670_v45 = vadd.f32 %v2669_v14, %v4747_v33  ;;  %v2905_v53 = vsel %vm2777_vm15, %v2664_v48, %v2841_v49  ;;  %v2842_v2 = vmul.f32 0.2, %v2668_v55  ;;  %vm2778_vm2 = vcmp.gt.f32.partialorder %v2668_v55, 0.0 }
 0x3f2   : > { %v2671_v41 = vpop.f32.mrf.mxu1  ;;  %v2953_v56 = vpack.c.bf16 %v2905_v53, %v2903_v52 }
 0x3f3   : > { %v2672_v6 = vadd.f32 %v2671_v41, %v4750_v37  ;;  %v2843_v59 = vmul.f32 0.2, %v2670_v45  ;;  %vm2779_vm1 = vcmp.gt.f32.partialorder %v2670_v45, 0.0  ;;  %v2906_v47 = vsel %vm2778_vm2, %v2668_v55, %v2842_v2 }
 0x3f4   : > { %v2673_v58 = vpop.f32.mrf.mxu1  ;;  %3193 = vmatprep.mubr.bf16.mxu0 %v2953_v56 }
 0x3f5   : > { %vm2780_vm0 = vcmp.gt.f32.partialorder %v2672_v6, 0.0  ;;  %v2844_v62 = vmul.f32 0.2, %v2672_v6  ;;  %v2674_v63 = vadd.f32 %v2673_v58, %v4747_v33  ;;  %3194 = vmatmul.mubr.bf16.gmra.mxu0 %v2952_v57  ;;  %v2907_v17 = vsel %vm2779_vm1, %v2670_v45, %v2843_v59 }
 0x3f6   : > { %v2677_v3 = vpop.f32.mrf.mxu1 }
 0x3f7   : > { %vm2781_vm3 = vcmp.gt.f32.partialorder %v2674_v63, 0.0  ;;  %v2845_v15 = vmul.f32 0.2, %v2674_v63  ;;  %v2908_v60 = vsel %vm2780_vm0, %v2672_v6, %v2844_v62  ;;  %v2678_v5 = vadd.f32 %v2677_v3, %v4750_v37 }
 0x3f8   : > { %v2679_v32 = vpop.f32.mrf.mxu1  ;;  %v2954_v12 = vpack.c.bf16 %v2908_v60, %v2906_v47 }
 0x3f9   : > { %v2680_v30 = vadd.f32 %v2679_v32, %v4747_v33  ;;  %v2909_v7 = vsel %vm2781_vm3, %v2674_v63, %v2845_v15  ;;  %v2846_v27 = vmul.f32 0.2, %v2678_v5  ;;  %vm2782_vm6 = vcmp.gt.f32.partialorder %v2678_v5, 0.0 }
 0x3fa   : > { %v2681_v8 = vpop.f32.mrf.mxu1  ;;  %v2955_v10 = vpack.c.bf16 %v2909_v7, %v2907_v17 }
 0x3fb   : > { %v2682_v13 = vadd.f32 %v2681_v8, %v4750_v37  ;;  %v2847_v22 = vmul.f32 0.2, %v2680_v30  ;;  %vm2783_vm5 = vcmp.gt.f32.partialorder %v2680_v30, 0.0  ;;  %v2910_v18 = vsel %vm2782_vm6, %v2678_v5, %v2846_v27 }
 0x3fc   : > { %v2683_v21 = vpop.f32.mrf.mxu1  ;;  %3201 = vmatprep.mubr.bf16.mxu0 %v2955_v10 }
 0x3fd   : > { %vm2784_vm4 = vcmp.gt.f32.partialorder %v2682_v13, 0.0  ;;  %v2848_v24 = vmul.f32 0.2, %v2682_v13  ;;  %v2684_v26 = vadd.f32 %v2683_v21, %v4747_v33  ;;  %3202 = vmatmul.mubr.bf16.gmra.mxu0 %v2954_v12  ;;  %v2911_v40 = vsel %vm2783_vm5, %v2680_v30, %v2847_v22 }
 0x3fe   : > { %v2687_v61 = vpop.f32.mrf.mxu1 }
 0x3ff   : > { %vm2785_vm7 = vcmp.gt.f32.partialorder %v2684_v26, 0.0  ;;  %v2849_v28 = vmul.f32 0.2, %v2684_v26  ;;  %v2912_v36 = vsel %vm2784_vm4, %v2682_v13, %v2848_v24  ;;  %v2688_v20 = vadd.f32 %v2687_v61, %v4750_v37 }
 0x400   : > { %v2689_v51 = vpop.f32.mrf.mxu1  ;;  %v2956_v46 = vpack.c.bf16 %v2912_v36, %v2910_v18 }
 0x401   : > { %v2690_v25 = vadd.f32 %v2689_v51, %v4747_v33  ;;  %v2913_v16 = vsel %vm2785_vm7, %v2684_v26, %v2849_v28  ;;  %v2850_v9 = vmul.f32 0.2, %v2688_v20  ;;  %vm2786_vm10 = vcmp.gt.f32.partialorder %v2688_v20, 0.0 }
 0x402   : > { %v2691_v29 = vpop.f32.mrf.mxu1  ;;  %v2957_v31 = vpack.c.bf16 %v2913_v16, %v2911_v40 }
 0x403   : > { %v2692_v35 = vadd.f32 %v2691_v29, %v4750_v37  ;;  %v2851_v38 = vmul.f32 0.2, %v2690_v25  ;;  %vm2787_vm9 = vcmp.gt.f32.partialorder %v2690_v25, 0.0  ;;  %v2914_v4 = vsel %vm2786_vm10, %v2688_v20, %v2850_v9 }
 0x404   : > { %v2693_v11 = vpop.f32.mrf.mxu1  ;;  %3209 = vmatprep.mubr.bf16.mxu0 %v2957_v31 }
 0x405   : > { %vm2788_vm8 = vcmp.gt.f32.partialorder %v2692_v35, 0.0  ;;  %v2852_v19 = vmul.f32 0.2, %v2692_v35  ;;  %v2694_v39 = vadd.f32 %v2693_v11, %v4747_v33  ;;  %3210 = vmatmul.mubr.bf16.gmra.mxu0 %v2956_v46  ;;  %v2915_v0 = vsel %vm2787_vm9, %v2690_v25, %v2851_v38 }
 0x406   : > { %v2697_v23 = vpop.f32.mrf.mxu1 }
 0x407   : > { %vm2789_vm11 = vcmp.gt.f32.partialorder %v2694_v39, 0.0  ;;  %v2853_v42 = vmul.f32 0.2, %v2694_v39  ;;  %v2916_v43 = vsel %vm2788_vm8, %v2692_v35, %v2852_v19  ;;  %v2698_v34 = vadd.f32 %v2697_v23, %v4750_v37 }
 0x408   : > { %v2699_v1 = vpop.f32.mrf.mxu1  ;;  %v2958_v14 = vpack.c.bf16 %v2916_v43, %v2914_v4 }
 0x409   : > { %v2700_v44 = vadd.f32 %v2699_v1, %v4747_v33  ;;  %v2917_v48 = vsel %vm2789_vm11, %v2694_v39, %v2853_v42  ;;  %v2854_v41 = vmul.f32 0.2, %v2698_v34  ;;  %vm2790_vm14 = vcmp.gt.f32.partialorder %v2698_v34, 0.0 }
 0x40a   : > { %v2701_v49 = vpop.f32.mrf.mxu1  ;;  %v2959_v50 = vpack.c.bf16 %v2917_v48, %v2915_v0 }
 0x40b   : > { %v2702_v45 = vadd.f32 %v2701_v49, %v4750_v37  ;;  %v2855_v53 = vmul.f32 0.2, %v2700_v44  ;;  %vm2791_vm13 = vcmp.gt.f32.partialorder %v2700_v44, 0.0  ;;  %v2918_v2 = vsel %vm2790_vm14, %v2698_v34, %v2854_v41 }
 0x40c   : > { %v2703_v52 = vpop.f32.mrf.mxu1  ;;  %3217 = vmatprep.mubr.bf16.mxu0 %v2959_v50 }
 0x40d   : > { %vm2792_vm12 = vcmp.gt.f32.partialorder %v2702_v45, 0.0  ;;  %v2856_v54 = vmul.f32 0.2, %v2702_v45  ;;  %v2704_v55 = vadd.f32 %v2703_v52, %v4747_v33  ;;  %3218 = vmatmul.mubr.bf16.gmra.mxu0 %v2958_v14  ;;  %v2919_v62 = vsel %vm2791_vm13, %v2700_v44, %v2855_v53 }
 0x40e   : > { %v2707_v56 = vpop.f32.mrf.mxu1 }
 0x40f   : > { %vm2793_vm15 = vcmp.gt.f32.partialorder %v2704_v55, 0.0  ;;  %v2857_v57 = vmul.f32 0.2, %v2704_v55  ;;  %v2920_v6 = vsel %vm2792_vm12, %v2702_v45, %v2856_v54  ;;  %v2708_v3 = vadd.f32 %v2707_v56, %v4750_v37 }
 0x410   : > { %v2709_v58 = vpop.f32.mrf.mxu1  ;;  %v2960_v32 = vpack.c.bf16 %v2920_v6, %v2918_v2 }
 0x411   : > { %v2710_v59 = vadd.f32 %v2709_v58, %v4747_v33  ;;  %v2921_v63 = vsel %vm2793_vm15, %v2704_v55, %v2857_v57  ;;  %v2858_v8 = vmul.f32 0.2, %v2708_v3  ;;  %vm2794_vm2 = vcmp.gt.f32.partialorder %v2708_v3, 0.0 }
 0x412   : > { %v2711_v15 = vpop.f32.mrf.mxu1  ;;  %v2961_v60 = vpack.c.bf16 %v2921_v63, %v2919_v62 }
 0x413   : > { %v2712_v30 = vadd.f32 %v2711_v15, %v4750_v37  ;;  %v2859_v7 = vmul.f32 0.2, %v2710_v59  ;;  %vm2795_vm1 = vcmp.gt.f32.partialorder %v2710_v59, 0.0  ;;  %v2922_v27 = vsel %vm2794_vm2, %v2708_v3, %v2858_v8 }
 0x414   : > { %v2713_v17 = vpop.f32.mrf.mxu1  ;;  %3225 = vmatprep.mubr.bf16.mxu0 %v2961_v60 }
 0x415   : > { %vm2796_vm0 = vcmp.gt.f32.partialorder %v2712_v30, 0.0  ;;  %v2860_v47 = vmul.f32 0.2, %v2712_v30  ;;  %v2714_v5 = vadd.f32 %v2713_v17, %v4747_v33  ;;  %3226 = vmatmul.mubr.bf16.gmra.mxu0 %v2960_v32  ;;  %v2923_v24 = vsel %vm2795_vm1, %v2710_v59, %v2859_v7 }
 0x416   : > { %v2717_v10 = vpop.f32.mrf.mxu1 }
 0x417   : > { %vm2797_vm3 = vcmp.gt.f32.partialorder %v2714_v5, 0.0  ;;  %v2861_v12 = vmul.f32 0.2, %v2714_v5  ;;  %v2924_v13 = vsel %vm2796_vm0, %v2712_v30, %v2860_v47  ;;  %v2718_v61 = vadd.f32 %v2717_v10, %v4750_v37 }
 0x418   : > { %v2719_v21 = vpop.f32.mrf.mxu1  ;;  %v2962_v51 = vpack.c.bf16 %v2924_v13, %v2922_v27  ;;  %vm3266_vm0 = vcmask 523264  }
 0x419   : > { %v2720_v22 = vadd.f32 %v2719_v21, %v4747_v33  ;;  %v2925_v26 = vsel %vm2797_vm3, %v2714_v5, %v2861_v12  ;;  %v2862_v29 = vmul.f32 0.2, %v2718_v61  ;;  %vm2798_vm6 = vcmp.gt.f32.partialorder %v2718_v61, 0.0 }
 0x41a   : > { %v2721_v28 = vpop.f32.mrf.mxu1  ;;  %v2963_v36 = vpack.c.bf16 %v2925_v26, %v2923_v24 }
 0x41b   : > { %v2722_v25 = vadd.f32 %v2721_v28, %v4750_v37  ;;  %v2863_v16 = vmul.f32 0.2, %v2720_v22  ;;  %vm2799_vm5 = vcmp.gt.f32.partialorder %v2720_v22, 0.0  ;;  %v2926_v9 = vsel %vm2798_vm6, %v2718_v61, %v2862_v29 }
 0x41c   : > { %v2723_v40 = vpop.f32.mrf.mxu1  ;;  %3233 = vmatprep.mubr.bf16.mxu0 %v2963_v36 }
 0x41d   : > { %vm2800_vm4 = vcmp.gt.f32.partialorder %v2722_v25, 0.0  ;;  %v2864_v18 = vmul.f32 0.2, %v2722_v25  ;;  %v2724_v20 = vadd.f32 %v2723_v40, %v4747_v33  ;;  %3234 = vmatmul.mubr.bf16.gmra.mxu0 %v2962_v51  ;;  %v2927_v19 = vsel %vm2799_vm5, %v2720_v22, %v2863_v16 }
 0x41e   : > { %v2727_v31 = vpop.f32.mrf.mxu1 }
 0x41f   : > { %vm2801_vm7 = vcmp.gt.f32.partialorder %v2724_v20, 0.0  ;;  %v2865_v46 = vmul.f32 0.2, %v2724_v20  ;;  %v2928_v35 = vsel %vm2800_vm4, %v2722_v25, %v2864_v18  ;;  %v2728_v23 = vadd.f32 %v2727_v31, %v4750_v37 }
 0x420   : > { %v2729_v11 = vpop.f32.mrf.mxu1  ;;  %v2964_v1 = vpack.c.bf16 %v2928_v35, %v2926_v9 }
 0x421   : > { %v2730_v38 = vadd.f32 %v2729_v11, %v4747_v33  ;;  %v2929_v39 = vsel %vm2801_vm7, %v2724_v20, %v2865_v46  ;;  %v2866_v49 = vmul.f32 0.2, %v2728_v23  ;;  %vm2802_vm10 = vcmp.gt.f32.partialorder %v2728_v23, 0.0 }
 0x422   : > { %v2731_v42 = vpop.f32.mrf.mxu1  ;;  %v2965_v43 = vpack.c.bf16 %v2929_v39, %v2927_v19 }
 0x423   : > { %v2732_v44 = vadd.f32 %v2731_v42, %v4750_v37  ;;  %v2867_v48 = vmul.f32 0.2, %v2730_v38  ;;  %vm2803_vm9 = vcmp.gt.f32.partialorder %v2730_v38, 0.0  ;;  %v2930_v41 = vsel %vm2802_vm10, %v2728_v23, %v2866_v49 }
 0x424   : > { %v2733_v0 = vpop.f32.mrf.mxu1  ;;  %3241 = vmatprep.mubr.bf16.mxu0 %v2965_v43 }
 0x425   : > { %vm2804_vm8 = vcmp.gt.f32.partialorder %v2732_v44, 0.0  ;;  %v2868_v4 = vmul.f32 0.2, %v2732_v44  ;;  %v2734_v34 = vadd.f32 %v2733_v0, %v4747_v33  ;;  %3242 = vmatmul.mubr.bf16.gmra.mxu0 %v2964_v1  ;;  %v2931_v54 = vsel %vm2803_vm9, %v2730_v38, %v2867_v48 }
 0x426   : > { %v2737_v50 = vpop.f32.mrf.mxu1 }
 0x427   : > { %vm2805_vm11 = vcmp.gt.f32.partialorder %v2734_v34, 0.0  ;;  %v2869_v14 = vmul.f32 0.2, %v2734_v34  ;;  %v2932_v45 = vsel %vm2804_vm8, %v2732_v44, %v2868_v4  ;;  %v2738_v56 = vadd.f32 %v2737_v50, %v4750_v37 }
 0x428   : > { %v2739_v52 = vpop.f32.mrf.mxu1  ;;  %v2966_v58 = vpack.c.bf16 %v2932_v45, %v2930_v41 }
 0x429   : > { %v2740_v53 = vadd.f32 %v2739_v52, %v4747_v33  ;;  %v2933_v55 = vsel %vm2805_vm11, %v2734_v34, %v2869_v14  ;;  %v2870_v15 = vmul.f32 0.2, %v2738_v56  ;;  %vm2806_vm14 = vcmp.gt.f32.partialorder %v2738_v56, 0.0 }
 0x42a   : > { %v2741_v57 = vpop.f32.mrf.mxu1  ;;  %v2967_v6 = vpack.c.bf16 %v2933_v55, %v2931_v54 }
 0x42b   : > { %v2742_v59 = vadd.f32 %v2741_v57, %v4750_v37  ;;  %v2871_v63 = vmul.f32 0.2, %v2740_v53  ;;  %vm2807_vm13 = vcmp.gt.f32.partialorder %v2740_v53, 0.0  ;;  %v2934_v7 = vsel %vm2806_vm14, %v2738_v56, %v2870_v15 }
 0x42c   : > { %v2743_v62 = vpop.f32.mrf.mxu1  ;;  %3249 = vmatprep.mubr.bf16.mxu0 %v2967_v6 }
 0x42d   : > { %vm2808_vm12 = vcmp.gt.f32.partialorder %v2742_v59, 0.0  ;;  %v2872_v2 = vmul.f32 0.2, %v2742_v59  ;;  %v2744_v3 = vadd.f32 %v2743_v62, %v4747_v33  ;;  %3250 = vmatmul.mubr.bf16.gmra.mxu0 %v2966_v58  ;;  %v2935_v30 = vsel %vm2807_vm13, %v2740_v53, %v2871_v63  ;;  %v4821_v33 = vld [vmem:[%s4947_s10] ss:$0 sm:$0xff] }
 0x42f   : > { %vm2809_vm15 = vcmp.gt.f32.partialorder %v2744_v3, 0.0  ;;  %v2873_v60 = vmul.f32 0.2, %v2744_v3  ;;  %v2936_v32 = vsel %vm2808_vm12, %v2742_v59, %v2872_v2 }
 0x430   : > { %v2968_v37 = vpack.c.bf16 %v2936_v32, %v2934_v7 }
 0x431   : > { %v2937_v17 = vsel %vm2809_vm15, %v2744_v3, %v2873_v60 }
 0x432   : > { %v2969_v47 = vpack.c.bf16 %v2937_v17, %v2935_v30 }
 0x434   : > { %3257 = vmatprep.mubr.bf16.mxu0 %v2969_v47 }
 0x435   : > { %3258 = vmatmul.mubr.bf16.gmra.mxu0 %v2968_v37 }
 0x47d   : > { %v3576_v5 = vpop.f32.mrf.mxu0 }
 0x47f   : > { %v3577_v8 = vpop.f32.mrf.mxu0 }
 0x480   : > { %v3578_v10 = vadd.f32 %v3577_v8, %v3576_v5 }
 0x481   : > { %v3579_v12 = vpop.f32.mrf.mxu0 }
 0x482   : > { %v3140_v13 = vadd.f32 %v3578_v10, %v4821_v33 }
 0x483   : > { %v3580_v21 = vpop.f32.mrf.mxu0 }
 0x484   : > { %3267 = vst.msk [vmem:[%s4826_s23] sm:$0xff] %vm3266_vm0, %v3140_v13  ;;  %v3581_v22 = vadd.f32 %v3580_v21, %v3579_v12 }
 0x485   : > { %v3582_v24 = vpop.f32.mrf.mxu0 }
 0x486   : > { %v3143_v26 = vadd.f32 %v3581_v22, %v4821_v33 }
 0x487   : > { %v3583_v27 = vpop.f32.mrf.mxu0 }
 0x488   : > { %3268 = vst.msk [vmem:[%s4826_s23 + $0x8] sm:$0xff] %vm3266_vm0, %v3143_v26  ;;  %v3584_v61 = vadd.f32 %v3583_v27, %v3582_v24 }
 0x489   : > { %v3585_v28 = vpop.f32.mrf.mxu0 }
 0x48a   : > { %v3148_v36 = vadd.f32 %v3584_v61, %v4821_v33 }
 0x48b   : > { %v3586_v51 = vpop.f32.mrf.mxu0 }
 0x48c   : > { %3269 = vst.msk [vmem:[%s4826_s23 + $0x10] sm:$0xff] %vm3266_vm0, %v3148_v36  ;;  %v3587_v25 = vadd.f32 %v3586_v51, %v3585_v28 }
 0x48d   : > { %v3588_v40 = vpop.f32.mrf.mxu0 }
 0x48e   : > { %v3151_v16 = vadd.f32 %v3587_v25, %v4821_v33 }
 0x48f   : > { %v3589_v18 = vpop.f32.mrf.mxu0 }
 0x490   : > { %3270 = vst.msk [vmem:[%s4826_s23 + $0x18] sm:$0xff] %vm3266_vm0, %v3151_v16  ;;  %v3590_v20 = vadd.f32 %v3589_v18, %v3588_v40 }
 0x491   : > { %v3591_v29 = vpop.f32.mrf.mxu0 }
 0x492   : > { %v3156_v31 = vadd.f32 %v3590_v20, %v4821_v33 }
 0x493   : > { %v3592_v46 = vpop.f32.mrf.mxu0 }
 0x494   : > { %3271 = vst.msk [vmem:[%s4826_s23 + $0x20] sm:$0xff] %vm3266_vm0, %v3156_v31  ;;  %v3593_v35 = vadd.f32 %v3592_v46, %v3591_v29 }
 0x495   : > { %v3594_v11 = vpop.f32.mrf.mxu0 }
 0x496   : > { %v3159_v38 = vadd.f32 %v3593_v35, %v4821_v33 }
 0x497   : > { %v3595_v19 = vpop.f32.mrf.mxu0 }
 0x498   : > { %3272 = vst.msk [vmem:[%s4826_s23 + $0x28] sm:$0xff] %vm3266_vm0, %v3159_v38  ;;  %v3596_v39 = vadd.f32 %v3595_v19, %v3594_v11 }
 0x499   : > { %v3597_v9 = vpop.f32.mrf.mxu0 }
 0x49a   : > { %v3164_v23 = vadd.f32 %v3596_v39, %v4821_v33 }
 0x49b   : > { %v3598_v42 = vpop.f32.mrf.mxu0 }
 0x49c   : > { %3273 = vst.msk [vmem:[%s4826_s23 + $0x30] sm:$0xff] %vm3266_vm0, %v3164_v23  ;;  %v3599_v43 = vadd.f32 %v3598_v42, %v3597_v9 }
 0x49d   : > { %v3600_v1 = vpop.f32.mrf.mxu0 }
 0x49e   : > { %v3167_v44 = vadd.f32 %v3599_v43, %v4821_v33 }
 0x49f   : > { %v3601_v0 = vpop.f32.mrf.mxu0 }
 0x4a0   : > { %3274 = vst.msk [vmem:[%s4826_s23 + $0x38] sm:$0xff] %vm3266_vm0, %v3167_v44  ;;  %v3602_v48 = vadd.f32 %v3601_v0, %v3600_v1 }
 0x4a1   : > { %v3603_v4 = vpop.f32.mrf.mxu0 }
 0x4a2   : > { %v3172_v34 = vadd.f32 %v3602_v48, %v4821_v33 }
 0x4a3   : > { %v3604_v49 = vpop.f32.mrf.mxu0 }
 0x4a4   : > { %3275 = vst.msk [vmem:[%s4826_s23 + $0x40] sm:$0xff] %vm3266_vm0, %v3172_v34  ;;  %v3605_v50 = vadd.f32 %v3604_v49, %v3603_v4 }
 0x4a5   : > { %v3606_v14 = vpop.f32.mrf.mxu0 }
 0x4a6   : > { %v3175_v45 = vadd.f32 %v3605_v50, %v4821_v33 }
 0x4a7   : > { %v3607_v52 = vpop.f32.mrf.mxu0 }
 0x4a8   : > { %3276 = vst.msk [vmem:[%s4826_s23 + $0x48] sm:$0xff] %vm3266_vm0, %v3175_v45  ;;  %v3608_v53 = vadd.f32 %v3607_v52, %v3606_v14 }
 0x4a9   : > { %v3609_v54 = vpop.f32.mrf.mxu0 }
 0x4aa   : > { %v3180_v55 = vadd.f32 %v3608_v53, %v4821_v33 }
 0x4ab   : > { %v3610_v41 = vpop.f32.mrf.mxu0 }
 0x4ac   : > { %3277 = vst.msk [vmem:[%s4826_s23 + $0x50] sm:$0xff] %vm3266_vm0, %v3180_v55  ;;  %v3611_v56 = vadd.f32 %v3610_v41, %v3609_v54 }
 0x4ad   : > { %v3612_v57 = vpop.f32.mrf.mxu0 }
 0x4ae   : > { %v3183_v6 = vadd.f32 %v3611_v56, %v4821_v33 }
 0x4af   : > { %v3613_v58 = vpop.f32.mrf.mxu0 }
 0x4b0   : > { %3278 = vst.msk [vmem:[%s4826_s23 + $0x58] sm:$0xff] %vm3266_vm0, %v3183_v6  ;;  %v3614_v59 = vadd.f32 %v3613_v58, %v3612_v57 }
 0x4b1   : > { %v3615_v62 = vpop.f32.mrf.mxu0 }
 0x4b2   : > { %v3188_v63 = vadd.f32 %v3614_v59, %v4821_v33 }
 0x4b3   : > { %v3616_v2 = vpop.f32.mrf.mxu0 }
 0x4b4   : > { %3279 = vst.msk [vmem:[%s4826_s23 + $0x60] sm:$0xff] %vm3266_vm0, %v3188_v63  ;;  %v3617_v3 = vadd.f32 %v3616_v2, %v3615_v62 }
 0x4b5   : > { %v3618_v15 = vpop.f32.mrf.mxu0 }
 0x4b6   : > { %v3191_v60 = vadd.f32 %v3617_v3, %v4821_v33 }
 0x4b7   : > { %v3619_v32 = vpop.f32.mrf.mxu0 }
 0x4b8   : > { %3280 = vst.msk [vmem:[%s4826_s23 + $0x68] sm:$0xff] %vm3266_vm0, %v3191_v60  ;;  %v3620_v30 = vadd.f32 %v3619_v32, %v3618_v15 }
 0x4b9   : > { %v3621_v17 = vpop.f32.mrf.mxu0 }
 0x4ba   : > { %v3196_v7 = vadd.f32 %v3620_v30, %v4821_v33 }
 0x4bb   : > { %v3622_v47 = vpop.f32.mrf.mxu0 }
 0x4bc   : > { %3281 = vst.msk [vmem:[%s4826_s23 + $0x70] sm:$0xff] %vm3266_vm0, %v3196_v7  ;;  %v3623_v37 = vadd.f32 %v3622_v47, %v3621_v17 }
 0x4bd   : > { %v3624_v5 = vpop.f32.mrf.mxu0 }
 0x4be   : > { %v3199_v8 = vadd.f32 %v3623_v37, %v4821_v33 }
 0x4bf   : > { %v3625_v10 = vpop.f32.mrf.mxu0 }
 0x4c0   : > { %3282 = vst.msk [vmem:[%s4826_s23 + $0x78] sm:$0xff] %vm3266_vm0, %v3199_v8  ;;  %v3626_v12 = vadd.f32 %v3625_v10, %v3624_v5 }
 0x4c1   : > { %v3627_v13 = vpop.f32.mrf.mxu0 }
 0x4c2   : > { %v3204_v21 = vadd.f32 %v3626_v12, %v4821_v33 }
 0x4c3   : > { %v3628_v22 = vpop.f32.mrf.mxu0 }
 0x4c4   : > { %3283 = vst.msk [vmem:[%s4826_s23 + $0x80] sm:$0xff] %vm3266_vm0, %v3204_v21  ;;  %v3629_v24 = vadd.f32 %v3628_v22, %v3627_v13 }
 0x4c5   : > { %v3630_v26 = vpop.f32.mrf.mxu0 }
 0x4c6   : > { %v3207_v27 = vadd.f32 %v3629_v24, %v4821_v33 }
 0x4c7   : > { %v3631_v61 = vpop.f32.mrf.mxu0 }
 0x4c8   : > { %3284 = vst.msk [vmem:[%s4826_s23 + $0x88] sm:$0xff] %vm3266_vm0, %v3207_v27  ;;  %v3632_v28 = vadd.f32 %v3631_v61, %v3630_v26 }
 0x4c9   : > { %v3633_v36 = vpop.f32.mrf.mxu0 }
 0x4ca   : > { %v3212_v51 = vadd.f32 %v3632_v28, %v4821_v33 }
 0x4cb   : > { %v3634_v25 = vpop.f32.mrf.mxu0 }
 0x4cc   : > { %3285 = vst.msk [vmem:[%s4826_s23 + $0x90] sm:$0xff] %vm3266_vm0, %v3212_v51  ;;  %v3635_v40 = vadd.f32 %v3634_v25, %v3633_v36 }
 0x4cd   : > { %v3636_v16 = vpop.f32.mrf.mxu0 }
 0x4ce   : > { %v3215_v18 = vadd.f32 %v3635_v40, %v4821_v33 }
 0x4cf   : > { %v3637_v20 = vpop.f32.mrf.mxu0 }
 0x4d0   : > { %3286 = vst.msk [vmem:[%s4826_s23 + $0x98] sm:$0xff] %vm3266_vm0, %v3215_v18  ;;  %v3638_v29 = vadd.f32 %v3637_v20, %v3636_v16 }
 0x4d1   : > { %v3639_v31 = vpop.f32.mrf.mxu0 }
 0x4d2   : > { %v3220_v46 = vadd.f32 %v3638_v29, %v4821_v33 }
 0x4d3   : > { %v3640_v35 = vpop.f32.mrf.mxu0 }
 0x4d4   : > { %3287 = vst.msk [vmem:[%s4826_s23 + $0xa0] sm:$0xff] %vm3266_vm0, %v3220_v46  ;;  %v3641_v11 = vadd.f32 %v3640_v35, %v3639_v31 }
 0x4d5   : > { %v3642_v38 = vpop.f32.mrf.mxu0 }
 0x4d6   : > { %v3223_v19 = vadd.f32 %v3641_v11, %v4821_v33 }
 0x4d7   : > { %v3643_v39 = vpop.f32.mrf.mxu0 }
 0x4d8   : > { %3288 = vst.msk [vmem:[%s4826_s23 + $0xa8] sm:$0xff] %vm3266_vm0, %v3223_v19  ;;  %v3644_v9 = vadd.f32 %v3643_v39, %v3642_v38 }
 0x4d9   : > { %v3645_v23 = vpop.f32.mrf.mxu0 }
 0x4da   : > { %v3228_v42 = vadd.f32 %v3644_v9, %v4821_v33 }
 0x4db   : > { %v3646_v43 = vpop.f32.mrf.mxu0 }
 0x4dc   : > { %3289 = vst.msk [vmem:[%s4826_s23 + $0xb0] sm:$0xff] %vm3266_vm0, %v3228_v42  ;;  %v3647_v1 = vadd.f32 %v3646_v43, %v3645_v23 }
 0x4dd   : > { %v3648_v44 = vpop.f32.mrf.mxu0 }
 0x4de   : > { %v3231_v0 = vadd.f32 %v3647_v1, %v4821_v33 }
 0x4df   : > { %v3649_v48 = vpop.f32.mrf.mxu0 }
 0x4e0   : > { %3290 = vst.msk [vmem:[%s4826_s23 + $0xb8] sm:$0xff] %vm3266_vm0, %v3231_v0  ;;  %v3650_v4 = vadd.f32 %v3649_v48, %v3648_v44 }
 0x4e1   : > { %v3651_v34 = vpop.f32.mrf.mxu0 }
 0x4e2   : > { %v3236_v49 = vadd.f32 %v3650_v4, %v4821_v33 }
 0x4e3   : > { %v3652_v50 = vpop.f32.mrf.mxu0 }
 0x4e4   : > { %3291 = vst.msk [vmem:[%s4826_s23 + $0xc0] sm:$0xff] %vm3266_vm0, %v3236_v49  ;;  %v3653_v14 = vadd.f32 %v3652_v50, %v3651_v34 }
 0x4e5   : > { %v3654_v45 = vpop.f32.mrf.mxu0 }
 0x4e6   : > { %v3239_v52 = vadd.f32 %v3653_v14, %v4821_v33 }
 0x4e7   : > { %v3655_v53 = vpop.f32.mrf.mxu0 }
 0x4e8   : > { %3292 = vst.msk [vmem:[%s4826_s23 + $0xc8] sm:$0xff] %vm3266_vm0, %v3239_v52  ;;  %v3656_v54 = vadd.f32 %v3655_v53, %v3654_v45 }
 0x4e9   : > { %v3657_v55 = vpop.f32.mrf.mxu0 }
 0x4ea   : > { %v3244_v41 = vadd.f32 %v3656_v54, %v4821_v33 }
 0x4eb   : > { %v3658_v56 = vpop.f32.mrf.mxu0 }
 0x4ec   : > { %3293 = vst.msk [vmem:[%s4826_s23 + $0xd0] sm:$0xff] %vm3266_vm0, %v3244_v41  ;;  %v3659_v57 = vadd.f32 %v3658_v56, %v3657_v55 }
 0x4ed   : > { %v3660_v6 = vpop.f32.mrf.mxu0 }
 0x4ee   : > { %v3247_v58 = vadd.f32 %v3659_v57, %v4821_v33 }
 0x4ef   : > { %v3661_v59 = vpop.f32.mrf.mxu0 }
 0x4f0   : > { %3294 = vst.msk [vmem:[%s4826_s23 + $0xd8] sm:$0xff] %vm3266_vm0, %v3247_v58  ;;  %v3662_v62 = vadd.f32 %v3661_v59, %v3660_v6 }
 0x4f1   : > { %v3663_v63 = vpop.f32.mrf.mxu0 }
 0x4f2   : > { %v3252_v2 = vadd.f32 %v3662_v62, %v4821_v33 }
 0x4f3   : > { %v3664_v3 = vpop.f32.mrf.mxu0 }
 0x4f4   : > { %3295 = vst.msk [vmem:[%s4826_s23 + $0xe0] sm:$0xff] %vm3266_vm0, %v3252_v2  ;;  %v3665_v15 = vadd.f32 %v3664_v3, %v3663_v63 }
 0x4f5   : > { %v3666_v60 = vpop.f32.mrf.mxu0 }
 0x4f6   : > { %v3255_v32 = vadd.f32 %v3665_v15, %v4821_v33 }
 0x4f7   : > { %v3667_v30 = vpop.f32.mrf.mxu0 }
 0x4f8   : > { %3296 = vst.msk [vmem:[%s4826_s23 + $0xe8] sm:$0xff] %vm3266_vm0, %v3255_v32  ;;  %v3668_v17 = vadd.f32 %v3667_v30, %v3666_v60 }
 0x4f9   : > { %v3669_v7 = vpop.f32.mrf.mxu0 }
 0x4fa   : > { %v3260_v47 = vadd.f32 %v3668_v17, %v4821_v33 }
 0x4fb   : > { %v3670_v37 = vpop.f32.mrf.mxu0 }
 0x4fc   : > { %3297 = vst.msk [vmem:[%s4826_s23 + $0xf0] sm:$0xff] %vm3266_vm0, %v3260_v47  ;;  %v3671_v5 = vadd.f32 %v3670_v37, %v3669_v7 }
 0x4fe   : > { %v3263_v8 = vadd.f32 %v3671_v5, %v4821_v33 }
 0x500   : > { %3298 = vst.msk [vmem:[%s4826_s23 + $0xf8] sm:$0xff] %vm3266_vm0, %v3263_v8 }
 0x501 PF: > { %p23_p3 = scmp.ge.s32.totalorder %s4255_s29, 4   ;;  %s4967_s17 = smov %s4103_s18 }
 0x502   : > { %s4968_s18 = smov %s4107_s19  ;;  %s4969_s19 = smov %s4265_s27 }
 0x503   : > { %s4970_s20 = smov %s4255_s29  ;;  %25 = sbr.rel (!%p23_p3) target bundleno = 8 (0x8), region = 116 }
 0x508   :  { %3321 = vsyncpa [#allocation3], 1 }
 0x509   :  { %3323 = vsyncpa [#allocation3 + $0x1], 1 }
 0x50a   :  { %3324 = vsyncpa [#allocation5], 1 }
 0x50b   :  { %3325 = vsyncpa [#allocation8], 1 }

</bundles_post_ra>
